<compile_context>
chip_gen: v5e
topology: v5e:2x2
jax: 0.10.0
libtpu: 0.0.40
codegen_flags: <defaults>
</compile_context>

<pallas_src>
import functools

import jax
import jax.numpy as jnp
from jax import lax
from jax.experimental import pallas as pl
from jax.experimental.pallas import tpu as pltpu


# ----------------------------- Pallas kernel ------------------------------- #
def _patch_embed_kernel(p_ref, w_ref, b_ref, g_ref, beta_ref, o_ref, *, eps):
    # p_ref: (TM, Kpad)  bf16 patches tile
    # w_ref: (Kpad, E)   bf16 projection weight (resident across grid steps)
    # b_ref, g_ref, beta_ref: (1, E) f32  conv bias, LN gamma, LN beta
    # o_ref: (TM, E)     f32
    acc = jnp.dot(p_ref[...], w_ref[...], preferred_element_type=jnp.float32)
    acc = acc + b_ref[...]  # broadcast (1, E) over rows

    # LayerNorm over the embedding (last) dim, all in f32.
    mean = jnp.mean(acc, axis=-1, keepdims=True)
    centered = acc - mean
    var = jnp.mean(centered * centered, axis=-1, keepdims=True)
    xhat = centered * lax.rsqrt(var + eps)
    o_ref[...] = (xhat * g_ref[...] + beta_ref[...]).astype(o_ref.dtype)


def _pallas_proj_norm(patches, weight, bias, gamma, beta, *, eps=1e-5, tm=256):
    """patches: (M, Kpad) bf16.  weight: (Kpad, E) bf16.  Returns (M, E) f32."""
    M, Kpad = patches.shape
    _, E = weight.shape

    # Remainder handling: pad M up to a multiple of tm, slice afterwards.
    m_pad = pl.cdiv(M, tm) * tm
    if m_pad != M:
        patches = jnp.pad(patches, ((0, m_pad - M), (0, 0)))

    bias2 = bias.reshape(1, E).astype(jnp.float32)
    gamma2 = gamma.reshape(1, E).astype(jnp.float32)
    beta2 = beta.reshape(1, E).astype(jnp.float32)

    kernel = functools.partial(_patch_embed_kernel, eps=eps)
    out = pl.pallas_call(
        kernel,
        out_shape=jax.ShapeDtypeStruct((m_pad, E), jnp.float32),
        grid_spec=pltpu.PrefetchScalarGridSpec(
            num_scalar_prefetch=0,
            grid=(m_pad // tm,),
            in_specs=[
                pl.BlockSpec((tm, Kpad), lambda i: (i, 0)),
                pl.BlockSpec((Kpad, E), lambda i: (0, 0)),
                pl.BlockSpec((1, E), lambda i: (0, 0)),
                pl.BlockSpec((1, E), lambda i: (0, 0)),
                pl.BlockSpec((1, E), lambda i: (0, 0)),
            ],
            out_specs=pl.BlockSpec((tm, E), lambda i: (i, 0)),
        ),
        compiler_params=pltpu.CompilerParams(
            dimension_semantics=("parallel",),
            vmem_limit_bytes=64 << 20,
        ),
    )(patches, weight, bias2, gamma2, beta2)
    return out[:M]


# ------------------------------- JAX glue ----------------------------------- #
def overlap_patch_embed(x, conv_w, conv_b, ln_g, ln_b, *, stride=2, eps=1e-5, tm=256):
    """x: (B, C_in, D, H, W).  conv_w: (E, C_in, kd, kh, kw)."""
    B, C, Din, Hin, Win = x.shape
    E, _, kd, kh, kw = conv_w.shape
    pd, ph, pw = kd // 2, kh // 2, kw // 2

    Do = (Din + 2 * pd - kd) // stride + 1
    Ho = (Hin + 2 * ph - kh) // stride + 1
    Wo = (Win + 2 * pw - kw) // stride + 1
    N = Do * Ho * Wo
    K = kd * kh * kw * C

    # --- im2col directly in (B*N, K) order, feature axis last, bf16 ---------- #
    # NCDHW -> NDHWC, cast early so the materialized patches tensor is bf16.
    x_cl = jnp.transpose(x, (0, 2, 3, 4, 1)).astype(jnp.bfloat16)
    x_pad = jnp.pad(x_cl, ((0, 0), (pd, pd), (ph, ph), (pw, pw), (0, 0)))
    cols = []
    for i in range(kd):
        for j in range(kh):
            for k in range(kw):
                cols.append(
                    x_pad[:,
                          i:i + stride * Do:stride,
                          j:j + stride * Ho:stride,
                          k:k + stride * Wo:stride,
                          :]
                )
    # (B, Do, Ho, Wo, k^3, C) -> (B*N, K); feature ordering = (kd, kh, kw, C).
    patches = jnp.stack(cols, axis=4).reshape(B * N, K)

    # Weight (E, C, kd, kh, kw) -> (kd, kh, kw, C, E) -> (K, E): same ordering.
    w2 = jnp.transpose(conv_w, (2, 3, 4, 1, 0)).reshape(K, E).astype(jnp.bfloat16)

    # Zero-pad contraction dim K up to a multiple of 128 (lane-dense MXU feed).
    k_pad = pl.cdiv(K, 128) * 128
    if k_pad != K:
        patches = jnp.pad(patches, ((0, 0), (0, k_pad - K)))
        w2 = jnp.pad(w2, ((0, k_pad - K), (0, 0)))

    out = _pallas_proj_norm(patches, w2, conv_b, ln_g, ln_b, eps=eps, tm=tm)
    out = out.reshape(B, N, E)
    return out, Do, Ho, Wo


# ------------------------------ reference ----------------------------------- #
def _reference(x, conv_w, conv_b, ln_g, ln_b, *, stride=2, eps=1e-5):
    # Match the kernel's bf16 input quantization, accumulate in full f32.
    xq = x.astype(jnp.bfloat16).astype(jnp.float32)
    wq = conv_w.astype(jnp.bfloat16).astype(jnp.float32)
    kd = conv_w.shape[2]
    pad = kd // 2
    y = lax.conv_general_dilated(
        xq, wq,
        window_strides=(stride, stride, stride),
        padding=[(pad, pad)] * 3,
        dimension_numbers=("NCDHW", "OIDHW", "NCDHW"),
        precision=lax.Precision.HIGHEST,
    ) + conv_b.reshape(1, -1, 1, 1, 1)
    B, E = y.shape[0], y.shape[1]
    y = y.reshape(B, E, -1).transpose(0, 2, 1)  # (B, N, E)
    mean = jnp.mean(y, axis=-1, keepdims=True)
    var = jnp.mean((y - mean) ** 2, axis=-1, keepdims=True)
    return (y - mean) * lax.rsqrt(var + eps) * ln_g + ln_b


# -------------------------------- main --------------------------------------- #
if __name__ == "__main__":
    key = jax.random.PRNGKey(0)
    # SMT stage-2 OverlapPatchEmbed config (in_chans=embed_dims[0]=64, embed_dim=128)
    # at a small spatial volume.
    B, C_in, S = 2, 64, 16
    E, ksz, stride = 128, 3, 2

    k1, k2, k3, k4, k5 = jax.random.split(key, 5)
    x = jax.random.normal(k1, (B, C_in, S, S, S), dtype=jnp.float32)
    conv_w = jax.random.normal(k2, (E, C_in, ksz, ksz, ksz), dtype=jnp.float32) * 0.05
    conv_b = jax.random.normal(k3, (E,), dtype=jnp.float32) * 0.05
    ln_g = jnp.ones((E,), dtype=jnp.float32) + 0.1 * jax.random.normal(k4, (E,), jnp.float32)
    ln_b = 0.1 * jax.random.normal(k5, (E,), dtype=jnp.float32)

    out, Do, Ho, Wo = overlap_patch_embed(x, conv_w, conv_b, ln_g, ln_b, stride=stride)
    out = jax.block_until_ready(out)

    ref = _reference(x, conv_w, conv_b, ln_g, ln_b, stride=stride)
    assert out.shape == (B, Do * Ho * Wo, E), out.shape
    max_err = float(jnp.max(jnp.abs(out - ref)))
    assert jnp.allclose(out, ref, atol=1e-2, rtol=1e-2), max_err

    print("KERNEL_OK")
</pallas_src>

<mosaic_0001>
module attributes {stable_mosaic.version = 11 : i64} {
  func.func @_patch_embed_kernel(%arg0: i32, %arg1: memref<256x1792xbf16, #tpu.memory_space<vmem>>, %arg2: memref<1792x128xbf16, #tpu.memory_space<vmem>>, %arg3: memref<1x128xf32, #tpu.memory_space<vmem>>, %arg4: memref<1x128xf32, #tpu.memory_space<vmem>>, %arg5: memref<1x128xf32, #tpu.memory_space<vmem>>, %arg6: memref<256x128xf32, #tpu.memory_space<vmem>>) attributes {dimension_semantics = [#tpu.dimension_semantics<parallel>], iteration_bounds = array<i64: 4>, scalar_prefetch = 0 : i64, scratch_operands = 0 : i64, tpu.core_type = #tpu.core_type<tc>, window_params = [{transform_indices = @transform_0, window_bounds = array<i64: 256, 1792>}, {pipeline_mode = #tpu.pipeline_mode<synchronous>, transform_indices = @transform_1, window_bounds = array<i64: 1792, 128>}, {pipeline_mode = #tpu.pipeline_mode<synchronous>, transform_indices = @transform_2, window_bounds = array<i64: 1, 128>}, {pipeline_mode = #tpu.pipeline_mode<synchronous>, transform_indices = @transform_3, window_bounds = array<i64: 1, 128>}, {pipeline_mode = #tpu.pipeline_mode<synchronous>, transform_indices = @transform_4, window_bounds = array<i64: 1, 128>}, {transform_indices = @transform_5, window_bounds = array<i64: 256, 128>}]} {
    %c0 = arith.constant 0 : index
    %c0_0 = arith.constant 0 : index
    %0 = vector.load %arg1[%c0, %c0_0] : memref<256x1792xbf16, #tpu.memory_space<vmem>>, vector<256x1792xbf16>
    %c0_1 = arith.constant 0 : index
    %c0_2 = arith.constant 0 : index
    %1 = vector.load %arg2[%c0_1, %c0_2] : memref<1792x128xbf16, #tpu.memory_space<vmem>>, vector<1792x128xbf16>
    %cst = arith.constant dense<0.000000e+00> : vector<256x128xf32>
    %2 = tpu.matmul %0, %1, %cst {dimension_numbers = #tpu.dot_dimension_numbers<[1], [0], [0], [1], [0, 0, 1, 1], [], []>} : vector<256x1792xbf16>, vector<1792x128xbf16>, vector<256x128xf32> -> vector<256x128xf32>
    %c0_3 = arith.constant 0 : index
    %c0_4 = arith.constant 0 : index
    %3 = vector.load %arg3[%c0_3, %c0_4] : memref<1x128xf32, #tpu.memory_space<vmem>>, vector<1x128xf32>
    %4 = vector.broadcast %3 : vector<1x128xf32> to vector<256x128xf32>
    %5 = arith.addf %2, %4 : vector<256x128xf32>
    %cst_5 = arith.constant dense<0.000000e+00> : vector<256xf32>
    %6 = vector.multi_reduction <add>, %5, %cst_5 [1] : vector<256x128xf32> to vector<256xf32>
    %7 = vector.shape_cast %6 : vector<256xf32> to vector<256x1xf32>
    %cst_6 = arith.constant 1.280000e+02 : f32
    %8 = vector.broadcast %cst_6 : f32 to vector<256x1xf32>
    %9 = arith.divf %7, %8 : vector<256x1xf32>
    %10 = vector.broadcast %9 : vector<256x1xf32> to vector<256x128xf32>
    %11 = arith.subf %5, %10 : vector<256x128xf32>
    %12 = arith.mulf %11, %11 : vector<256x128xf32>
    %cst_7 = arith.constant dense<0.000000e+00> : vector<256xf32>
    %13 = vector.multi_reduction <add>, %12, %cst_7 [1] : vector<256x128xf32> to vector<256xf32>
    %14 = vector.shape_cast %13 : vector<256xf32> to vector<256x1xf32>
    %cst_8 = arith.constant 1.280000e+02 : f32
    %15 = vector.broadcast %cst_8 : f32 to vector<256x1xf32>
    %16 = arith.divf %14, %15 : vector<256x1xf32>
    %cst_9 = arith.constant 9.99999974E-6 : f32
    %17 = vector.broadcast %cst_9 : f32 to vector<256x1xf32>
    %18 = arith.addf %16, %17 : vector<256x1xf32>
    %19 = math.rsqrt %18 : vector<256x1xf32>
    %20 = vector.broadcast %19 : vector<256x1xf32> to vector<256x128xf32>
    %21 = arith.mulf %11, %20 : vector<256x128xf32>
    %c0_10 = arith.constant 0 : index
    %c0_11 = arith.constant 0 : index
    %22 = vector.load %arg4[%c0_10, %c0_11] : memref<1x128xf32, #tpu.memory_space<vmem>>, vector<1x128xf32>
    %23 = vector.broadcast %22 : vector<1x128xf32> to vector<256x128xf32>
    %24 = arith.mulf %21, %23 : vector<256x128xf32>
    %c0_12 = arith.constant 0 : index
    %c0_13 = arith.constant 0 : index
    %25 = vector.load %arg5[%c0_12, %c0_13] : memref<1x128xf32, #tpu.memory_space<vmem>>, vector<1x128xf32>
    %26 = vector.broadcast %25 : vector<1x128xf32> to vector<256x128xf32>
    %27 = arith.addf %24, %26 : vector<256x128xf32>
    %c0_14 = arith.constant 0 : index
    %c0_15 = arith.constant 0 : index
    %28 = vector.load %arg6[%c0_14, %c0_15] : memref<256x128xf32, #tpu.memory_space<vmem>>, vector<256x128xf32>
    tpu.vector_store %arg6[%c0_14, %c0_15], %27 {strides = array<i32>} : memref<256x128xf32, #tpu.memory_space<vmem>>, vector<256x128xf32>,
    return
  }
  func.func @transform_0(%arg0: i32) -> (i32, i32) {
    %c0_i32 = arith.constant 0 : i32
    %c0_i32_0 = arith.constant 0 : i32
    return %arg0, %c0_i32 : i32, i32
  }
  func.func @transform_1(%arg0: i32) -> (i32, i32) {
    %c0_i32 = arith.constant 0 : i32
    %c0_i32_0 = arith.constant 0 : i32
    %c0_i32_1 = arith.constant 0 : i32
    return %c0_i32, %c0_i32_0 : i32, i32
  }
  func.func @transform_2(%arg0: i32) -> (i32, i32) {
    %c0_i32 = arith.constant 0 : i32
    %c0_i32_0 = arith.constant 0 : i32
    %c0_i32_1 = arith.constant 0 : i32
    return %c0_i32, %c0_i32_0 : i32, i32
  }
  func.func @transform_3(%arg0: i32) -> (i32, i32) {
    %c0_i32 = arith.constant 0 : i32
    %c0_i32_0 = arith.constant 0 : i32
    %c0_i32_1 = arith.constant 0 : i32
    return %c0_i32, %c0_i32_0 : i32, i32
  }
  func.func @transform_4(%arg0: i32) -> (i32, i32) {
    %c0_i32 = arith.constant 0 : i32
    %c0_i32_0 = arith.constant 0 : i32
    %c0_i32_1 = arith.constant 0 : i32
    return %c0_i32, %c0_i32_0 : i32, i32
  }
  func.func @transform_5(%arg0: i32) -> (i32, i32) {
    %c0_i32 = arith.constant 0 : i32
    %c0_i32_0 = arith.constant 0 : i32
    return %arg0, %c0_i32 : i32, i32
  }
}

</mosaic_0001>

<bundles_post_ra>
// kernel: tpu_custom_call.1
= control target key start
LH: loop header
LB: loop body
LE: loop exit
PB: predicated region body
PF: predicated region fallthrough
CT: control target
= control target key end

     0   :  { %s8224_s0 = inlined_call_operand.hbm [shape: bf16[1024,1792], index: 0, kind: input, shape index: {}]   ;;  %s8225_s1 = inlined_call_operand.hbm [shape: bf16[1792,128], index: 1, kind: input, shape index: {}]   ;;  %s8226_s2 = inlined_call_operand.hbm [shape: f32[1,128], index: 2, kind: input, shape index: {}]   ;;  %s8227_s3 = inlined_call_operand.hbm [shape: f32[1,128], index: 3, kind: input, shape index: {}]   ;;  %s8228_s4 = inlined_call_operand.hbm [shape: f32[1,128], index: 4, kind: input, shape index: {}]   ;;  %s8229_s5 = inlined_call_operand.hbm [shape: f32[1024,128], index: 5, kind: output, shape index: {}]  }
   0x1   :  { %8230 = sst [smem:[#allocation16_spill]] %s8225_s1 }
   0x2   :  { %10 = vsyncpa [#allocation3], 0 }
   0x3   :  { %12 = vsyncpa [#allocation3 + $0x1], 0 }
   0x4   :  { %13 = vsyncpa [#allocation6], 0 }
   0x5   :  { %14 = vsyncpa [#allocation9], 0 }
   0x6   :  { %15 = vsyncpa [#allocation4], 0 }
   0x7   :  { %17 = vsyncpa [#allocation4 + $0x1], 0  ;;  %s6829_s18 = smov 0   ;;  %s6831_s19 = smov 0  }
   0x8   :  { %s6833_s20 = smov 0   ;;  %s6835_s21 = smov 0  }
   0x9 LB: > { %s6850_s22 = sadd.s32 4294967295, %s6786_s21   ;;  %s4676_s23 = sadd.s32 4294967294, %s6786_s21   ;;  %s6786_s21 = sphi %s6835_s21, %s8241_s21   ;;  %s6782_s20 = sphi %s6833_s20, %s8240_s20   ;;  %s6778_s19 = sphi %s6831_s19, %s8239_s19   ;;  %s6774_s18 = sphi %s6829_s18, %s8238_s18  }
   0xa   : > { %p43_p0 = scmp.ne.s32.totalorder %s6778_s19, %s6774_s18  ;;  %p44_p1 = scmp.eq.s32.totalorder %s6850_s22, 0 }
   0xb   : > { %p151_p2 = scmp.eq.s32.totalorder %s6850_s22, 3  ;;  %p157_p3 = scmp.eq.s32.totalorder %s4676_s23, 3 }
   0xc   : > { %p6859_p4 = por %p44_p1, %p43_p0  ;;  %p4677_p5 = scmp.ge.s32.totalorder %s6786_s21, 1 }
   0xd   : > { %p6864_p6 = por %p157_p3, %p43_p0  ;;  %p164_p7 = scmp.lt.s32.totalorder %s6786_s21, 5 }
   0xe   : > { %s8233_s1 = sld [smem:[#allocation16_spill]]  ;;  %s6788_s30 = smov [#allocation5]  }
   0xf   : > { %p6872_p8 = pnand %p4677_p5, %p164_p7  ;;  %s177_s6 = sshll.u32 %s6788_s30, 4  ;;  %s178_s6 = int_to_ptr.vmem [resolvable:$true] %s177_s6 }
  0x10   : > { %s202_s10 = sshll.u32 %s8227_s3, 4  ;;  %s6789_s11 = smov 64   ;;  %s203_s10 = int_to_ptr.hbm [resolvable:$true] %s202_s10 }
  0x11   : > { %p6417_p9 = pneg %p6872_p8  ;;  %s6790_s12 = smov 4  }
  0x12   : > { %s6791_s13 = smov [#allocation8]   ;;  %s190_s17 = sshll.u32 %s8226_s2, 4  ;;  %s191_s17 = int_to_ptr.hbm [resolvable:$true] %s190_s17 }
  0x13   : > { %p6880_p10 = pnand %p6417_p9, %p44_p1  ;;  %s204_s14 = sshll.u32 %s6791_s13, 4  ;;  %s205_s14 = int_to_ptr.vmem [resolvable:$true] %s204_s14 }
  0x14   : > { %s175_s28 = sshll.u32 %s8233_s1, 4  ;;  %s214_s27 = sshll.u32 %s8228_s4, 4  ;;  %s176_s28 = int_to_ptr.hbm [resolvable:$true] %s175_s28  ;;  %s215_s27 = int_to_ptr.hbm [resolvable:$true] %s214_s27 }
  0x15   : > { %6420 = dma.hbm_to_vmem [thread:$0]  (!%p6880_p10), %s176_s28, 14336, %s178_s6, [#allocation6], %s6789_s11, %s6789_s11, %s6790_s12  }
  0x16   : > { %6426 = dma.hbm_to_vmem [thread:$0]  (!%p6880_p10), %s203_s10, 16, %s205_s14, [#allocation9]  }
  0x17   : > { %s6792_s28 = smov [#allocation7]   ;;  %s6793_s6 = smov [#allocation10]  }
  0x18   : > { %s192_s30 = sshll.u32 %s6792_s28, 4  ;;  %s216_s8 = sshll.u32 %s6793_s6, 4  ;;  %s193_s30 = int_to_ptr.vmem [resolvable:$true] %s192_s30  ;;  %s217_s8 = int_to_ptr.vmem [resolvable:$true] %s216_s8 }
  0x19   : > { %6423 = dma.hbm_to_vmem [thread:$0]  (!%p6880_p10), %s191_s17, 16, %s193_s30, [#allocation6]  }
  0x1a   : > { %6429 = dma.hbm_to_vmem [thread:$0]  (!%p6880_p10), %s215_s27, 16, %s217_s8, [#allocation9]  }
  0x1b   : > { %s6902_s9 = sadd.s32 1, %s6786_s21   ;;  %s30_s10 = sadd.s32 1, %s6782_s20 }
  0x1c   : > { %s27_s11 = ssub.s32 %s6786_s21, %s6902_s9  ;;  %p37_p11 = scmp.ne.s32.totalorder %s6782_s20, %s6778_s19 }
  0x1d   : > { %p28_p12 = scmp.eq.s32.totalorder %s27_s11, 0  ;;  %p38_p13 = scmp.eq.s32.totalorder %s6786_s21, 0 }
  0x1e   : > { %p6912_p0 = por %p151_p2, %p37_p11  ;;  %p6442_p3 = scmp.lt.s32.totalorder %s6786_s21, 4 }
  0x1f   : > { %s6918_s13 = scalar_select %p28_p12, %s6782_s20, %s30_s10  }
  0x20   : > { %p39_p5 = por %p38_p13, %p37_p11  ;;  %s227_s14 = sand.u32 1, %s6782_s20  }
  0x21   : > { %s6394_s7 = smul.u32 1792, %s227_s14  ;;  %s228_s6 = scalar_lea.sflag [#allocation3], %s227_s14 }
  0x22   : > { %s6395_s15 = smul.u32 1792, %s6786_s21  ;;  %p6922_p7 = pnand %p6442_p3, %p39_p5 }
  0x23   : > { %s231_s27 = scalar_lea.vmem [#allocation2], %s6394_s7  ;;  %s6689_s17 = scalar_lea.hbm %s8224_s0, 7168 }
  0x24   : > { %s237_s26 = scalar_lea.hbm %s8224_s0, %s6395_s15  ;;  %s240_s28 = sshll.u32 %s231_s27, 4  ;;  %s241_s28 = int_to_ptr.vmem [resolvable:$true] %s240_s28 }
  0x25   : > { %s238_s30 = sshll.u32 %s237_s26, 4  ;;  %p6686_p9 = pneg %p6922_p7  ;;  %s239_s30 = int_to_ptr.hbm [resolvable:$true] %s238_s30 }
  0x26   : > { %s6682_s8 = sshra.s32 %s239_s30, 4  ;;  %s6683_s8 = int_to_ptr.hbm [resolvable:$true] %s6682_s8 }
  0x27   : > { %s6684_s10 = scalar_lea.hbm %s6683_s8, 1792  ;;  %p6690_p12 = scmp.lt.s32.totalorder %s6683_s8, %s8224_s0 }
  0x28   : > { %p6685_p2 = scmp.ne.s32.totalorder %s6683_s8, %s6684_s10  ;;  %p6691_p13 = scmp.lt.s32.totalorder %s6689_s17, %s6684_s10 }
  0x2a   : > { %p6687_p10 = pnand %p6686_p9, %p6685_p2  ;;  %p6692_p3 = por %p6691_p13, %p6690_p12 }
  0x2c   : > { %p6688_p11 = pneg %p6687_p10 }
  0x2e   : > { %p6693_p5 = pnand %p6692_p3, %p6688_p11 }
  0x30   : > { %6696 = shalt.err (!%p6693_p5)
}
  0x31   : > { %s6794_s14 = smov 896   ;;  %s6795_s7 = smov 56  }
  0x32   : > { %6433 = dma.hbm_to_vmem [thread:$0]  (!%p6922_p7), %s239_s30, 28672, %s241_s28, %s228_s6, %s6794_s14, %s6794_s14, %s6795_s7  }
  0x33   : > { %252 = sbr.rel (%p6872_p8) target bundleno = 1391 (0x56f), region = 40  ;;  %s6942_s1 = sand.u32 (!%p6872_p8), 1, %s6778_s19  }
  0x34   : > { %s6396_s26 = smul.u32 (!%p6872_p8), 1792, %s6942_s1  ;;  %s255_s27 = scalar_lea.sflag (!%p6872_p8), [#allocation3], %s6942_s1 }
  0x36   : > { %s6946_s8 = scalar_lea.vmem (!%p6872_p8), [#allocation2], %s6396_s26 }
  0x38   : > { %6757 = dma.done.wait (%p6859_p4), %s255_s27, 28672  }
  0x39   : > { %6759 = vsyncadd (%p6859_p4), %s255_s27, 4294938624 }
  0x3a   : > { %6761 = dma.done.wait (%p44_p1), [#allocation6], 14352  }
  0x3b   : > { %6763 = vsyncadd (%p44_p1), [#allocation6], 4294952944 }
  0x3c   : > { %6765 = dma.done.wait (%p44_p1), [#allocation9], 32  }
  0x3d   : > { %6767 = vsyncadd (%p44_p1), [#allocation9], 4294967264  ;;  %v6272_v0 = vld [vmem:[#allocation5 + $0x38] sm:$0xff]  ;;  %v6271_v2 = vld [vmem:[#allocation5 + $0x30] sm:$0xff]  ;;  %s4691_s24 = sshll.u32 %s6942_s1, 8  ;;  %s6377_s16 = sshll.u32 %s6850_s22, 8 }
  0x3e   : > { %v6280_v1 = vld [vmem:[#allocation5 + $0x78] sm:$0xff]  ;;  %6378 = vmatpush.bf16.msra.mxu2 %v6272_v0  ;;  %v6279_v3 = vld [vmem:[#allocation5 + $0x70] sm:$0xff]  ;;  %2552 = vmatpush.bf16.msra.mxu0 %v6272_v0  ;;  %v6270_v4 = vld [vmem:[#allocation5 + $0x28] sm:$0xff]  ;;  %s7954_s29 = scalar_lea.vmem [#allocation11], %s4691_s24  ;;  %s4561_s6 = scalar_lea.hbm %s8229_s5, %s6377_s16 }
  0x3f   : > { %6386 = vmatpush.bf16.msra.mxu3 %v6280_v1  ;;  %2641 = vmatpush.bf16.msra.mxu1 %v6280_v1  ;;  %v6278_v5 = vld [vmem:[#allocation5 + $0x68] sm:$0xff]  ;;  %v6269_v6 = vld [vmem:[#allocation5 + $0x20] sm:$0xff]  ;;  %v6268_v8 = vld [vmem:[#allocation5 + $0x18] sm:$0xff]  ;;  %s4562_s10 = sshll.u32 %s7954_s29, 4  ;;  %s4564_s22 = sshll.u32 %s4561_s6, 4  ;;  %s4563_s10 = int_to_ptr.vmem [resolvable:$true] %s4562_s10  ;;  %s4565_s22 = int_to_ptr.hbm [resolvable:$true] %s4564_s22 }
  0x40   : > { %v6277_v7 = vld [vmem:[#allocation5 + $0x60] sm:$0xff]  ;;  %v6276_v9 = vld [vmem:[#allocation5 + $0x58] sm:$0xff]  ;;  %v6267_v10 = vld [vmem:[#allocation5 + $0x10] sm:$0xff]  ;;  %s4550_s11 = scalar_lea.sflag [#allocation4], %s6942_s1  ;;  %s6726_s17 = sshra.s32 %s4565_s22, 4  ;;  %s6727_s17 = int_to_ptr.hbm [resolvable:$true] %s6726_s17 }
  0x41   : > { %v6275_v11 = vld [vmem:[#allocation5 + $0x50] sm:$0xff]  ;;  %v6266_v12 = vld [vmem:[#allocation5 + $0x8] sm:$0xff]  ;;  %v6265_v14 = vld [vmem:[#allocation5] sm:$0xff]  ;;  %s6728_s23 = scalar_lea.hbm %s6727_s17, 256  ;;  %s6732_s7 = scalar_lea.hbm %s8229_s5, 1024 }
  0x42   : > { %6379 = vmatpush.bf16.msra.mxu2 %v6271_v2  ;;  %2553 = vmatpush.bf16.msra.mxu0 %v6271_v2  ;;  %v6274_v13 = vld [vmem:[#allocation5 + $0x48] sm:$0xff]  ;;  %v6273_v15 = vld [vmem:[#allocation5 + $0x40] sm:$0xff]  ;;  %v6160_v17 = vld [vmem:[%s6946_s8 + $0x3b4] sm:$0xf0]  ;;  %p6729_p1 = scmp.ne.s32.totalorder %s6727_s17, %s6728_s23  ;;  %p6733_p7 = scmp.lt.s32.totalorder %s6727_s17, %s8229_s5 }
  0x43   : > { %6387 = vmatpush.bf16.msra.mxu3 %v6279_v3  ;;  %2642 = vmatpush.bf16.msra.mxu1 %v6279_v3  ;;  %v5142_v16 = vld [vmem:[%s6946_s8 + $0x380] sm:$0xf]  ;;  %v6153_v18 = vld [vmem:[%s6946_s8 + $0x384] sm:$0xf]  ;;  %v5144_v19 = vld [vmem:[%s6946_s8 + $0x3b8] sm:$0xf0]  ;;  %p6734_p2 = scmp.lt.s32.totalorder %s6732_s7, %s6728_s23 }
  0x44   : > { %v6288_v20 = vld [vmem:[#allocation5 + $0xb8] sm:$0xff]  ;;  %v4694_v21 = vld [vmem:[%s6946_s8] sm:$0xf]  ;;  %v6041_v24 = vld [vmem:[%s6946_s8 + $0x4] sm:$0xf]  ;;  %v5143_v26 = vor.u32 %v6160_v17, %v5142_v16  ;;  %v5147_v27 = vor.u32 %v6153_v18, %v5144_v19  ;;  %p6730_p4 = pnand %p6729_p1, %p6912_p0 }
  0x45   : > { %v6048_v22 = vld [vmem:[%s6946_s8 + $0x34] sm:$0xf0]  ;;  %v4696_v25 = vld [vmem:[%s6946_s8 + $0x38] sm:$0xf0]  ;;  %v6287_v32 = vld [vmem:[#allocation5 + $0xb0] sm:$0xff]  ;;  %p6735_p9 = por %p6734_p2, %p6733_p7 }
  0x46   : > { %6380 = vmatpush.bf16.msra.mxu2 %v6270_v4  ;;  %2554 = vmatpush.bf16.msra.mxu0 %v6270_v4  ;;  %v6296_v23 = vld [vmem:[#allocation5 + $0xf8] sm:$0xff]  ;;  %v4695_v28 = vor.u32 %v6048_v22, %v4694_v21  ;;  %v4699_v30 = vor.u32 %v6041_v24, %v4696_v25  ;;  %v6295_v33 = vld [vmem:[#allocation5 + $0xf0] sm:$0xff]  ;;  %v6286_v36 = vld [vmem:[#allocation5 + $0xa8] sm:$0xff]  ;;  %p6731_p8 = pneg %p6730_p4 }
  0x47   : > { %6388 = vmatpush.bf16.msra.mxu3 %v6278_v5  ;;  %2643 = vmatpush.bf16.msra.mxu1 %v6278_v5  ;;  %v6312_v29 = vld [vmem:[#allocation5 + $0x178] sm:$0xff]  ;;  %v6311_v34 = vld [vmem:[#allocation5 + $0x170] sm:$0xff]  ;;  %v6294_v37 = vld [vmem:[#allocation5 + $0xe8] sm:$0xff] }
  0x48   : > { %v6304_v31 = vld [vmem:[#allocation5 + $0x138] sm:$0xff]  ;;  %v6303_v35 = vld [vmem:[#allocation5 + $0x130] sm:$0xff]  ;;  %v6310_v38 = vld [vmem:[#allocation5 + $0x168] sm:$0xff]  ;;  %p6736_p10 = pnand %p6735_p9, %p6731_p8 }
  0x49   : > { %v6302_v39 = vld [vmem:[#allocation5 + $0x128] sm:$0xff]  ;;  %v5198_v40 = vld [vmem:[%s6946_s8 + $0x3f0] sm:$0xf]  ;;  %v6167_v42 = vld [vmem:[%s6946_s8 + $0x3f4] sm:$0xf] }
  0x4a   : > { %6381 = vmatpush.bf16.msra.mxu2 %v6269_v6  ;;  %2555 = vmatpush.bf16.msra.mxu0 %v6269_v6  ;;  %v6174_v41 = vld [vmem:[%s6946_s8 + $0x424] sm:$0xf0]  ;;  %v5200_v43 = vld [vmem:[%s6946_s8 + $0x428] sm:$0xf0]  ;;  %v4750_v44 = vld [vmem:[%s6946_s8 + $0x70] sm:$0xf] }
  0x4b   : > { %6389 = vmatpush.bf16.msra.mxu3 %v6277_v7  ;;  %2644 = vmatpush.bf16.msra.mxu1 %v6277_v7  ;;  %v6062_v45 = vld [vmem:[%s6946_s8 + $0xa4] sm:$0xf0]  ;;  %v6055_v46 = vld [vmem:[%s6946_s8 + $0x74] sm:$0xf]  ;;  %v4752_v47 = vld [vmem:[%s6946_s8 + $0xa8] sm:$0xf0]  ;;  %v5199_v48 = vor.u32 %v6174_v41, %v5198_v40  ;;  %v5203_v49 = vor.u32 %v6167_v42, %v5200_v43 }
  0x4c   : > { %v4751_v50 = vor.u32 %v6062_v45, %v4750_v44  ;;  %v4755_v51 = vor.u32 %v6055_v46, %v4752_v47  ;;  %v6285_v52 = vld [vmem:[#allocation5 + $0xa0] sm:$0xff]  ;;  %v6188_v57 = vld [vmem:[%s6946_s8 + $0x494] sm:$0xf0]  ;;  %v5256_v59 = vld [vmem:[%s6946_s8 + $0x498] sm:$0xf0] }
  0x4d   : > { %v6293_v53 = vld [vmem:[#allocation5 + $0xe0] sm:$0xff]  ;;  %v6076_v61 = vld [vmem:[%s6946_s8 + $0x114] sm:$0xf0]  ;;  %v4808_v63 = vld [vmem:[%s6946_s8 + $0x118] sm:$0xf0] }
  0x4e   : > { %6382 = vmatpush.bf16.msra.mxu2 %v6268_v8  ;;  %2556 = vmatpush.bf16.msra.mxu0 %v6268_v8  ;;  %v6301_v54 = vld [vmem:[#allocation5 + $0x120] sm:$0xff]  ;;  %v6284_v4 = vld [vmem:[#allocation5 + $0x98] sm:$0xff]  ;;  %v5310_v8 = vld [vmem:[%s6946_s8 + $0x4d0] sm:$0xf] }
  0x4f   : > { %6390 = vmatpush.bf16.msra.mxu3 %v6276_v9  ;;  %2645 = vmatpush.bf16.msra.mxu1 %v6276_v9  ;;  %v6309_v55 = vld [vmem:[#allocation5 + $0x160] sm:$0xff]  ;;  %v6292_v5 = vld [vmem:[#allocation5 + $0xd8] sm:$0xff]  ;;  %v6202_v9 = vld [vmem:[%s6946_s8 + $0x504] sm:$0xf0] }
  0x50   : > { %v5254_v56 = vld [vmem:[%s6946_s8 + $0x460] sm:$0xf]  ;;  %v6181_v58 = vld [vmem:[%s6946_s8 + $0x464] sm:$0xf]  ;;  %v6300_v6 = vld [vmem:[#allocation5 + $0x118] sm:$0xff]  ;;  %v5311_v16 = vor.u32 %v6202_v9, %v5310_v8 }
  0x51   : > { %v4806_v60 = vld [vmem:[%s6946_s8 + $0xe0] sm:$0xf]  ;;  %v6069_v62 = vld [vmem:[%s6946_s8 + $0xe4] sm:$0xf]  ;;  %v5255_v0 = vor.u32 %v6188_v57, %v5254_v56  ;;  %v5259_v1 = vor.u32 %v6181_v58, %v5256_v59  ;;  %v6308_v7 = vld [vmem:[#allocation5 + $0x158] sm:$0xff] }
  0x52   : > { %6383 = vmatpush.bf16.msra.mxu2 %v6267_v10  ;;  %2557 = vmatpush.bf16.msra.mxu0 %v6267_v10  ;;  %v4807_v2 = vor.u32 %v6076_v61, %v4806_v60  ;;  %v4811_v3 = vor.u32 %v6069_v62, %v4808_v63  ;;  %v6195_v10 = vld [vmem:[%s6946_s8 + $0x4d4] sm:$0xf]  ;;  %v5366_v24 = vld [vmem:[%s6946_s8 + $0x540] sm:$0xf]  ;;  %v6216_v25 = vld [vmem:[%s6946_s8 + $0x574] sm:$0xf0] }
  0x53   : > { %6391 = vmatpush.bf16.msra.mxu3 %v6275_v11  ;;  %2646 = vmatpush.bf16.msra.mxu1 %v6275_v11  ;;  %v5312_v11 = vld [vmem:[%s6946_s8 + $0x508] sm:$0xf0]  ;;  %v6291_v21 = vld [vmem:[#allocation5 + $0xd0] sm:$0xff]  ;;  %v6230_v41 = vld [vmem:[%s6946_s8 + $0x5e4] sm:$0xf0] }
  0x54   : > { %v5315_v17 = vor.u32 %v6195_v10, %v5312_v11  ;;  %v6299_v22 = vld [vmem:[#allocation5 + $0x110] sm:$0xff]  ;;  %v5424_v43 = vld [vmem:[%s6946_s8 + $0x5e8] sm:$0xf0]  ;;  %v6118_v45 = vld [vmem:[%s6946_s8 + $0x264] sm:$0xf0] }
  0x55   : > { %v5422_v40 = vld [vmem:[%s6946_s8 + $0x5b0] sm:$0xf]  ;;  %v6223_v42 = vld [vmem:[%s6946_s8 + $0x5b4] sm:$0xf]  ;;  %v4976_v47 = vld [vmem:[%s6946_s8 + $0x268] sm:$0xf0] }
  0x56   : > { %6384 = vmatpush.bf16.msra.mxu2 %v6266_v12  ;;  %2558 = vmatpush.bf16.msra.mxu0 %v6266_v12  ;;  %v4862_v12 = vld [vmem:[%s6946_s8 + $0x150] sm:$0xf]  ;;  %v6111_v46 = vld [vmem:[%s6946_s8 + $0x234] sm:$0xf]  ;;  %v5478_v56 = vld [vmem:[%s6946_s8 + $0x620] sm:$0xf] }
  0x57   : > { %6392 = vmatpush.bf16.msra.mxu3 %v6274_v13  ;;  %2647 = vmatpush.bf16.msra.mxu1 %v6274_v13  ;;  %v6090_v13 = vld [vmem:[%s6946_s8 + $0x184] sm:$0xf0]  ;;  %v4974_v44 = vld [vmem:[%s6946_s8 + $0x230] sm:$0xf]  ;;  %v6244_v57 = vld [vmem:[%s6946_s8 + $0x654] sm:$0xf0] }
  0x58   : > { %v4863_v18 = vor.u32 %v6090_v13, %v4862_v12  ;;  %v6237_v58 = vld [vmem:[%s6946_s8 + $0x624] sm:$0xf]  ;;  %v5480_v59 = vld [vmem:[%s6946_s8 + $0x658] sm:$0xf0]  ;;  %v5030_v60 = vld [vmem:[%s6946_s8 + $0x2a0] sm:$0xf] }
  0x59   : > { %v6132_v61 = vld [vmem:[%s6946_s8 + $0x2d4] sm:$0xf0]  ;;  %v6125_v62 = vld [vmem:[%s6946_s8 + $0x2a4] sm:$0xf]  ;;  %v5032_v63 = vld [vmem:[%s6946_s8 + $0x2d8] sm:$0xf0] }
  0x5a   : > { %6385 = vmatpush.bf16.msra.mxu2 %v6265_v14  ;;  %2559 = vmatpush.bf16.msra.mxu0 %v6265_v14  ;;  %v6083_v14 = vld [vmem:[%s6946_s8 + $0x154] sm:$0xf]  ;;  %v5536_v9 = vld [vmem:[%s6946_s8 + $0x6c8] sm:$0xf0]  ;;  %v6336_v10 = vld [vmem:[#allocation5 + $0x238] sm:$0xff] }
  0x5b   : > { %6393 = vmatpush.bf16.msra.mxu3 %v6273_v15  ;;  %2648 = vmatpush.bf16.msra.mxu1 %v6273_v15  ;;  %v4864_v15 = vld [vmem:[%s6946_s8 + $0x188] sm:$0xf0]  ;;  %v6251_v8 = vld [vmem:[%s6946_s8 + $0x694] sm:$0xf]  ;;  %v5086_v11 = vld [vmem:[%s6946_s8 + $0x310] sm:$0xf] }
  0x5c   : > { %v4867_v19 = vor.u32 %v6083_v14, %v4864_v15  ;;  %v6146_v12 = vld [vmem:[%s6946_s8 + $0x344] sm:$0xf0]  ;;  %v6139_v13 = vld [vmem:[%s6946_s8 + $0x314] sm:$0xf]  ;;  %v5088_v14 = vld [vmem:[%s6946_s8 + $0x348] sm:$0xf0] }
  0x5d   : > { %2600 = vmatmul.bf16.vlgmr.msra.gmra.mxu2 %v5143_v26  ;;  %2560 = vmatmul.bf16.vlgmr.msra.gmra.mxu0 %v4695_v28  ;;  %v6209_v26 = vld [vmem:[%s6946_s8 + $0x544] sm:$0xf]  ;;  %v4918_v28 = vld [vmem:[%s6946_s8 + $0x1c0] sm:$0xf] }
  0x5e   : > { %2730 = vmatpush.bf16.msrb.mxu2 %v6288_v20  ;;  %2689 = vmatmul.bf16.vlgmr.msra.gmra.mxu3 %v5147_v27  ;;  %v6283_v20 = vld [vmem:[#allocation5 + $0x90] sm:$0xff]  ;;  %v5368_v27 = vld [vmem:[%s6946_s8 + $0x578] sm:$0xf0] }
  0x5f   : > { %2819 = vmatpush.bf16.msrb.mxu3 %v6296_v23  ;;  %2997 = vmatpush.bf16.msrb.mxu1 %v6312_v29  ;;  %v6307_v23 = vld [vmem:[#allocation5 + $0x150] sm:$0xff]  ;;  %v6104_v29 = vld [vmem:[%s6946_s8 + $0x1f4] sm:$0xf0] }
  0x60   : > { %2649 = vmatmul.bf16.vlgmr.msra.gmra.mxu1 %v4699_v30  ;;  %2908 = vmatpush.bf16.msrb.mxu0 %v6304_v31  ;;  %v6097_v30 = vld [vmem:[%s6946_s8 + $0x1c4] sm:$0xf]  ;;  %v4920_v31 = vld [vmem:[%s6946_s8 + $0x1f8] sm:$0xf0] }
  0x62   : > { %2731 = vmatpush.bf16.msrb.mxu2 %v6287_v32  ;;  %v5367_v32 = vor.u32 %v6216_v25, %v5366_v24  ;;  %v4710_v24 = vld [vmem:[%s6946_s8 + $0x10] sm:$0xf]  ;;  %v6050_v25 = vld [vmem:[%s6946_s8 + $0x44] sm:$0xf0] }
  0x63   : > { %2820 = vmatpush.bf16.msrb.mxu3 %v6295_v33  ;;  %2998 = vmatpush.bf16.msrb.mxu1 %v6311_v34  ;;  %v5371_v33 = vor.u32 %v6209_v26, %v5368_v27  ;;  %v4919_v34 = vor.u32 %v6104_v29, %v4918_v28  ;;  %v6043_v26 = vld [vmem:[%s6946_s8 + $0x14] sm:$0xf]  ;;  %v4712_v27 = vld [vmem:[%s6946_s8 + $0x48] sm:$0xf0] }
  0x64   : > { %2909 = vmatpush.bf16.msrb.mxu0 %v6303_v35  ;;  %v4923_v35 = vor.u32 %v6097_v30, %v4920_v31  ;;  %v7032_v30 = vld [vmem:[#allocation7] ss:$0 sm:$0xff]  ;;  %v4711_v31 = vor.u32 %v6050_v25, %v4710_v24 }
  0x66   : > { %2732 = vmatpush.bf16.msrb.mxu2 %v6286_v36  ;;  %v6282_v36 = vld [vmem:[#allocation5 + $0x88] sm:$0xff] }
  0x67   : > { %2821 = vmatpush.bf16.msrb.mxu3 %v6294_v37  ;;  %2999 = vmatpush.bf16.msrb.mxu1 %v6310_v38  ;;  %v6290_v37 = vld [vmem:[#allocation5 + $0xc8] sm:$0xff] }
  0x68   : > { %2910 = vmatpush.bf16.msrb.mxu0 %v6302_v39  ;;  %v6298_v38 = vld [vmem:[#allocation5 + $0x108] sm:$0xff] }
  0x69   : > { %v6306_v39 = vld [vmem:[#allocation5 + $0x148] sm:$0xff] }
  0x6a   : > { %2733 = vmatpush.bf16.msrb.mxu2 %v6285_v52  ;;  %v6281_v52 = vld [vmem:[#allocation5 + $0x80] sm:$0xff] }
  0x6b   : > { %2822 = vmatpush.bf16.msrb.mxu3 %v6293_v53  ;;  %3000 = vmatpush.bf16.msrb.mxu1 %v6309_v55  ;;  %v6289_v53 = vld [vmem:[#allocation5 + $0xc0] sm:$0xff] }
  0x6c   : > { %2911 = vmatpush.bf16.msrb.mxu0 %v6301_v54  ;;  %v6297_v54 = vld [vmem:[#allocation5 + $0x100] sm:$0xff] }
  0x6d   : > { %2605 = vmatmul.bf16.gmra.mxu2 %v5199_v48  ;;  %2565 = vmatmul.bf16.gmra.mxu0 %v4751_v50  ;;  %v5423_v48 = vor.u32 %v6230_v41, %v5422_v40  ;;  %v4975_v50 = vor.u32 %v6118_v45, %v4974_v44  ;;  %v6305_v55 = vld [vmem:[#allocation5 + $0x140] sm:$0xff] }
  0x6e   : > { %2694 = vmatmul.bf16.gmra.mxu3 %v5203_v49  ;;  %2734 = vmatpush.bf16.msrb.mxu2 %v6284_v4  ;;  %v5427_v49 = vor.u32 %v6223_v42, %v5424_v43  ;;  %v6320_v4 = vld [vmem:[#allocation5 + $0x1b8] sm:$0xff] }
  0x6f   : > { %2823 = vmatpush.bf16.msrb.mxu3 %v6292_v5  ;;  %3001 = vmatpush.bf16.msrb.mxu1 %v6308_v7  ;;  %v6328_v5 = vld [vmem:[#allocation5 + $0x1f8] sm:$0xff]  ;;  %v6258_v7 = vld [vmem:[%s6946_s8 + $0x6c4] sm:$0xf0] }
  0x70   : > { %2654 = vmatmul.bf16.gmra.mxu1 %v4755_v51  ;;  %2912 = vmatpush.bf16.msrb.mxu0 %v6300_v6  ;;  %v4979_v51 = vor.u32 %v6111_v46, %v4976_v47  ;;  %v5534_v6 = vld [vmem:[%s6946_s8 + $0x690] sm:$0xf]  ;;  %v4758_v46 = vld [vmem:[%s6946_s8 + $0x78] sm:$0xf] }
  0x71   : > { %v5535_v15 = vor.u32 %v6258_v7, %v5534_v6  ;;  %v6063_v47 = vld [vmem:[%s6946_s8 + $0xac] sm:$0xf0] }
  0x72   : > { %2735 = vmatpush.bf16.msrb.mxu2 %v6283_v20  ;;  %v4702_v20 = vld [vmem:[%s6946_s8 + $0x8] sm:$0xf] }
  0x73   : > { %2824 = vmatpush.bf16.msrb.mxu3 %v6291_v21  ;;  %3002 = vmatpush.bf16.msrb.mxu1 %v6307_v23  ;;  %v6049_v21 = vld [vmem:[%s6946_s8 + $0x3c] sm:$0xf0]  ;;  %v4704_v23 = vld [vmem:[%s6946_s8 + $0x40] sm:$0xf0] }
  0x74   : > { %2913 = vmatpush.bf16.msrb.mxu0 %v6299_v22  ;;  %v6042_v22 = vld [vmem:[%s6946_s8 + $0xc] sm:$0xf]  ;;  %v4703_v28 = vor.u32 %v6049_v21, %v4702_v20  ;;  %v6071_v21 = vld [vmem:[%s6946_s8 + $0xf4] sm:$0xf] }
  0x75   : > { %v4707_v29 = vor.u32 %v6042_v22, %v4704_v23  ;;  %v4824_v22 = vld [vmem:[%s6946_s8 + $0x128] sm:$0xf0] }
  0x76   : > { %2736 = vmatpush.bf16.msrb.mxu2 %v6282_v36  ;;  %v6319_v36 = vld [vmem:[#allocation5 + $0x1b0] sm:$0xff] }
  0x77   : > { %2825 = vmatpush.bf16.msrb.mxu3 %v6290_v37  ;;  %3003 = vmatpush.bf16.msrb.mxu1 %v6306_v39 }
  0x78   : > { %2914 = vmatpush.bf16.msrb.mxu0 %v6298_v38  ;;  %v6327_v38 = vld [vmem:[#allocation5 + $0x1f0] sm:$0xff] }
  0x7a   : > { %2737 = vmatpush.bf16.msrb.mxu2 %v6281_v52  ;;  %v4766_v52 = vld [vmem:[%s6946_s8 + $0x80] sm:$0xf] }
  0x7b   : > { %2826 = vmatpush.bf16.msrb.mxu3 %v6289_v53  ;;  %3004 = vmatpush.bf16.msrb.mxu1 %v6305_v55  ;;  %v6064_v53 = vld [vmem:[%s6946_s8 + $0xb4] sm:$0xf0] }
  0x7c   : > { %2915 = vmatpush.bf16.msrb.mxu0 %v6297_v54 }
  0x7d   : > { %2610 = vmatmul.bf16.gmra.mxu2 %v5255_v0  ;;  %2570 = vmatmul.bf16.gmra.mxu0 %v4807_v2  ;;  %v5479_v0 = vor.u32 %v6244_v57, %v5478_v56  ;;  %v5031_v2 = vor.u32 %v6132_v61, %v5030_v60  ;;  %v6057_v56 = vld [vmem:[%s6946_s8 + $0x84] sm:$0xf]  ;;  %v4768_v57 = vld [vmem:[%s6946_s8 + $0xb8] sm:$0xf0]  ;;  %v4767_v61 = vor.u32 %v6064_v53, %v4766_v52  ;;  %v4878_v52 = vld [vmem:[%s6946_s8 + $0x160] sm:$0xf] }
  0x7e   : > { %2699 = vmatmul.bf16.gmra.mxu3 %v5259_v1  ;;  %v5483_v1 = vor.u32 %v6237_v58, %v5480_v59  ;;  %3086 = vmatpush.bf16.msra.mxu2 %v6320_v4  ;;  %v4759_v59 = vor.u32 %v6063_v47, %v4758_v46  ;;  %v6091_v46 = vld [vmem:[%s6946_s8 + $0x18c] sm:$0xf0]  ;;  %v6092_v53 = vld [vmem:[%s6946_s8 + $0x194] sm:$0xf0] }
  0x7f   : > { %3175 = vmatpush.bf16.msra.mxu3 %v6328_v5 }
  0x80   : > { %2659 = vmatmul.bf16.gmra.mxu1 %v4811_v3  ;;  %v5035_v3 = vor.u32 %v6125_v62, %v5032_v63  ;;  %3264 = vmatpush.bf16.msra.mxu0 %v6336_v10 }
  0x82   : > { %3087 = vmatpush.bf16.msra.mxu2 %v6319_v36 }
  0x83   : > { %3176 = vmatpush.bf16.msra.mxu3 %v6327_v38 }
  0x8d   : > { %2615 = vmatmul.bf16.gmra.mxu2 %v5311_v16  ;;  %2575 = vmatmul.bf16.gmra.mxu0 %v4863_v18  ;;  %v5539_v16 = vor.u32 %v6251_v8, %v5536_v9  ;;  %v5091_v18 = vor.u32 %v6139_v13, %v5088_v14  ;;  %v6077_v14 = vld [vmem:[%s6946_s8 + $0x11c] sm:$0xf0] }
  0x8e   : > { %2704 = vmatmul.bf16.gmra.mxu3 %v5315_v17  ;;  %v5087_v17 = vor.u32 %v6146_v12, %v5086_v11  ;;  %v4814_v12 = vld [vmem:[%s6946_s8 + $0xe8] sm:$0xf] }
  0x8f   : > { %v4815_v24 = vor.u32 %v6077_v14, %v4814_v12 }
  0x90   : > { %2664 = vmatmul.bf16.gmra.mxu1 %v4867_v19  ;;  %v6344_v19 = vld [vmem:[#allocation5 + $0x278] sm:$0xff] }
  0x91   : > { %3353 = vmatpush.bf16.msra.mxu1 %v6344_v19 }
  0x9d   : > { %2620 = vmatmul.bf16.gmra.mxu2 %v5367_v32  ;;  %2580 = vmatmul.bf16.gmra.mxu0 %v4919_v34 }
  0x9e   : > { %2709 = vmatmul.bf16.gmra.mxu3 %v5371_v33  ;;  %v4715_v33 = vor.u32 %v6043_v26, %v4712_v27 }
  0xa0   : > { %2669 = vmatmul.bf16.gmra.mxu1 %v4923_v35 }
  0xad   : > { %2625 = vmatmul.bf16.gmra.mxu2 %v5423_v48  ;;  %2585 = vmatmul.bf16.gmra.mxu0 %v4975_v50  ;;  %v4760_v50 = vld [vmem:[%s6946_s8 + $0xb0] sm:$0xf0] }
  0xae   : > { %2714 = vmatmul.bf16.gmra.mxu3 %v5427_v49  ;;  %v6056_v49 = vld [vmem:[%s6946_s8 + $0x7c] sm:$0xf] }
  0xaf   : > { %v4763_v60 = vor.u32 %v6056_v49, %v4760_v50  ;;  %v6084_v49 = vld [vmem:[%s6946_s8 + $0x15c] sm:$0xf]  ;;  %v4872_v50 = vld [vmem:[%s6946_s8 + $0x190] sm:$0xf0] }
  0xb0   : > { %2674 = vmatmul.bf16.gmra.mxu1 %v4979_v51  ;;  %v6335_v51 = vld [vmem:[#allocation5 + $0x230] sm:$0xff] }
  0xb1   : > { %3265 = vmatpush.bf16.msra.mxu0 %v6335_v51  ;;  %v6334_v51 = vld [vmem:[#allocation5 + $0x228] sm:$0xff] }
  0xb5   : > { %3266 = vmatpush.bf16.msra.mxu0 %v6334_v51 }
  0xbd   : > { %2630 = vmatmul.bf16.gmra.mxu2 %v5479_v0  ;;  %2590 = vmatmul.bf16.gmra.mxu0 %v5031_v2  ;;  %v4771_v0 = vor.u32 %v6057_v56, %v4768_v57  ;;  %v6085_v56 = vld [vmem:[%s6946_s8 + $0x164] sm:$0xf]  ;;  %v4880_v57 = vld [vmem:[%s6946_s8 + $0x198] sm:$0xf0] }
  0xbe   : > { %2719 = vmatmul.bf16.gmra.mxu3 %v5483_v1  ;;  %v6343_v1 = vld [vmem:[#allocation5 + $0x270] sm:$0xff] }
  0xbf   : > { %3354 = vmatpush.bf16.msra.mxu1 %v6343_v1  ;;  %v4883_v1 = vor.u32 %v6085_v56, %v4880_v57  ;;  %v6112_v57 = vld [vmem:[%s6946_s8 + $0x23c] sm:$0xf] }
  0xc0   : > { %2679 = vmatmul.bf16.gmra.mxu1 %v5035_v3 }
  0xcd   : > { %2635 = vmatmul.bf16.gmra.mxu2 %v5535_v15  ;;  %2595 = vmatmul.bf16.gmra.mxu0 %v5087_v17  ;;  %v6070_v15 = vld [vmem:[%s6946_s8 + $0xec] sm:$0xf]  ;;  %v4822_v17 = vld [vmem:[%s6946_s8 + $0xf0] sm:$0xf] }
  0xce   : > { %2724 = vmatmul.bf16.gmra.mxu3 %v5539_v16  ;;  %v4816_v16 = vld [vmem:[%s6946_s8 + $0x120] sm:$0xf0] }
  0xcf   : > { %v4819_v25 = vor.u32 %v6070_v15, %v4816_v16  ;;  %v4926_v16 = vld [vmem:[%s6946_s8 + $0x1c8] sm:$0xf] }
  0xd0   : > { %2684 = vmatmul.bf16.gmra.mxu1 %v5091_v18  ;;  %v6078_v18 = vld [vmem:[%s6946_s8 + $0x124] sm:$0xf0] }
  0xd1   : > { %v4823_v26 = vor.u32 %v6078_v18, %v4822_v17  ;;  %v6105_v18 = vld [vmem:[%s6946_s8 + $0x1fc] sm:$0xf0] }
  0xda   : > { %v2561_v32 = vpop.f32.mrf.mxu0 }
  0xdb   : > { %v2562_v34 = vadd.f32 %v7032_v30, %v2561_v32 }
  0xdd   : > { %v2650_v35 = vpop.f32.mrf.mxu1  ;;  %2738 = vmatmul.bf16.vlgmr.msrb.gmra.mxu2 %v4703_v28  ;;  %2916 = vmatmul.bf16.vlgmr.msrb.gmra.mxu0 %v4711_v31 }
  0xde   : > { %2827 = vmatmul.bf16.vlgmr.msrb.gmra.mxu3 %v4707_v29  ;;  %v7035_v37 = vadd.f32 %v2650_v35, %v2562_v34  ;;  %v4827_v29 = vor.u32 %v6071_v21, %v4824_v22  ;;  %v6326_v35 = vld [vmem:[#allocation5 + $0x1e8] sm:$0xff]  ;;  %v4934_v21 = vld [vmem:[%s6946_s8 + $0x1d0] sm:$0xf] }
  0xdf   : > { %3177 = vmatpush.bf16.msra.mxu3 %v6326_v35  ;;  %v6106_v22 = vld [vmem:[%s6946_s8 + $0x204] sm:$0xf0] }
  0xe0   : > { %3005 = vmatmul.bf16.vlgmr.msrb.gmra.mxu1 %v4715_v33  ;;  %v2601_v39 = vpop.f32.mrf.mxu2  ;;  %v6318_v33 = vld [vmem:[#allocation5 + $0x1a8] sm:$0xff] }
  0xe1   : > { %v2690_v40 = vpop.f32.mrf.mxu3  ;;  %v2602_v41 = vadd.f32 %v7032_v30, %v2601_v39  ;;  %3088 = vmatpush.bf16.msra.mxu2 %v6318_v33 }
  0xe2   : > { %v2563_v43 = vpop.f32.mrf.mxu0 }
  0xe3   : > { %v7038_v42 = vadd.f32 %v2690_v40, %v2602_v41  ;;  %v2564_v44 = vadd.f32 %v7032_v30, %v2563_v43 }
  0xe5   : > { %v2652_v45 = vpop.f32.mrf.mxu1 }
  0xe6   : > { %v7043_v48 = vadd.f32 %v2652_v45, %v2564_v44  ;;  %v4870_v45 = vld [vmem:[%s6946_s8 + $0x158] sm:$0xf] }
  0xe8   : > { %v2603_v54 = vpop.f32.mrf.mxu2 }
  0xe9   : > { %v2692_v55 = vpop.f32.mrf.mxu3  ;;  %v2604_v58 = vadd.f32 %v7032_v30, %v2603_v54 }
  0xea   : > { %v2566_v63 = vpop.f32.mrf.mxu0 }
  0xeb   : > { %v7052_v62 = vadd.f32 %v2692_v55, %v2604_v58  ;;  %v2567_v2 = vadd.f32 %v7032_v30, %v2566_v63 }
  0xed   : > { %v2655_v3 = vpop.f32.mrf.mxu1  ;;  %2743 = vmatmul.bf16.gmra.mxu2 %v4759_v59  ;;  %2921 = vmatmul.bf16.gmra.mxu0 %v4767_v61  ;;  %v4871_v59 = vor.u32 %v6091_v46, %v4870_v45  ;;  %v4879_v61 = vor.u32 %v6092_v53, %v4878_v52 }
  0xee   : > { %2832 = vmatmul.bf16.gmra.mxu3 %v4763_v60  ;;  %v7055_v4 = vadd.f32 %v2655_v3, %v2567_v2  ;;  %v4875_v60 = vor.u32 %v6084_v49, %v4872_v50  ;;  %v6342_v2 = vld [vmem:[#allocation5 + $0x268] sm:$0xff] }
  0xef   : > { %3355 = vmatpush.bf16.msra.mxu1 %v6342_v2  ;;  %v6113_v2 = vld [vmem:[%s6946_s8 + $0x244] sm:$0xf] }
  0xf0   : > { %3010 = vmatmul.bf16.gmra.mxu1 %v4771_v0  ;;  %v2606_v5 = vpop.f32.mrf.mxu2 }
  0xf1   : > { %v2695_v6 = vpop.f32.mrf.mxu3  ;;  %v2607_v7 = vadd.f32 %v7032_v30, %v2606_v5 }
  0xf2   : > { %v2568_v9 = vpop.f32.mrf.mxu0 }
  0xf3   : > { %v7058_v8 = vadd.f32 %v2695_v6, %v2607_v7  ;;  %v2569_v10 = vadd.f32 %v7032_v30, %v2568_v9 }
  0xf5   : > { %v2657_v11 = vpop.f32.mrf.mxu1 }
  0xf6   : > { %v7062_v13 = vadd.f32 %v2657_v11, %v2569_v10 }
  0xf8   : > { %v2608_v19 = vpop.f32.mrf.mxu2 }
  0xf9   : > { %v2697_v20 = vpop.f32.mrf.mxu3  ;;  %v2609_v23 = vadd.f32 %v7032_v30, %v2608_v19  ;;  %v6098_v19 = vld [vmem:[%s6946_s8 + $0x1cc] sm:$0xf] }
  0xfa   : > { %v2571_v28 = vpop.f32.mrf.mxu0 }
  0xfb   : > { %v7072_v27 = vadd.f32 %v2697_v20, %v2609_v23  ;;  %v2572_v31 = vadd.f32 %v7032_v30, %v2571_v28  ;;  %v4928_v20 = vld [vmem:[%s6946_s8 + $0x200] sm:$0xf0] }
  0xfd   : > { %v2660_v32 = vpop.f32.mrf.mxu1  ;;  %2748 = vmatmul.bf16.gmra.mxu2 %v4815_v24  ;;  %2926 = vmatmul.bf16.gmra.mxu0 %v4823_v26  ;;  %v4936_v26 = vld [vmem:[%s6946_s8 + $0x208] sm:$0xf0] }
  0xfe   : > { %2837 = vmatmul.bf16.gmra.mxu3 %v4819_v25  ;;  %v7075_v34 = vadd.f32 %v2660_v32, %v2572_v31  ;;  %v6099_v25 = vld [vmem:[%s6946_s8 + $0x1d4] sm:$0xf]  ;;  %v4931_v31 = vor.u32 %v6098_v19, %v4928_v20  ;;  %v4935_v32 = vor.u32 %v6106_v22, %v4934_v21 }
 0x100   : > { %3015 = vmatmul.bf16.gmra.mxu1 %v4827_v29  ;;  %v2611_v36 = vpop.f32.mrf.mxu2  ;;  %v4927_v29 = vor.u32 %v6105_v18, %v4926_v16  ;;  %v6341_v16 = vld [vmem:[#allocation5 + $0x260] sm:$0xff] }
 0x101   : > { %v2700_v38 = vpop.f32.mrf.mxu3  ;;  %v2612_v39 = vadd.f32 %v7032_v30, %v2611_v36  ;;  %v4939_v36 = vor.u32 %v6099_v25, %v4936_v26  ;;  %3356 = vmatpush.bf16.msra.mxu1 %v6341_v16 }
 0x102   : > { %v2573_v41 = vpop.f32.mrf.mxu0 }
 0x103   : > { %v7078_v40 = vadd.f32 %v2700_v38, %v2612_v39  ;;  %v2574_v43 = vadd.f32 %v7032_v30, %v2573_v41  ;;  %v6317_v41 = vld [vmem:[#allocation5 + $0x1a0] sm:$0xff] }
 0x104   : > { %3089 = vmatpush.bf16.msra.mxu2 %v6317_v41 }
 0x105   : > { %v2662_v44 = vpop.f32.mrf.mxu1 }
 0x106   : > { %v7083_v47 = vadd.f32 %v2662_v44, %v2574_v43  ;;  %v6325_v44 = vld [vmem:[#allocation5 + $0x1e0] sm:$0xff] }
 0x107   : > { %3178 = vmatpush.bf16.msra.mxu3 %v6325_v44 }
 0x108   : > { %v2613_v54 = vpop.f32.mrf.mxu2 }
 0x109   : > { %v2702_v55 = vpop.f32.mrf.mxu3  ;;  %v2614_v58 = vadd.f32 %v7032_v30, %v2613_v54  ;;  %v4982_v54 = vld [vmem:[%s6946_s8 + $0x238] sm:$0xf] }
 0x10a   : > { %v2576_v0 = vpop.f32.mrf.mxu0 }
 0x10b   : > { %v7092_v63 = vadd.f32 %v2702_v55, %v2614_v58  ;;  %v2577_v3 = vadd.f32 %v7032_v30, %v2576_v0  ;;  %v6119_v55 = vld [vmem:[%s6946_s8 + $0x26c] sm:$0xf0]  ;;  %v4984_v58 = vld [vmem:[%s6946_s8 + $0x270] sm:$0xf0] }
 0x10d   : > { %v2665_v5 = vpop.f32.mrf.mxu1  ;;  %2753 = vmatmul.bf16.gmra.mxu2 %v4871_v59  ;;  %2931 = vmatmul.bf16.gmra.mxu0 %v4879_v61  ;;  %v6333_v59 = vld [vmem:[#allocation5 + $0x220] sm:$0xff]  ;;  %v6120_v61 = vld [vmem:[%s6946_s8 + $0x274] sm:$0xf0] }
 0x10e   : > { %2842 = vmatmul.bf16.gmra.mxu3 %v4875_v60  ;;  %v7095_v6 = vadd.f32 %v2665_v5, %v2577_v3  ;;  %v4990_v60 = vld [vmem:[%s6946_s8 + $0x240] sm:$0xf]  ;;  %v4992_v3 = vld [vmem:[%s6946_s8 + $0x278] sm:$0xf0]  ;;  %3267 = vmatpush.bf16.msra.mxu0 %v6333_v59 }
 0x110   : > { %3020 = vmatmul.bf16.gmra.mxu1 %v4883_v1  ;;  %v2616_v7 = vpop.f32.mrf.mxu2 }
 0x111   : > { %v2705_v9 = vpop.f32.mrf.mxu3  ;;  %v2617_v10 = vadd.f32 %v7032_v30, %v2616_v7  ;;  %v4983_v7 = vor.u32 %v6119_v55, %v4982_v54 }
 0x112   : > { %v2578_v12 = vpop.f32.mrf.mxu0 }
 0x113   : > { %v7098_v11 = vadd.f32 %v2705_v9, %v2617_v10  ;;  %v2579_v14 = vadd.f32 %v7032_v30, %v2578_v12  ;;  %v4987_v9 = vor.u32 %v6112_v57, %v4984_v58  ;;  %v4991_v10 = vor.u32 %v6120_v61, %v4990_v60  ;;  %v6316_v60 = vld [vmem:[#allocation5 + $0x198] sm:$0xff] }
 0x114   : > { %3090 = vmatpush.bf16.msra.mxu2 %v6316_v60 }
 0x115   : > { %v2667_v15 = vpop.f32.mrf.mxu1 }
 0x116   : > { %v7102_v17 = vadd.f32 %v2667_v15, %v2579_v14  ;;  %v4995_v15 = vor.u32 %v6113_v2, %v4992_v3 }
 0x118   : > { %v2618_v23 = vpop.f32.mrf.mxu2 }
 0x119   : > { %v2707_v24 = vpop.f32.mrf.mxu3  ;;  %v2619_v28 = vadd.f32 %v7032_v30, %v2618_v23 }
 0x11a   : > { %v2581_v35 = vpop.f32.mrf.mxu0 }
 0x11b   : > { %v7112_v33 = vadd.f32 %v2707_v24, %v2619_v28  ;;  %v2582_v38 = vadd.f32 %v7032_v30, %v2581_v35  ;;  %v6126_v35 = vld [vmem:[%s6946_s8 + $0x2ac] sm:$0xf] }
 0x11d   : > { %v2670_v39 = vpop.f32.mrf.mxu1  ;;  %2758 = vmatmul.bf16.gmra.mxu2 %v4927_v29  ;;  %2936 = vmatmul.bf16.gmra.mxu0 %v4935_v32  ;;  %v5038_v29 = vld [vmem:[%s6946_s8 + $0x2a8] sm:$0xf]  ;;  %v6133_v32 = vld [vmem:[%s6946_s8 + $0x2dc] sm:$0xf0] }
 0x11e   : > { %2847 = vmatmul.bf16.gmra.mxu3 %v4931_v31  ;;  %v7115_v43 = vadd.f32 %v2670_v39, %v2582_v38  ;;  %v5046_v38 = vld [vmem:[%s6946_s8 + $0x2b0] sm:$0xf]  ;;  %v6134_v39 = vld [vmem:[%s6946_s8 + $0x2e4] sm:$0xf0] }
 0x120   : > { %3025 = vmatmul.bf16.gmra.mxu1 %v4939_v36  ;;  %v2621_v45 = vpop.f32.mrf.mxu2  ;;  %v5040_v36 = vld [vmem:[%s6946_s8 + $0x2e0] sm:$0xf0] }
 0x121   : > { %v2710_v46 = vpop.f32.mrf.mxu3  ;;  %v2622_v49 = vadd.f32 %v7032_v30, %v2621_v45  ;;  %v6127_v45 = vld [vmem:[%s6946_s8 + $0x2b4] sm:$0xf] }
 0x122   : > { %v2583_v51 = vpop.f32.mrf.mxu0 }
 0x123   : > { %v7118_v50 = vadd.f32 %v2710_v46, %v2622_v49  ;;  %v2584_v52 = vadd.f32 %v7032_v30, %v2583_v51  ;;  %v5048_v46 = vld [vmem:[%s6946_s8 + $0x2e8] sm:$0xf0]  ;;  %v5039_v51 = vor.u32 %v6133_v32, %v5038_v29  ;;  %v5104_v29 = vld [vmem:[%s6946_s8 + $0x358] sm:$0xf0] }
 0x124   : > { %v5051_v57 = vor.u32 %v6127_v45, %v5048_v46 }
 0x125   : > { %v2672_v53 = vpop.f32.mrf.mxu1 }
 0x126   : > { %v7123_v56 = vadd.f32 %v2672_v53, %v2584_v52  ;;  %v5043_v52 = vor.u32 %v6126_v35, %v5040_v36  ;;  %v5047_v53 = vor.u32 %v6134_v39, %v5046_v38 }
 0x128   : > { %v2623_v0 = vpop.f32.mrf.mxu2 }
 0x129   : > { %v2712_v1 = vpop.f32.mrf.mxu3  ;;  %v2624_v5 = vadd.f32 %v7032_v30, %v2623_v0  ;;  %v6324_v0 = vld [vmem:[#allocation5 + $0x1d8] sm:$0xff] }
 0x12a   : > { %v2586_v14 = vpop.f32.mrf.mxu0  ;;  %3179 = vmatpush.bf16.msra.mxu3 %v6324_v0  ;;  %v5150_v0 = vld [vmem:[%s6946_s8 + $0x388] sm:$0xf] }
 0x12b   : > { %v7132_v12 = vadd.f32 %v2712_v1, %v2624_v5  ;;  %v2587_v18 = vadd.f32 %v7032_v30, %v2586_v14  ;;  %v5094_v14 = vld [vmem:[%s6946_s8 + $0x318] sm:$0xf] }
 0x12d   : > { %v2675_v19 = vpop.f32.mrf.mxu1  ;;  %2763 = vmatmul.bf16.gmra.mxu2 %v4983_v7  ;;  %2941 = vmatmul.bf16.gmra.mxu0 %v4991_v10 }
 0x12e   : > { %2852 = vmatmul.bf16.gmra.mxu3 %v4987_v9  ;;  %v7135_v20 = vadd.f32 %v2675_v19, %v2587_v18  ;;  %v6147_v18 = vld [vmem:[%s6946_s8 + $0x34c] sm:$0xf0]  ;;  %v6140_v19 = vld [vmem:[%s6946_s8 + $0x31c] sm:$0xf] }
 0x12f   : > { %v5095_v35 = vor.u32 %v6147_v18, %v5094_v14  ;;  %v6155_v18 = vld [vmem:[%s6946_s8 + $0x394] sm:$0xf] }
 0x130   : > { %3030 = vmatmul.bf16.gmra.mxu1 %v4995_v15  ;;  %v2626_v21 = vpop.f32.mrf.mxu2  ;;  %v6332_v15 = vld [vmem:[#allocation5 + $0x218] sm:$0xff] }
 0x131   : > { %v2715_v22 = vpop.f32.mrf.mxu3  ;;  %v2627_v23 = vadd.f32 %v7032_v30, %v2626_v21  ;;  %v5096_v21 = vld [vmem:[%s6946_s8 + $0x350] sm:$0xf0]  ;;  %3268 = vmatpush.bf16.msra.mxu0 %v6332_v15 }
 0x132   : > { %v2588_v25 = vpop.f32.mrf.mxu0  ;;  %v5099_v36 = vor.u32 %v6140_v19, %v5096_v21  ;;  %v5160_v19 = vld [vmem:[%s6946_s8 + $0x3c8] sm:$0xf0] }
 0x133   : > { %v7138_v24 = vadd.f32 %v2715_v22, %v2627_v23  ;;  %v2589_v26 = vadd.f32 %v7032_v30, %v2588_v25  ;;  %v5102_v22 = vld [vmem:[%s6946_s8 + $0x320] sm:$0xf]  ;;  %v6148_v23 = vld [vmem:[%s6946_s8 + $0x354] sm:$0xf0] }
 0x134   : > { %v5103_v38 = vor.u32 %v6148_v23, %v5102_v22 }
 0x135   : > { %v2677_v28 = vpop.f32.mrf.mxu1 }
 0x136   : > { %v7142_v31 = vadd.f32 %v2677_v28, %v2589_v26  ;;  %v6141_v28 = vld [vmem:[%s6946_s8 + $0x324] sm:$0xf] }
 0x138   : > { %v2628_v41 = vpop.f32.mrf.mxu2 }
 0x139   : > { %v2717_v44 = vpop.f32.mrf.mxu3  ;;  %v2629_v49 = vadd.f32 %v7032_v30, %v2628_v41 }
 0x13a   : > { %v2591_v55 = vpop.f32.mrf.mxu0 }
 0x13b   : > { %v7152_v54 = vadd.f32 %v2717_v44, %v2629_v49  ;;  %v2592_v58 = vadd.f32 %v7032_v30, %v2591_v55  ;;  %v5107_v44 = vor.u32 %v6141_v28, %v5104_v29  ;;  %v6340_v49 = vld [vmem:[#allocation5 + $0x258] sm:$0xff]  ;;  %v5163_v29 = vor.u32 %v6155_v18, %v5160_v19 }
 0x13c   : > { %3357 = vmatpush.bf16.msra.mxu1 %v6340_v49 }
 0x13d   : > { %v2680_v59 = vpop.f32.mrf.mxu1  ;;  %2768 = vmatmul.bf16.gmra.mxu2 %v5039_v51  ;;  %2946 = vmatmul.bf16.gmra.mxu0 %v5047_v53 }
 0x13e   : > { %2857 = vmatmul.bf16.gmra.mxu3 %v5043_v52  ;;  %v7155_v61 = vadd.f32 %v2680_v59, %v2592_v58 }
 0x140   : > { %3035 = vmatmul.bf16.gmra.mxu1 %v5051_v57  ;;  %v2631_v1 = vpop.f32.mrf.mxu2 }
 0x141   : > { %v2720_v2 = vpop.f32.mrf.mxu3  ;;  %v2632_v3 = vadd.f32 %v7032_v30, %v2631_v1 }
 0x142   : > { %v2593_v7 = vpop.f32.mrf.mxu0 }
 0x143   : > { %v7158_v5 = vadd.f32 %v2720_v2, %v2632_v3  ;;  %v2594_v9 = vadd.f32 %v7032_v30, %v2593_v7  ;;  %v6161_v2 = vld [vmem:[%s6946_s8 + $0x3bc] sm:$0xf0]  ;;  %v6154_v3 = vld [vmem:[%s6946_s8 + $0x38c] sm:$0xf]  ;;  %v5152_v7 = vld [vmem:[%s6946_s8 + $0x3c0] sm:$0xf0] }
 0x144   : > { %v5151_v22 = vor.u32 %v6161_v2, %v5150_v0  ;;  %v5155_v23 = vor.u32 %v6154_v3, %v5152_v7  ;;  %v6176_v0 = vld [vmem:[%s6946_s8 + $0x434] sm:$0xf0] }
 0x145   : > { %v2682_v10 = vpop.f32.mrf.mxu1 }
 0x146   : > { %v7162_v16 = vadd.f32 %v2682_v10, %v2594_v9  ;;  %v5158_v9 = vld [vmem:[%s6946_s8 + $0x390] sm:$0xf]  ;;  %v6162_v10 = vld [vmem:[%s6946_s8 + $0x3c4] sm:$0xf0] }
 0x148   : > { %v2633_v25 = vpop.f32.mrf.mxu2 }
 0x149   : > { %v2722_v26 = vpop.f32.mrf.mxu3  ;;  %v2634_v32 = vadd.f32 %v7032_v30, %v2633_v25  ;;  %v5159_v25 = vor.u32 %v6162_v10, %v5158_v9  ;;  %v6169_v9 = vld [vmem:[%s6946_s8 + $0x404] sm:$0xf] }
 0x14a   : > { %v2596_v41 = vpop.f32.mrf.mxu0 }
 0x14b   : > { %v7172_v39 = vadd.f32 %v2722_v26, %v2634_v32  ;;  %v2597_v45 = vadd.f32 %v7032_v30, %v2596_v41 }
 0x14d   : > { %v2685_v46 = vpop.f32.mrf.mxu1  ;;  %2773 = vmatmul.bf16.gmra.mxu2 %v5095_v35  ;;  %2951 = vmatmul.bf16.gmra.mxu0 %v5103_v38  ;;  %v6315_v35 = vld [vmem:[#allocation5 + $0x190] sm:$0xff] }
 0x14e   : > { %2862 = vmatmul.bf16.gmra.mxu3 %v5099_v36  ;;  %v7175_v51 = vadd.f32 %v2685_v46, %v2597_v45  ;;  %v6323_v36 = vld [vmem:[#allocation5 + $0x1d0] sm:$0xff]  ;;  %3091 = vmatpush.bf16.msra.mxu2 %v6315_v35 }
 0x14f   : > { %3180 = vmatpush.bf16.msra.mxu3 %v6323_v36 }
 0x150   : > { %3040 = vmatmul.bf16.gmra.mxu1 %v5107_v44  ;;  %v2636_v52 = vpop.f32.mrf.mxu2 }
 0x151   : > { %v2725_v53 = vpop.f32.mrf.mxu3  ;;  %v2637_v55 = vadd.f32 %v7032_v30, %v2636_v52  ;;  %v5206_v52 = vld [vmem:[%s6946_s8 + $0x3f8] sm:$0xf] }
 0x152   : > { %v2598_v58 = vpop.f32.mrf.mxu0 }
 0x153   : > { %v7178_v57 = vadd.f32 %v2725_v53, %v2637_v55  ;;  %v2599_v59 = vadd.f32 %v7032_v30, %v2598_v58  ;;  %v6331_v53 = vld [vmem:[#allocation5 + $0x210] sm:$0xff]  ;;  %v6168_v58 = vld [vmem:[%s6946_s8 + $0x3fc] sm:$0xf] }
 0x154   : > { %v6175_v55 = vld [vmem:[%s6946_s8 + $0x42c] sm:$0xf0]  ;;  %3269 = vmatpush.bf16.msra.mxu0 %v6331_v53 }
 0x155   : > { %v2687_v60 = vpop.f32.mrf.mxu1  ;;  %v5270_v53 = vld [vmem:[%s6946_s8 + $0x470] sm:$0xf] }
 0x156   : > { %v7182_v1 = vadd.f32 %v2687_v60, %v2599_v59  ;;  %v5208_v59 = vld [vmem:[%s6946_s8 + $0x430] sm:$0xf0]  ;;  %v5214_v60 = vld [vmem:[%s6946_s8 + $0x400] sm:$0xf] }
 0x157   : > { %v5215_v18 = vor.u32 %v6176_v0, %v5214_v60  ;;  %v6183_v60 = vld [vmem:[%s6946_s8 + $0x474] sm:$0xf]  ;;  %v5272_v0 = vld [vmem:[%s6946_s8 + $0x4a8] sm:$0xf0] }
 0x158   : > { %v2638_v14 = vpop.f32.mrf.mxu2 }
 0x159   : > { %v2727_v15 = vpop.f32.mrf.mxu3  ;;  %v2639_v21 = vadd.f32 %v7032_v30, %v2638_v14  ;;  %v5207_v14 = vor.u32 %v6175_v55, %v5206_v52  ;;  %v5264_v52 = vld [vmem:[%s6946_s8 + $0x4a0] sm:$0xf0]  ;;  %v6190_v55 = vld [vmem:[%s6946_s8 + $0x4a4] sm:$0xf0] }
 0x15a   : > { %v2917_v28 = vpop.f32.mrf.mxu0 }
 0x15b   : > { %v7192_v26 = vadd.f32 %v2727_v15, %v2639_v21  ;;  %v5211_v15 = vor.u32 %v6168_v58, %v5208_v59 }
 0x15d   : > { %v3006_v32 = vpop.f32.mrf.mxu1  ;;  %2778 = vmatmul.bf16.gmra.mxu2 %v5151_v22  ;;  %2956 = vmatmul.bf16.gmra.mxu0 %v5159_v25 }
 0x15e   : > { %2867 = vmatmul.bf16.gmra.mxu3 %v5155_v23 }
 0x160   : > { %3045 = vmatmul.bf16.gmra.mxu1 %v5163_v29  ;;  %v2739_v30 = vpop.f32.mrf.mxu2 }
 0x161   : > { %v2828_v38 = vpop.f32.mrf.mxu3  ;;  %v2740_v41 = vadd.f32 %v2739_v30, %v7035_v37  ;;  %v5216_v37 = vld [vmem:[%s6946_s8 + $0x438] sm:$0xf0] }
 0x162   : > { %v2919_v45 = vpop.f32.mrf.mxu0  ;;  %v5219_v22 = vor.u32 %v6169_v9, %v5216_v37  ;;  %v5271_v9 = vor.u32 %v6190_v55, %v5270_v53 }
 0x163   : > { %v2829_v44 = vadd.f32 %v2828_v38, %v2740_v41 }
 0x165   : > { %v3008_v46 = vpop.f32.mrf.mxu1  ;;  %v2918_v49 = vadd.f32 %v2917_v28, %v2829_v44  ;;  %v6339_v28 = vld [vmem:[#allocation5 + $0x250] sm:$0xff]  ;;  %v5262_v44 = vld [vmem:[%s6946_s8 + $0x468] sm:$0xf] }
 0x166   : > { %3358 = vmatpush.bf16.msra.mxu1 %v6339_v28 }
 0x167   : > { %v7201_v2 = vadd.f32 %v3006_v32, %v2918_v49  ;;  %v6182_v49 = vld [vmem:[%s6946_s8 + $0x46c] sm:$0xf] }
 0x168   : > { %v2741_v3 = vpop.f32.mrf.mxu2 }
 0x169   : > { %v2830_v7 = vpop.f32.mrf.mxu3  ;;  %v2742_v10 = vadd.f32 %v2741_v3, %v7043_v48 }
 0x16a   : > { %v2922_v21 = vpop.f32.mrf.mxu0 }
 0x16b   : > { %v2831_v19 = vadd.f32 %v2830_v7, %v2742_v10 }
 0x16d   : > { %v3011_v23 = vpop.f32.mrf.mxu1  ;;  %v2920_v25 = vadd.f32 %v2919_v45, %v2831_v19  ;;  %2783 = vmatmul.bf16.gmra.mxu2 %v5207_v14  ;;  %2961 = vmatmul.bf16.gmra.mxu0 %v5215_v18  ;;  %v6189_v45 = vld [vmem:[%s6946_s8 + $0x49c] sm:$0xf0]  ;;  %v5275_v14 = vor.u32 %v6183_v60, %v5272_v0  ;;  %v6314_v19 = vld [vmem:[#allocation5 + $0x188] sm:$0xff] }
 0x16e   : > { %2872 = vmatmul.bf16.gmra.mxu3 %v5211_v15  ;;  %v5263_v7 = vor.u32 %v6189_v45, %v5262_v44  ;;  %3092 = vmatpush.bf16.msra.mxu2 %v6314_v19  ;;  %v6196_v44 = vld [vmem:[%s6946_s8 + $0x4dc] sm:$0xf]  ;;  %v5320_v45 = vld [vmem:[%s6946_s8 + $0x510] sm:$0xf0] }
 0x16f   : > { %v7206_v48 = vadd.f32 %v3008_v46, %v2920_v25  ;;  %v5323_v0 = vor.u32 %v6196_v44, %v5320_v45 }
 0x170   : > { %3050 = vmatmul.bf16.gmra.mxu1 %v5219_v22  ;;  %v2744_v29 = vpop.f32.mrf.mxu2 }
 0x171   : > { %v2833_v32 = vpop.f32.mrf.mxu3  ;;  %v2745_v35 = vadd.f32 %v2744_v29, %v7055_v4  ;;  %v5267_v4 = vor.u32 %v6182_v49, %v5264_v52  ;;  %v5326_v49 = vld [vmem:[%s6946_s8 + $0x4e0] sm:$0xf]  ;;  %v6204_v52 = vld [vmem:[%s6946_s8 + $0x514] sm:$0xf0] }
 0x172   : > { %v2924_v30 = vpop.f32.mrf.mxu0 }
 0x173   : > { %v2834_v36 = vadd.f32 %v2833_v32, %v2745_v35 }
 0x175   : > { %v3013_v38 = vpop.f32.mrf.mxu1  ;;  %v2923_v41 = vadd.f32 %v2922_v21, %v2834_v36  ;;  %v6322_v21 = vld [vmem:[#allocation5 + $0x1c8] sm:$0xff]  ;;  %v5318_v36 = vld [vmem:[%s6946_s8 + $0x4d8] sm:$0xf] }
 0x176   : > { %3181 = vmatpush.bf16.msra.mxu3 %v6322_v21 }
 0x177   : > { %v7215_v58 = vadd.f32 %v3011_v23, %v2923_v41  ;;  %v6203_v41 = vld [vmem:[%s6946_s8 + $0x50c] sm:$0xf0] }
 0x178   : > { %v2746_v46 = vpop.f32.mrf.mxu2  ;;  %v5319_v60 = vor.u32 %v6203_v41, %v5318_v36  ;;  %v5376_v36 = vld [vmem:[%s6946_s8 + $0x580] sm:$0xf0]  ;;  %v6218_v41 = vld [vmem:[%s6946_s8 + $0x584] sm:$0xf0] }
 0x179   : > { %v2835_v59 = vpop.f32.mrf.mxu3  ;;  %v2747_v3 = vadd.f32 %v2746_v46, %v7062_v13  ;;  %v6197_v46 = vld [vmem:[%s6946_s8 + $0x4e4] sm:$0xf] }
 0x17a   : > { %v2927_v10 = vpop.f32.mrf.mxu0 }
 0x17b   : > { %v2836_v37 = vadd.f32 %v2835_v59, %v2747_v3  ;;  %v5327_v3 = vor.u32 %v6204_v52, %v5326_v49  ;;  %v6211_v49 = vld [vmem:[%s6946_s8 + $0x554] sm:$0xf]  ;;  %v5384_v52 = vld [vmem:[%s6946_s8 + $0x588] sm:$0xf0] }
 0x17d   : > { %v3016_v15 = vpop.f32.mrf.mxu1  ;;  %v2925_v18 = vadd.f32 %v2924_v30, %v2836_v37  ;;  %2788 = vmatmul.bf16.gmra.mxu2 %v5263_v7  ;;  %2966 = vmatmul.bf16.gmra.mxu0 %v5271_v9  ;;  %v6330_v30 = vld [vmem:[#allocation5 + $0x208] sm:$0xff] }
 0x17e   : > { %2877 = vmatmul.bf16.gmra.mxu3 %v5267_v4  ;;  %3270 = vmatpush.bf16.msra.mxu0 %v6330_v30  ;;  %v5382_v30 = vld [vmem:[%s6946_s8 + $0x550] sm:$0xf] }
 0x17f   : > { %v7220_v13 = vadd.f32 %v3013_v38, %v2925_v18 }
 0x180   : > { %3055 = vmatmul.bf16.gmra.mxu1 %v5275_v14  ;;  %v2749_v22 = vpop.f32.mrf.mxu2  ;;  %v6338_v14 = vld [vmem:[#allocation5 + $0x248] sm:$0xff] }
 0x181   : > { %v2838_v23 = vpop.f32.mrf.mxu3  ;;  %v2750_v25 = vadd.f32 %v2749_v22, %v7075_v34  ;;  %v5328_v34 = vld [vmem:[%s6946_s8 + $0x518] sm:$0xf0]  ;;  %3359 = vmatpush.bf16.msra.mxu1 %v6338_v14 }
 0x182   : > { %v2929_v29 = vpop.f32.mrf.mxu0  ;;  %v5331_v9 = vor.u32 %v6197_v46, %v5328_v34  ;;  %v5383_v46 = vor.u32 %v6218_v41, %v5382_v30 }
 0x183   : > { %v2839_v28 = vadd.f32 %v2838_v23, %v2750_v25 }
 0x185   : > { %v3018_v32 = vpop.f32.mrf.mxu1  ;;  %v2928_v35 = vadd.f32 %v2927_v10, %v2839_v28  ;;  %v5374_v28 = vld [vmem:[%s6946_s8 + $0x548] sm:$0xf] }
 0x187   : > { %v7229_v38 = vadd.f32 %v3016_v15, %v2928_v35  ;;  %v6210_v35 = vld [vmem:[%s6946_s8 + $0x54c] sm:$0xf] }
 0x188   : > { %v2751_v53 = vpop.f32.mrf.mxu2 }
 0x189   : > { %v2840_v55 = vpop.f32.mrf.mxu3  ;;  %v2752_v59 = vadd.f32 %v2751_v53, %v7083_v47 }
 0x18a   : > { %v2932_v4 = vpop.f32.mrf.mxu0 }
 0x18b   : > { %v2841_v7 = vadd.f32 %v2840_v55, %v2752_v59 }
 0x18d   : > { %v3021_v37 = vpop.f32.mrf.mxu1  ;;  %v2930_v10 = vadd.f32 %v2929_v29, %v2841_v7  ;;  %2793 = vmatmul.bf16.gmra.mxu2 %v5319_v60  ;;  %2971 = vmatmul.bf16.gmra.mxu0 %v5327_v3  ;;  %v6217_v29 = vld [vmem:[%s6946_s8 + $0x57c] sm:$0xf0]  ;;  %v5387_v60 = vor.u32 %v6211_v49, %v5384_v52 }
 0x18e   : > { %2882 = vmatmul.bf16.gmra.mxu3 %v5323_v0  ;;  %v5375_v55 = vor.u32 %v6217_v29, %v5374_v28  ;;  %v6313_v7 = vld [vmem:[#allocation5 + $0x180] sm:$0xff]  ;;  %v6224_v28 = vld [vmem:[%s6946_s8 + $0x5bc] sm:$0xf]  ;;  %v5432_v29 = vld [vmem:[%s6946_s8 + $0x5f0] sm:$0xf0] }
 0x18f   : > { %v7234_v47 = vadd.f32 %v3018_v32, %v2930_v10  ;;  %3093 = vmatpush.bf16.msra.mxu2 %v6313_v7  ;;  %v5435_v52 = vor.u32 %v6224_v28, %v5432_v29 }
 0x190   : > { %3060 = vmatmul.bf16.gmra.mxu1 %v5331_v9  ;;  %v2754_v15 = vpop.f32.mrf.mxu2 }
 0x191   : > { %v2843_v18 = vpop.f32.mrf.mxu3  ;;  %v2755_v19 = vadd.f32 %v2754_v15, %v7095_v6  ;;  %v5379_v6 = vor.u32 %v6210_v35, %v5376_v36  ;;  %v5438_v35 = vld [vmem:[%s6946_s8 + $0x5c0] sm:$0xf]  ;;  %v6232_v36 = vld [vmem:[%s6946_s8 + $0x5f4] sm:$0xf0] }
 0x192   : > { %v2934_v22 = vpop.f32.mrf.mxu0 }
 0x193   : > { %v2844_v21 = vadd.f32 %v2843_v18, %v2755_v19 }
 0x195   : > { %v3023_v23 = vpop.f32.mrf.mxu1  ;;  %v2933_v25 = vadd.f32 %v2932_v4, %v2844_v21  ;;  %v6321_v4 = vld [vmem:[#allocation5 + $0x1c0] sm:$0xff]  ;;  %v5430_v21 = vld [vmem:[%s6946_s8 + $0x5b8] sm:$0xf] }
 0x196   : > { %3182 = vmatpush.bf16.msra.mxu3 %v6321_v4 }
 0x197   : > { %v7243_v44 = vadd.f32 %v3021_v37, %v2933_v25  ;;  %v6231_v25 = vld [vmem:[%s6946_s8 + $0x5ec] sm:$0xf0] }
 0x198   : > { %v2756_v32 = vpop.f32.mrf.mxu2  ;;  %v5431_v49 = vor.u32 %v6231_v25, %v5430_v21  ;;  %v5488_v21 = vld [vmem:[%s6946_s8 + $0x660] sm:$0xf0]  ;;  %v6246_v25 = vld [vmem:[%s6946_s8 + $0x664] sm:$0xf0] }
 0x199   : > { %v2845_v45 = vpop.f32.mrf.mxu3  ;;  %v2757_v53 = vadd.f32 %v2756_v32, %v7102_v17  ;;  %v6225_v32 = vld [vmem:[%s6946_s8 + $0x5c4] sm:$0xf] }
 0x19a   : > { %v2937_v59 = vpop.f32.mrf.mxu0 }
 0x19b   : > { %v2846_v34 = vadd.f32 %v2845_v45, %v2757_v53  ;;  %v5439_v53 = vor.u32 %v6232_v36, %v5438_v35  ;;  %v6239_v35 = vld [vmem:[%s6946_s8 + $0x634] sm:$0xf]  ;;  %v5496_v36 = vld [vmem:[%s6946_s8 + $0x668] sm:$0xf0] }
 0x19d   : > { %v3026_v0 = vpop.f32.mrf.mxu1  ;;  %v2935_v3 = vadd.f32 %v2934_v22, %v2846_v34  ;;  %2798 = vmatmul.bf16.gmra.mxu2 %v5375_v55  ;;  %2976 = vmatmul.bf16.gmra.mxu0 %v5383_v46  ;;  %v6329_v22 = vld [vmem:[#allocation5 + $0x200] sm:$0xff] }
 0x19e   : > { %2887 = vmatmul.bf16.gmra.mxu3 %v5379_v6  ;;  %3271 = vmatpush.bf16.msra.mxu0 %v6329_v22  ;;  %v5494_v22 = vld [vmem:[%s6946_s8 + $0x630] sm:$0xf] }
 0x19f   : > { %v7248_v17 = vadd.f32 %v3023_v23, %v2935_v3 }
 0x1a0   : > { %3065 = vmatmul.bf16.gmra.mxu1 %v5387_v60  ;;  %v2759_v9 = vpop.f32.mrf.mxu2  ;;  %v6337_v60 = vld [vmem:[#allocation5 + $0x240] sm:$0xff] }
 0x1a1   : > { %v2848_v37 = vpop.f32.mrf.mxu3  ;;  %v2760_v10 = vadd.f32 %v2759_v9, %v7115_v43  ;;  %v5440_v43 = vld [vmem:[%s6946_s8 + $0x5f8] sm:$0xf0]  ;;  %3360 = vmatpush.bf16.msra.mxu1 %v6337_v60 }
 0x1a2   : > { %v2939_v15 = vpop.f32.mrf.mxu0  ;;  %v5443_v46 = vor.u32 %v6225_v32, %v5440_v43  ;;  %v5495_v32 = vor.u32 %v6246_v25, %v5494_v22 }
 0x1a3   : > { %v2849_v14 = vadd.f32 %v2848_v37, %v2760_v10 }
 0x1a5   : > { %v3028_v18 = vpop.f32.mrf.mxu1  ;;  %v2938_v19 = vadd.f32 %v2937_v59, %v2849_v14  ;;  %v5486_v14 = vld [vmem:[%s6946_s8 + $0x628] sm:$0xf] }
 0x1a7   : > { %v7257_v23 = vadd.f32 %v3026_v0, %v2938_v19  ;;  %v6238_v19 = vld [vmem:[%s6946_s8 + $0x62c] sm:$0xf] }
 0x1a8   : > { %v2761_v30 = vpop.f32.mrf.mxu2 }
 0x1a9   : > { %v2850_v41 = vpop.f32.mrf.mxu3  ;;  %v2762_v45 = vadd.f32 %v2761_v30, %v7123_v56 }
 0x1aa   : > { %v2942_v6 = vpop.f32.mrf.mxu0 }
 0x1ab   : > { %v2851_v55 = vadd.f32 %v2850_v41, %v2762_v45 }
 0x1ad   : > { %v3031_v34 = vpop.f32.mrf.mxu1  ;;  %v2940_v59 = vadd.f32 %v2939_v15, %v2851_v55  ;;  %2803 = vmatmul.bf16.gmra.mxu2 %v5431_v49  ;;  %2981 = vmatmul.bf16.gmra.mxu0 %v5439_v53  ;;  %v6245_v15 = vld [vmem:[%s6946_s8 + $0x65c] sm:$0xf0]  ;;  %v5499_v49 = vor.u32 %v6239_v35, %v5496_v36  ;;  %v6352_v55 = vld [vmem:[#allocation5 + $0x2b8] sm:$0xff] }
 0x1ae   : > { %2892 = vmatmul.bf16.gmra.mxu3 %v5435_v52  ;;  %v5487_v41 = vor.u32 %v6245_v15, %v5486_v14  ;;  %3442 = vmatpush.bf16.msrb.mxu2 %v6352_v55  ;;  %v6252_v14 = vld [vmem:[%s6946_s8 + $0x69c] sm:$0xf]  ;;  %v5544_v15 = vld [vmem:[%s6946_s8 + $0x6d0] sm:$0xf0] }
 0x1af   : > { %v7262_v56 = vadd.f32 %v3028_v18, %v2940_v59  ;;  %v5547_v36 = vor.u32 %v6252_v14, %v5544_v15 }
 0x1b0   : > { %3070 = vmatmul.bf16.gmra.mxu1 %v5443_v46  ;;  %v2764_v0 = vpop.f32.mrf.mxu2 }
 0x1b1   : > { %v2853_v3 = vpop.f32.mrf.mxu3  ;;  %v2765_v7 = vadd.f32 %v2764_v0, %v7135_v20  ;;  %v5491_v20 = vor.u32 %v6238_v19, %v5488_v21  ;;  %v5550_v19 = vld [vmem:[%s6946_s8 + $0x6a0] sm:$0xf]  ;;  %v6260_v21 = vld [vmem:[%s6946_s8 + $0x6d4] sm:$0xf0] }
 0x1b2   : > { %v2944_v9 = vpop.f32.mrf.mxu0 }
 0x1b3   : > { %v2854_v4 = vadd.f32 %v2853_v3, %v2765_v7 }
 0x1b5   : > { %v3033_v37 = vpop.f32.mrf.mxu1  ;;  %v2943_v10 = vadd.f32 %v2942_v6, %v2854_v4  ;;  %v6360_v6 = vld [vmem:[#allocation5 + $0x2f8] sm:$0xff] }
 0x1b6   : > { %3531 = vmatpush.bf16.msrb.mxu3 %v6360_v6  ;;  %v5542_v4 = vld [vmem:[%s6946_s8 + $0x698] sm:$0xf] }
 0x1b7   : > { %v7271_v28 = vadd.f32 %v3031_v34, %v2943_v10  ;;  %v6259_v10 = vld [vmem:[%s6946_s8 + $0x6cc] sm:$0xf0] }
 0x1b8   : > { %v2766_v18 = vpop.f32.mrf.mxu2  ;;  %v5543_v35 = vor.u32 %v6259_v10, %v5542_v4  ;;  %v4720_v4 = vld [vmem:[%s6946_s8 + $0x50] sm:$0xf0]  ;;  %v6052_v10 = vld [vmem:[%s6946_s8 + $0x54] sm:$0xf0] }
 0x1b9   : > { %v2855_v29 = vpop.f32.mrf.mxu3  ;;  %v2767_v30 = vadd.f32 %v2766_v18, %v7142_v31  ;;  %v6253_v18 = vld [vmem:[%s6946_s8 + $0x6a4] sm:$0xf] }
 0x1ba   : > { %v2947_v45 = vpop.f32.mrf.mxu0 }
 0x1bb   : > { %v2856_v43 = vadd.f32 %v2855_v29, %v2767_v30  ;;  %v5551_v30 = vor.u32 %v6260_v21, %v5550_v19  ;;  %v6045_v19 = vld [vmem:[%s6946_s8 + $0x24] sm:$0xf]  ;;  %v4728_v21 = vld [vmem:[%s6946_s8 + $0x58] sm:$0xf0] }
 0x1bd   : > { %v3036_v52 = vpop.f32.mrf.mxu1  ;;  %v2945_v53 = vadd.f32 %v2944_v9, %v2856_v43  ;;  %2808 = vmatmul.bf16.gmra.mxu2 %v5487_v41  ;;  %2986 = vmatmul.bf16.gmra.mxu0 %v5495_v32  ;;  %v6368_v9 = vld [vmem:[#allocation5 + $0x338] sm:$0xff] }
 0x1be   : > { %2897 = vmatmul.bf16.gmra.mxu3 %v5491_v20  ;;  %3620 = vmatpush.bf16.msrb.mxu0 %v6368_v9  ;;  %v4726_v9 = vld [vmem:[%s6946_s8 + $0x20] sm:$0xf] }
 0x1bf   : > { %v7276_v31 = vadd.f32 %v3033_v37, %v2945_v53 }
 0x1c0   : > { %3075 = vmatmul.bf16.gmra.mxu1 %v5499_v49  ;;  %v2769_v46 = vpop.f32.mrf.mxu2  ;;  %v6376_v49 = vld [vmem:[#allocation5 + $0x378] sm:$0xff] }
 0x1c1   : > { %v2858_v34 = vpop.f32.mrf.mxu3  ;;  %v2770_v59 = vadd.f32 %v2769_v46, %v7155_v61  ;;  %v5552_v61 = vld [vmem:[%s6946_s8 + $0x6d8] sm:$0xf0]  ;;  %3709 = vmatpush.bf16.msrb.mxu1 %v6376_v49 }
 0x1c2   : > { %v2949_v0 = vpop.f32.mrf.mxu0  ;;  %v5555_v32 = vor.u32 %v6253_v18, %v5552_v61  ;;  %v4727_v18 = vor.u32 %v6052_v10, %v4726_v9 }
 0x1c3   : > { %v2859_v60 = vadd.f32 %v2858_v34, %v2770_v59 }
 0x1c5   : > { %v3038_v3 = vpop.f32.mrf.mxu1  ;;  %v2948_v7 = vadd.f32 %v2947_v45, %v2859_v60  ;;  %v4718_v60 = vld [vmem:[%s6946_s8 + $0x18] sm:$0xf] }
 0x1c7   : > { %v7285_v37 = vadd.f32 %v3036_v52, %v2948_v7  ;;  %v6044_v7 = vld [vmem:[%s6946_s8 + $0x1c] sm:$0xf] }
 0x1c8   : > { %v2771_v22 = vpop.f32.mrf.mxu2 }
 0x1c9   : > { %v2860_v25 = vpop.f32.mrf.mxu3  ;;  %v2772_v29 = vadd.f32 %v2771_v22, %v7162_v16 }
 0x1ca   : > { %v2952_v20 = vpop.f32.mrf.mxu0 }
 0x1cb   : > { %v2861_v41 = vadd.f32 %v2860_v25, %v2772_v29 }
 0x1cd   : > { %v3041_v43 = vpop.f32.mrf.mxu1  ;;  %v2950_v45 = vadd.f32 %v2949_v0, %v2861_v41  ;;  %2813 = vmatmul.bf16.gmra.mxu2 %v5543_v35  ;;  %2991 = vmatmul.bf16.gmra.mxu0 %v5551_v30  ;;  %v6051_v0 = vld [vmem:[%s6946_s8 + $0x4c] sm:$0xf0]  ;;  %v4731_v35 = vor.u32 %v6045_v19, %v4728_v21 }
 0x1ce   : > { %2902 = vmatmul.bf16.gmra.mxu3 %v5547_v36  ;;  %v4719_v25 = vor.u32 %v6051_v0, %v4718_v60  ;;  %v6351_v41 = vld [vmem:[#allocation5 + $0x2b0] sm:$0xff]  ;;  %v6058_v60 = vld [vmem:[%s6946_s8 + $0x8c] sm:$0xf]  ;;  %v4776_v0 = vld [vmem:[%s6946_s8 + $0xc0] sm:$0xf0] }
 0x1cf   : > { %v7290_v16 = vadd.f32 %v3038_v3, %v2950_v45  ;;  %3443 = vmatpush.bf16.msrb.mxu2 %v6351_v41  ;;  %v4779_v21 = vor.u32 %v6058_v60, %v4776_v0 }
 0x1d0   : > { %3080 = vmatmul.bf16.gmra.mxu1 %v5555_v32  ;;  %v2774_v52 = vpop.f32.mrf.mxu2 }
 0x1d1   : > { %v2863_v53 = vpop.f32.mrf.mxu3  ;;  %v2775_v55 = vadd.f32 %v2774_v52, %v7175_v51  ;;  %v4723_v51 = vor.u32 %v6044_v7, %v4720_v4  ;;  %v4782_v7 = vld [vmem:[%s6946_s8 + $0x90] sm:$0xf]  ;;  %v6066_v4 = vld [vmem:[%s6946_s8 + $0xc4] sm:$0xf0] }
 0x1d2   : > { %v2954_v46 = vpop.f32.mrf.mxu0 }
 0x1d3   : > { %v2864_v6 = vadd.f32 %v2863_v53, %v2775_v55 }
 0x1d5   : > { %v3043_v34 = vpop.f32.mrf.mxu1  ;;  %v2953_v59 = vadd.f32 %v2952_v20, %v2864_v6  ;;  %v6359_v20 = vld [vmem:[#allocation5 + $0x2f0] sm:$0xff]  ;;  %v4774_v6 = vld [vmem:[%s6946_s8 + $0x88] sm:$0xf] }
 0x1d6   : > { %3532 = vmatpush.bf16.msrb.mxu3 %v6359_v20 }
 0x1d7   : > { %v7299_v14 = vadd.f32 %v3041_v43, %v2953_v59  ;;  %v6065_v59 = vld [vmem:[%s6946_s8 + $0xbc] sm:$0xf0] }
 0x1d8   : > { %v2776_v3 = vpop.f32.mrf.mxu2  ;;  %v4775_v19 = vor.u32 %v6065_v59, %v4774_v6  ;;  %v4832_v6 = vld [vmem:[%s6946_s8 + $0x130] sm:$0xf0]  ;;  %v6080_v59 = vld [vmem:[%s6946_s8 + $0x134] sm:$0xf0] }
 0x1d9   : > { %v2865_v15 = vpop.f32.mrf.mxu3  ;;  %v2777_v22 = vadd.f32 %v2776_v3, %v7182_v1  ;;  %v6059_v3 = vld [vmem:[%s6946_s8 + $0x94] sm:$0xf] }
 0x1da   : > { %v2957_v29 = vpop.f32.mrf.mxu0 }
 0x1db   : > { %v2866_v61 = vadd.f32 %v2865_v15, %v2777_v22  ;;  %v4783_v22 = vor.u32 %v6066_v4, %v4782_v7  ;;  %v6073_v7 = vld [vmem:[%s6946_s8 + $0x104] sm:$0xf]  ;;  %v4840_v4 = vld [vmem:[%s6946_s8 + $0x138] sm:$0xf0] }
 0x1dd   : > { %v3046_v36 = vpop.f32.mrf.mxu1  ;;  %v2955_v30 = vadd.f32 %v2954_v46, %v2866_v61  ;;  %3094 = vmatmul.bf16.vlgmr.msra.gmra.mxu2 %v4719_v25  ;;  %3272 = vmatmul.bf16.vlgmr.msra.gmra.mxu0 %v4727_v18  ;;  %v6367_v46 = vld [vmem:[#allocation5 + $0x330] sm:$0xff] }
 0x1de   : > { %3183 = vmatmul.bf16.vlgmr.msra.gmra.mxu3 %v4723_v51  ;;  %3621 = vmatpush.bf16.msrb.mxu0 %v6367_v46  ;;  %v4838_v46 = vld [vmem:[%s6946_s8 + $0x100] sm:$0xf] }
 0x1df   : > { %v7304_v1 = vadd.f32 %v3043_v34, %v2955_v30 }
 0x1e0   : > { %3361 = vmatmul.bf16.vlgmr.msra.gmra.mxu1 %v4731_v35  ;;  %v2779_v32 = vpop.f32.mrf.mxu2  ;;  %v6375_v35 = vld [vmem:[#allocation5 + $0x370] sm:$0xff] }
 0x1e1   : > { %v2868_v43 = vpop.f32.mrf.mxu3  ;;  %v2780_v45 = vadd.f32 %v2779_v32, %v7038_v42  ;;  %v4784_v42 = vld [vmem:[%s6946_s8 + $0xc8] sm:$0xf0]  ;;  %3710 = vmatpush.bf16.msrb.mxu1 %v6375_v35 }
 0x1e2   : > { %v2959_v52 = vpop.f32.mrf.mxu0  ;;  %v4787_v18 = vor.u32 %v6059_v3, %v4784_v42  ;;  %v4839_v3 = vor.u32 %v6080_v59, %v4838_v46 }
 0x1e3   : > { %v2869_v49 = vadd.f32 %v2868_v43, %v2780_v45 }
 0x1e5   : > { %v3048_v53 = vpop.f32.mrf.mxu1  ;;  %v2958_v55 = vadd.f32 %v2957_v29, %v2869_v49  ;;  %v4830_v49 = vld [vmem:[%s6946_s8 + $0xf8] sm:$0xf] }
 0x1e7   : > { %v7313_v34 = vadd.f32 %v3046_v36, %v2958_v55  ;;  %v6072_v55 = vld [vmem:[%s6946_s8 + $0xfc] sm:$0xf] }
 0x1e8   : > { %v2781_v9 = vpop.f32.mrf.mxu2 }
 0x1e9   : > { %v2870_v10 = vpop.f32.mrf.mxu3  ;;  %v2782_v15 = vadd.f32 %v2781_v9, %v7052_v62 }
 0x1ea   : > { %v2962_v51 = vpop.f32.mrf.mxu0 }
 0x1eb   : > { %v2871_v25 = vadd.f32 %v2870_v10, %v2782_v15 }
 0x1ed   : > { %v3051_v61 = vpop.f32.mrf.mxu1  ;;  %v2960_v29 = vadd.f32 %v2959_v52, %v2871_v25  ;;  %3099 = vmatmul.bf16.gmra.mxu2 %v4775_v19  ;;  %3277 = vmatmul.bf16.gmra.mxu0 %v4783_v22  ;;  %v6079_v52 = vld [vmem:[%s6946_s8 + $0x12c] sm:$0xf0]  ;;  %v4843_v19 = vor.u32 %v6073_v7, %v4840_v4  ;;  %v6350_v25 = vld [vmem:[#allocation5 + $0x2a8] sm:$0xff] }
 0x1ee   : > { %3188 = vmatmul.bf16.gmra.mxu3 %v4779_v21  ;;  %v4831_v10 = vor.u32 %v6079_v52, %v4830_v49  ;;  %3444 = vmatpush.bf16.msrb.mxu2 %v6350_v25  ;;  %v6086_v49 = vld [vmem:[%s6946_s8 + $0x16c] sm:$0xf]  ;;  %v4888_v52 = vld [vmem:[%s6946_s8 + $0x1a0] sm:$0xf0] }
 0x1ef   : > { %v7318_v62 = vadd.f32 %v3048_v53, %v2960_v29  ;;  %v4891_v4 = vor.u32 %v6086_v49, %v4888_v52 }
 0x1f0   : > { %3366 = vmatmul.bf16.gmra.mxu1 %v4787_v18  ;;  %v2784_v36 = vpop.f32.mrf.mxu2 }
 0x1f1   : > { %v2873_v30 = vpop.f32.mrf.mxu3  ;;  %v2785_v41 = vadd.f32 %v2784_v36, %v7058_v8  ;;  %v4835_v8 = vor.u32 %v6072_v55, %v4832_v6  ;;  %v4894_v55 = vld [vmem:[%s6946_s8 + $0x170] sm:$0xf]  ;;  %v6094_v6 = vld [vmem:[%s6946_s8 + $0x1a4] sm:$0xf0] }
 0x1f2   : > { %v2964_v32 = vpop.f32.mrf.mxu0 }
 0x1f3   : > { %v2874_v20 = vadd.f32 %v2873_v30, %v2785_v41 }
 0x1f5   : > { %v3053_v43 = vpop.f32.mrf.mxu1  ;;  %v2963_v45 = vadd.f32 %v2962_v51, %v2874_v20  ;;  %v6358_v51 = vld [vmem:[#allocation5 + $0x2e8] sm:$0xff] }
 0x1f6   : > { %3533 = vmatpush.bf16.msrb.mxu3 %v6358_v51  ;;  %v4886_v20 = vld [vmem:[%s6946_s8 + $0x168] sm:$0xf] }
 0x1f7   : > { %v7327_v60 = vadd.f32 %v3051_v61, %v2963_v45  ;;  %v6093_v45 = vld [vmem:[%s6946_s8 + $0x19c] sm:$0xf0] }
 0x1f8   : > { %v2786_v53 = vpop.f32.mrf.mxu2  ;;  %v4887_v7 = vor.u32 %v6093_v45, %v4886_v20  ;;  %v4944_v20 = vld [vmem:[%s6946_s8 + $0x210] sm:$0xf0]  ;;  %v6108_v45 = vld [vmem:[%s6946_s8 + $0x214] sm:$0xf0] }
 0x1f9   : > { %v2875_v0 = vpop.f32.mrf.mxu3  ;;  %v2787_v9 = vadd.f32 %v2786_v53, %v7072_v27  ;;  %v6087_v53 = vld [vmem:[%s6946_s8 + $0x174] sm:$0xf] }
 0x1fa   : > { %v2967_v15 = vpop.f32.mrf.mxu0 }
 0x1fb   : > { %v2876_v42 = vadd.f32 %v2875_v0, %v2787_v9  ;;  %v4895_v9 = vor.u32 %v6094_v6, %v4894_v55  ;;  %v6101_v55 = vld [vmem:[%s6946_s8 + $0x1e4] sm:$0xf]  ;;  %v4952_v6 = vld [vmem:[%s6946_s8 + $0x218] sm:$0xf0] }
 0x1fd   : > { %v3056_v21 = vpop.f32.mrf.mxu1  ;;  %v2965_v22 = vadd.f32 %v2964_v32, %v2876_v42  ;;  %3104 = vmatmul.bf16.gmra.mxu2 %v4831_v10  ;;  %3282 = vmatmul.bf16.gmra.mxu0 %v4839_v3  ;;  %v6366_v32 = vld [vmem:[#allocation5 + $0x328] sm:$0xff] }
 0x1fe   : > { %3193 = vmatmul.bf16.gmra.mxu3 %v4835_v8  ;;  %3622 = vmatpush.bf16.msrb.mxu0 %v6366_v32  ;;  %v4950_v32 = vld [vmem:[%s6946_s8 + $0x1e0] sm:$0xf] }
 0x1ff   : > { %v7332_v27 = vadd.f32 %v3053_v43, %v2965_v22 }
 0x200   : > { %3371 = vmatmul.bf16.gmra.mxu1 %v4843_v19  ;;  %v2789_v18 = vpop.f32.mrf.mxu2  ;;  %v6374_v19 = vld [vmem:[#allocation5 + $0x368] sm:$0xff] }
 0x201   : > { %v2878_v61 = vpop.f32.mrf.mxu3  ;;  %v2790_v29 = vadd.f32 %v2789_v18, %v7078_v40  ;;  %v4896_v40 = vld [vmem:[%s6946_s8 + $0x1a8] sm:$0xf0]  ;;  %3711 = vmatpush.bf16.msrb.mxu1 %v6374_v19 }
 0x202   : > { %v2969_v36 = vpop.f32.mrf.mxu0  ;;  %v4899_v3 = vor.u32 %v6087_v53, %v4896_v40  ;;  %v4951_v53 = vor.u32 %v6108_v45, %v4950_v32 }
 0x203   : > { %v2879_v35 = vadd.f32 %v2878_v61, %v2790_v29 }
 0x205   : > { %v3058_v30 = vpop.f32.mrf.mxu1  ;;  %v2968_v41 = vadd.f32 %v2967_v15, %v2879_v35  ;;  %v4942_v35 = vld [vmem:[%s6946_s8 + $0x1d8] sm:$0xf] }
 0x207   : > { %v7341_v43 = vadd.f32 %v3056_v21, %v2968_v41  ;;  %v6100_v41 = vld [vmem:[%s6946_s8 + $0x1dc] sm:$0xf] }
 0x208   : > { %v2791_v46 = vpop.f32.mrf.mxu2 }
 0x209   : > { %v2880_v59 = vpop.f32.mrf.mxu3  ;;  %v2792_v0 = vadd.f32 %v2791_v46, %v7092_v63 }
 0x20a   : > { %v2972_v8 = vpop.f32.mrf.mxu0 }
 0x20b   : > { %v2881_v10 = vadd.f32 %v2880_v59, %v2792_v0 }
 0x20d   : > { %v3061_v42 = vpop.f32.mrf.mxu1  ;;  %v2970_v15 = vadd.f32 %v2969_v36, %v2881_v10  ;;  %3109 = vmatmul.bf16.gmra.mxu2 %v4887_v7  ;;  %3287 = vmatmul.bf16.gmra.mxu0 %v4895_v9  ;;  %v6107_v36 = vld [vmem:[%s6946_s8 + $0x20c] sm:$0xf0]  ;;  %v4955_v7 = vor.u32 %v6101_v55, %v4952_v6  ;;  %v6349_v10 = vld [vmem:[#allocation5 + $0x2a0] sm:$0xff] }
 0x20e   : > { %3198 = vmatmul.bf16.gmra.mxu3 %v4891_v4  ;;  %v4943_v59 = vor.u32 %v6107_v36, %v4942_v35  ;;  %3445 = vmatpush.bf16.msrb.mxu2 %v6349_v10  ;;  %v6114_v35 = vld [vmem:[%s6946_s8 + $0x24c] sm:$0xf]  ;;  %v5000_v36 = vld [vmem:[%s6946_s8 + $0x280] sm:$0xf0] }
 0x20f   : > { %v7346_v63 = vadd.f32 %v3058_v30, %v2970_v15  ;;  %v5003_v6 = vor.u32 %v6114_v35, %v5000_v36 }
 0x210   : > { %3376 = vmatmul.bf16.gmra.mxu1 %v4899_v3  ;;  %v2794_v21 = vpop.f32.mrf.mxu2 }
 0x211   : > { %v2883_v22 = vpop.f32.mrf.mxu3  ;;  %v2795_v25 = vadd.f32 %v2794_v21, %v7098_v11  ;;  %v4947_v11 = vor.u32 %v6100_v41, %v4944_v20  ;;  %v5006_v41 = vld [vmem:[%s6946_s8 + $0x250] sm:$0xf]  ;;  %v6122_v20 = vld [vmem:[%s6946_s8 + $0x284] sm:$0xf0] }
 0x212   : > { %v2974_v18 = vpop.f32.mrf.mxu0 }
 0x213   : > { %v2884_v51 = vadd.f32 %v2883_v22, %v2795_v25 }
 0x215   : > { %v3063_v61 = vpop.f32.mrf.mxu1  ;;  %v2973_v29 = vadd.f32 %v2972_v8, %v2884_v51  ;;  %v6357_v8 = vld [vmem:[#allocation5 + $0x2e0] sm:$0xff]  ;;  %v4998_v51 = vld [vmem:[%s6946_s8 + $0x248] sm:$0xf] }
 0x216   : > { %3534 = vmatpush.bf16.msrb.mxu3 %v6357_v8 }
 0x217   : > { %v7355_v49 = vadd.f32 %v3061_v42, %v2973_v29  ;;  %v6121_v29 = vld [vmem:[%s6946_s8 + $0x27c] sm:$0xf0] }
 0x218   : > { %v2796_v30 = vpop.f32.mrf.mxu2  ;;  %v4999_v55 = vor.u32 %v6121_v29, %v4998_v51  ;;  %v5056_v51 = vld [vmem:[%s6946_s8 + $0x2f0] sm:$0xf0]  ;;  %v6136_v29 = vld [vmem:[%s6946_s8 + $0x2f4] sm:$0xf0] }
 0x219   : > { %v2885_v52 = vpop.f32.mrf.mxu3  ;;  %v2797_v46 = vadd.f32 %v2796_v30, %v7112_v33  ;;  %v6115_v30 = vld [vmem:[%s6946_s8 + $0x254] sm:$0xf] }
 0x21a   : > { %v2977_v0 = vpop.f32.mrf.mxu0 }
 0x21b   : > { %v2886_v40 = vadd.f32 %v2885_v52, %v2797_v46  ;;  %v5007_v46 = vor.u32 %v6122_v20, %v5006_v41  ;;  %v6129_v41 = vld [vmem:[%s6946_s8 + $0x2c4] sm:$0xf]  ;;  %v5064_v20 = vld [vmem:[%s6946_s8 + $0x2f8] sm:$0xf0] }
 0x21d   : > { %v3066_v4 = vpop.f32.mrf.mxu1  ;;  %v2975_v9 = vadd.f32 %v2974_v18, %v2886_v40  ;;  %3114 = vmatmul.bf16.gmra.mxu2 %v4943_v59  ;;  %3292 = vmatmul.bf16.gmra.mxu0 %v4951_v53  ;;  %v6365_v18 = vld [vmem:[#allocation5 + $0x320] sm:$0xff] }
 0x21e   : > { %3203 = vmatmul.bf16.gmra.mxu3 %v4947_v11  ;;  %3623 = vmatpush.bf16.msrb.mxu0 %v6365_v18  ;;  %v5062_v18 = vld [vmem:[%s6946_s8 + $0x2c0] sm:$0xf] }
 0x21f   : > { %v7360_v33 = vadd.f32 %v3063_v61, %v2975_v9 }
 0x220   : > { %3381 = vmatmul.bf16.gmra.mxu1 %v4955_v7  ;;  %v2799_v3 = vpop.f32.mrf.mxu2  ;;  %v6373_v7 = vld [vmem:[#allocation5 + $0x360] sm:$0xff] }
 0x221   : > { %v2888_v42 = vpop.f32.mrf.mxu3  ;;  %v2800_v15 = vadd.f32 %v2799_v3, %v7118_v50  ;;  %v5008_v50 = vld [vmem:[%s6946_s8 + $0x288] sm:$0xf0]  ;;  %3712 = vmatpush.bf16.msrb.mxu1 %v6373_v7 }
 0x222   : > { %v2979_v21 = vpop.f32.mrf.mxu0  ;;  %v5011_v53 = vor.u32 %v6115_v30, %v5008_v50  ;;  %v5063_v30 = vor.u32 %v6136_v29, %v5062_v18 }
 0x223   : > { %v2889_v19 = vadd.f32 %v2888_v42, %v2800_v15 }
 0x225   : > { %v3068_v22 = vpop.f32.mrf.mxu1  ;;  %v2978_v25 = vadd.f32 %v2977_v0, %v2889_v19  ;;  %v5054_v19 = vld [vmem:[%s6946_s8 + $0x2b8] sm:$0xf] }
 0x227   : > { %v7369_v61 = vadd.f32 %v3066_v4, %v2978_v25  ;;  %v6128_v25 = vld [vmem:[%s6946_s8 + $0x2bc] sm:$0xf] }
 0x228   : > { %v2801_v32 = vpop.f32.mrf.mxu2 }
 0x229   : > { %v2890_v45 = vpop.f32.mrf.mxu3  ;;  %v2802_v52 = vadd.f32 %v2801_v32, %v7132_v12 }
 0x22a   : > { %v2982_v11 = vpop.f32.mrf.mxu0 }
 0x22b   : > { %v2891_v59 = vadd.f32 %v2890_v45, %v2802_v52 }
 0x22d   : > { %v3071_v40 = vpop.f32.mrf.mxu1  ;;  %v2980_v0 = vadd.f32 %v2979_v21, %v2891_v59  ;;  %3119 = vmatmul.bf16.gmra.mxu2 %v4999_v55  ;;  %3297 = vmatmul.bf16.gmra.mxu0 %v5007_v46  ;;  %v6135_v21 = vld [vmem:[%s6946_s8 + $0x2ec] sm:$0xf0]  ;;  %v5067_v55 = vor.u32 %v6129_v41, %v5064_v20  ;;  %v6348_v59 = vld [vmem:[#allocation5 + $0x298] sm:$0xff] }
 0x22e   : > { %3208 = vmatmul.bf16.gmra.mxu3 %v5003_v6  ;;  %v5055_v45 = vor.u32 %v6135_v21, %v5054_v19  ;;  %3446 = vmatpush.bf16.msrb.mxu2 %v6348_v59  ;;  %v6142_v19 = vld [vmem:[%s6946_s8 + $0x32c] sm:$0xf]  ;;  %v5112_v21 = vld [vmem:[%s6946_s8 + $0x360] sm:$0xf0] }
 0x22f   : > { %v7374_v12 = vadd.f32 %v3068_v22, %v2980_v0  ;;  %v5115_v20 = vor.u32 %v6142_v19, %v5112_v21 }
 0x230   : > { %3386 = vmatmul.bf16.gmra.mxu1 %v5011_v53  ;;  %v2804_v4 = vpop.f32.mrf.mxu2 }
 0x231   : > { %v2893_v9 = vpop.f32.mrf.mxu3  ;;  %v2805_v10 = vadd.f32 %v2804_v4, %v7138_v24  ;;  %v5059_v24 = vor.u32 %v6128_v25, %v5056_v51  ;;  %v5118_v25 = vld [vmem:[%s6946_s8 + $0x330] sm:$0xf]  ;;  %v6150_v51 = vld [vmem:[%s6946_s8 + $0x364] sm:$0xf0] }
 0x232   : > { %v2984_v3 = vpop.f32.mrf.mxu0 }
 0x233   : > { %v2894_v8 = vadd.f32 %v2893_v9, %v2805_v10 }
 0x235   : > { %v3073_v42 = vpop.f32.mrf.mxu1  ;;  %v2983_v15 = vadd.f32 %v2982_v11, %v2894_v8  ;;  %v6356_v11 = vld [vmem:[#allocation5 + $0x2d8] sm:$0xff]  ;;  %v5110_v8 = vld [vmem:[%s6946_s8 + $0x328] sm:$0xf] }
 0x236   : > { %3535 = vmatpush.bf16.msrb.mxu3 %v6356_v11 }
 0x237   : > { %v7383_v35 = vadd.f32 %v3071_v40, %v2983_v15  ;;  %v6149_v15 = vld [vmem:[%s6946_s8 + $0x35c] sm:$0xf0] }
 0x238   : > { %v2806_v22 = vpop.f32.mrf.mxu2  ;;  %v5111_v41 = vor.u32 %v6149_v15, %v5110_v8  ;;  %v5168_v8 = vld [vmem:[%s6946_s8 + $0x3d0] sm:$0xf0]  ;;  %v6164_v15 = vld [vmem:[%s6946_s8 + $0x3d4] sm:$0xf0] }
 0x239   : > { %v2895_v36 = vpop.f32.mrf.mxu3  ;;  %v2807_v32 = vadd.f32 %v2806_v22, %v7152_v54  ;;  %v6143_v22 = vld [vmem:[%s6946_s8 + $0x334] sm:$0xf] }
 0x23a   : > { %v2987_v52 = vpop.f32.mrf.mxu0 }
 0x23b   : > { %v2896_v50 = vadd.f32 %v2895_v36, %v2807_v32  ;;  %v5119_v32 = vor.u32 %v6150_v51, %v5118_v25  ;;  %v6157_v25 = vld [vmem:[%s6946_s8 + $0x3a4] sm:$0xf]  ;;  %v5176_v51 = vld [vmem:[%s6946_s8 + $0x3d8] sm:$0xf0] }
 0x23d   : > { %v3076_v6 = vpop.f32.mrf.mxu1  ;;  %v2985_v46 = vadd.f32 %v2984_v3, %v2896_v50  ;;  %3124 = vmatmul.bf16.gmra.mxu2 %v5055_v45  ;;  %3302 = vmatmul.bf16.gmra.mxu0 %v5063_v30  ;;  %v6364_v3 = vld [vmem:[#allocation5 + $0x318] sm:$0xff] }
 0x23e   : > { %3213 = vmatmul.bf16.gmra.mxu3 %v5059_v24  ;;  %3624 = vmatpush.bf16.msrb.mxu0 %v6364_v3  ;;  %v5174_v3 = vld [vmem:[%s6946_s8 + $0x3a0] sm:$0xf] }
 0x23f   : > { %v7388_v54 = vadd.f32 %v3073_v42, %v2985_v46 }
 0x240   : > { %3391 = vmatmul.bf16.gmra.mxu1 %v5067_v55  ;;  %v2809_v53 = vpop.f32.mrf.mxu2  ;;  %v6372_v55 = vld [vmem:[#allocation5 + $0x358] sm:$0xff] }
 0x241   : > { %v2898_v40 = vpop.f32.mrf.mxu3  ;;  %v2810_v0 = vadd.f32 %v2809_v53, %v7158_v5  ;;  %v5120_v5 = vld [vmem:[%s6946_s8 + $0x368] sm:$0xf0]  ;;  %3713 = vmatpush.bf16.msrb.mxu1 %v6372_v55 }
 0x242   : > { %v2989_v4 = vpop.f32.mrf.mxu0  ;;  %v5123_v30 = vor.u32 %v6143_v22, %v5120_v5  ;;  %v5175_v22 = vor.u32 %v6164_v15, %v5174_v3 }
 0x243   : > { %v2899_v7 = vadd.f32 %v2898_v40, %v2810_v0 }
 0x245   : > { %v3078_v9 = vpop.f32.mrf.mxu1  ;;  %v2988_v10 = vadd.f32 %v2987_v52, %v2899_v7  ;;  %v5166_v7 = vld [vmem:[%s6946_s8 + $0x398] sm:$0xf] }
 0x247   : > { %v7397_v42 = vadd.f32 %v3076_v6, %v2988_v10  ;;  %v6156_v10 = vld [vmem:[%s6946_s8 + $0x39c] sm:$0xf] }
 0x248   : > { %v2811_v18 = vpop.f32.mrf.mxu2 }
 0x249   : > { %v2900_v29 = vpop.f32.mrf.mxu3  ;;  %v2812_v36 = vadd.f32 %v2811_v18, %v7172_v39 }
 0x24a   : > { %v2992_v24 = vpop.f32.mrf.mxu0 }
 0x24b   : > { %v2901_v45 = vadd.f32 %v2900_v29, %v2812_v36 }
 0x24d   : > { %v3081_v50 = vpop.f32.mrf.mxu1  ;;  %v2990_v52 = vadd.f32 %v2989_v4, %v2901_v45  ;;  %3129 = vmatmul.bf16.gmra.mxu2 %v5111_v41  ;;  %3307 = vmatmul.bf16.gmra.mxu0 %v5119_v32  ;;  %v6163_v4 = vld [vmem:[%s6946_s8 + $0x3cc] sm:$0xf0]  ;;  %v5179_v41 = vor.u32 %v6157_v25, %v5176_v51 }
 0x24e   : > { %3218 = vmatmul.bf16.gmra.mxu3 %v5115_v20  ;;  %v5167_v29 = vor.u32 %v6163_v4, %v5166_v7  ;;  %v6347_v45 = vld [vmem:[#allocation5 + $0x290] sm:$0xff]  ;;  %v6170_v7 = vld [vmem:[%s6946_s8 + $0x40c] sm:$0xf]  ;;  %v5224_v4 = vld [vmem:[%s6946_s8 + $0x440] sm:$0xf0] }
 0x24f   : > { %v7402_v39 = vadd.f32 %v3078_v9, %v2990_v52  ;;  %3447 = vmatpush.bf16.msrb.mxu2 %v6347_v45  ;;  %v5227_v51 = vor.u32 %v6170_v7, %v5224_v4 }
 0x250   : > { %3396 = vmatmul.bf16.gmra.mxu1 %v5123_v30  ;;  %v2814_v6 = vpop.f32.mrf.mxu2 }
 0x251   : > { %v2903_v46 = vpop.f32.mrf.mxu3  ;;  %v2815_v59 = vadd.f32 %v2814_v6, %v7178_v57  ;;  %v5171_v57 = vor.u32 %v6156_v10, %v5168_v8  ;;  %v5230_v10 = vld [vmem:[%s6946_s8 + $0x410] sm:$0xf]  ;;  %v6178_v8 = vld [vmem:[%s6946_s8 + $0x444] sm:$0xf0] }
 0x252   : > { %v2994_v53 = vpop.f32.mrf.mxu0 }
 0x253   : > { %v2904_v11 = vadd.f32 %v2903_v46, %v2815_v59 }
 0x255   : > { %v3083_v40 = vpop.f32.mrf.mxu1  ;;  %v2993_v0 = vadd.f32 %v2992_v24, %v2904_v11  ;;  %v6355_v24 = vld [vmem:[#allocation5 + $0x2d0] sm:$0xff]  ;;  %v5222_v11 = vld [vmem:[%s6946_s8 + $0x408] sm:$0xf] }
 0x256   : > { %3536 = vmatpush.bf16.msrb.mxu3 %v6355_v24 }
 0x257   : > { %v7411_v19 = vadd.f32 %v3081_v50, %v2993_v0  ;;  %v6177_v0 = vld [vmem:[%s6946_s8 + $0x43c] sm:$0xf0] }
 0x258   : > { %v2816_v9 = vpop.f32.mrf.mxu2  ;;  %v5223_v25 = vor.u32 %v6177_v0, %v5222_v11  ;;  %v5280_v11 = vld [vmem:[%s6946_s8 + $0x4b0] sm:$0xf0]  ;;  %v6192_v0 = vld [vmem:[%s6946_s8 + $0x4b4] sm:$0xf0] }
 0x259   : > { %v2905_v21 = vpop.f32.mrf.mxu3  ;;  %v2817_v18 = vadd.f32 %v2816_v9, %v7192_v26  ;;  %v6171_v9 = vld [vmem:[%s6946_s8 + $0x414] sm:$0xf] }
 0x25a   : > { %v3273_v36 = vpop.f32.mrf.mxu0 }
 0x25b   : > { %v2906_v5 = vadd.f32 %v2905_v21, %v2817_v18  ;;  %v5231_v18 = vor.u32 %v6178_v8, %v5230_v10  ;;  %v6185_v10 = vld [vmem:[%s6946_s8 + $0x484] sm:$0xf]  ;;  %v5288_v8 = vld [vmem:[%s6946_s8 + $0x4b8] sm:$0xf0] }
 0x25d   : > { %v3362_v20 = vpop.f32.mrf.mxu1  ;;  %v2995_v32 = vadd.f32 %v2994_v53, %v2906_v5  ;;  %3134 = vmatmul.bf16.gmra.mxu2 %v5167_v29  ;;  %3312 = vmatmul.bf16.gmra.mxu0 %v5175_v22  ;;  %v6363_v53 = vld [vmem:[#allocation5 + $0x310] sm:$0xff] }
 0x25e   : > { %3223 = vmatmul.bf16.gmra.mxu3 %v5171_v57  ;;  %3625 = vmatpush.bf16.msrb.mxu0 %v6363_v53  ;;  %v5286_v53 = vld [vmem:[%s6946_s8 + $0x480] sm:$0xf] }
 0x25f   : > { %v7416_v26 = vadd.f32 %v3083_v40, %v2995_v32 }
 0x260   : > { %3401 = vmatmul.bf16.gmra.mxu1 %v5179_v41  ;;  %v3095_v30 = vpop.f32.mrf.mxu2  ;;  %v6371_v41 = vld [vmem:[#allocation5 + $0x350] sm:$0xff] }
 0x261   : > { %v3184_v50 = vpop.f32.mrf.mxu3  ;;  %v3096_v52 = vadd.f32 %v3095_v30, %v7201_v2  ;;  %v5232_v2 = vld [vmem:[%s6946_s8 + $0x448] sm:$0xf0]  ;;  %3714 = vmatpush.bf16.msrb.mxu1 %v6371_v41 }
 0x262   : > { %v3275_v6 = vpop.f32.mrf.mxu0  ;;  %v5235_v22 = vor.u32 %v6171_v9, %v5232_v2  ;;  %v5287_v9 = vor.u32 %v6192_v0, %v5286_v53 }
 0x263   : > { %v3185_v55 = vadd.f32 %v3184_v50, %v3096_v52 }
 0x265   : > { %v3364_v46 = vpop.f32.mrf.mxu1  ;;  %v3274_v59 = vadd.f32 %v3273_v36, %v3185_v55  ;;  %v5278_v55 = vld [vmem:[%s6946_s8 + $0x478] sm:$0xf] }
 0x267   : > { %v7425_v40 = vadd.f32 %v3362_v20, %v3274_v59  ;;  %v6184_v59 = vld [vmem:[%s6946_s8 + $0x47c] sm:$0xf] }
 0x268   : > { %v3097_v3 = vpop.f32.mrf.mxu2 }
 0x269   : > { %v3186_v15 = vpop.f32.mrf.mxu3  ;;  %v3098_v21 = vadd.f32 %v3097_v3, %v7206_v48 }
 0x26a   : > { %v3278_v57 = vpop.f32.mrf.mxu0 }
 0x26b   : > { %v3187_v29 = vadd.f32 %v3186_v15, %v3098_v21 }
 0x26d   : > { %v3367_v5 = vpop.f32.mrf.mxu1  ;;  %v3276_v36 = vadd.f32 %v3275_v6, %v3187_v29  ;;  %3139 = vmatmul.bf16.gmra.mxu2 %v5223_v25  ;;  %3317 = vmatmul.bf16.gmra.mxu0 %v5231_v18  ;;  %v6191_v6 = vld [vmem:[%s6946_s8 + $0x4ac] sm:$0xf0]  ;;  %v5291_v25 = vor.u32 %v6185_v10, %v5288_v8  ;;  %v6346_v29 = vld [vmem:[#allocation5 + $0x288] sm:$0xff] }
 0x26e   : > { %3228 = vmatmul.bf16.gmra.mxu3 %v5227_v51  ;;  %v5279_v15 = vor.u32 %v6191_v6, %v5278_v55  ;;  %3448 = vmatpush.bf16.msrb.mxu2 %v6346_v29  ;;  %v6198_v55 = vld [vmem:[%s6946_s8 + $0x4ec] sm:$0xf]  ;;  %v5336_v6 = vld [vmem:[%s6946_s8 + $0x520] sm:$0xf0] }
 0x26f   : > { %v7430_v48 = vadd.f32 %v3364_v46, %v3276_v36  ;;  %v5339_v8 = vor.u32 %v6198_v55, %v5336_v6 }
 0x270   : > { %3406 = vmatmul.bf16.gmra.mxu1 %v5235_v22  ;;  %v3100_v20 = vpop.f32.mrf.mxu2 }
 0x271   : > { %v3189_v32 = vpop.f32.mrf.mxu3  ;;  %v3101_v45 = vadd.f32 %v3100_v20, %v7215_v58  ;;  %v5283_v58 = vor.u32 %v6184_v59, %v5280_v11  ;;  %v5342_v59 = vld [vmem:[%s6946_s8 + $0x4f0] sm:$0xf]  ;;  %v6206_v11 = vld [vmem:[%s6946_s8 + $0x524] sm:$0xf0] }
 0x272   : > { %v3280_v30 = vpop.f32.mrf.mxu0 }
 0x273   : > { %v3190_v24 = vadd.f32 %v3189_v32, %v3101_v45 }
 0x275   : > { %v3369_v50 = vpop.f32.mrf.mxu1  ;;  %v3279_v52 = vadd.f32 %v3278_v57, %v3190_v24  ;;  %v6354_v57 = vld [vmem:[#allocation5 + $0x2c8] sm:$0xff] }
 0x276   : > { %3537 = vmatpush.bf16.msrb.mxu3 %v6354_v57  ;;  %v5334_v24 = vld [vmem:[%s6946_s8 + $0x4e8] sm:$0xf] }
 0x277   : > { %v7439_v7 = vadd.f32 %v3367_v5, %v3279_v52  ;;  %v6205_v52 = vld [vmem:[%s6946_s8 + $0x51c] sm:$0xf0] }
 0x278   : > { %v3102_v46 = vpop.f32.mrf.mxu2  ;;  %v5335_v10 = vor.u32 %v6205_v52, %v5334_v24  ;;  %v5392_v24 = vld [vmem:[%s6946_s8 + $0x590] sm:$0xf0]  ;;  %v6220_v52 = vld [vmem:[%s6946_s8 + $0x594] sm:$0xf0] }
 0x279   : > { %v3191_v4 = vpop.f32.mrf.mxu3  ;;  %v3103_v3 = vadd.f32 %v3102_v46, %v7220_v13  ;;  %v6199_v46 = vld [vmem:[%s6946_s8 + $0x4f4] sm:$0xf] }
 0x27a   : > { %v3283_v21 = vpop.f32.mrf.mxu0 }
 0x27b   : > { %v3192_v2 = vadd.f32 %v3191_v4, %v3103_v3  ;;  %v5343_v3 = vor.u32 %v6206_v11, %v5342_v59  ;;  %v6213_v59 = vld [vmem:[%s6946_s8 + $0x564] sm:$0xf]  ;;  %v5400_v11 = vld [vmem:[%s6946_s8 + $0x598] sm:$0xf0] }
 0x27d   : > { %v3372_v51 = vpop.f32.mrf.mxu1  ;;  %v3281_v18 = vadd.f32 %v3280_v30, %v3192_v2  ;;  %3144 = vmatmul.bf16.gmra.mxu2 %v5279_v15  ;;  %3322 = vmatmul.bf16.gmra.mxu0 %v5287_v9  ;;  %v6362_v30 = vld [vmem:[#allocation5 + $0x308] sm:$0xff] }
 0x27e   : > { %3233 = vmatmul.bf16.gmra.mxu3 %v5283_v58  ;;  %3626 = vmatpush.bf16.msrb.mxu0 %v6362_v30  ;;  %v5398_v30 = vld [vmem:[%s6946_s8 + $0x560] sm:$0xf] }
 0x27f   : > { %v7444_v13 = vadd.f32 %v3369_v50, %v3281_v18 }
 0x280   : > { %3411 = vmatmul.bf16.gmra.mxu1 %v5291_v25  ;;  %v3105_v22 = vpop.f32.mrf.mxu2  ;;  %v6370_v25 = vld [vmem:[#allocation5 + $0x348] sm:$0xff] }
 0x281   : > { %v3194_v5 = vpop.f32.mrf.mxu3  ;;  %v3106_v36 = vadd.f32 %v3105_v22, %v7229_v38  ;;  %v5344_v38 = vld [vmem:[%s6946_s8 + $0x528] sm:$0xf0]  ;;  %3715 = vmatpush.bf16.msrb.mxu1 %v6370_v25 }
 0x282   : > { %v3285_v20 = vpop.f32.mrf.mxu0  ;;  %v5347_v9 = vor.u32 %v6199_v46, %v5344_v38  ;;  %v5399_v46 = vor.u32 %v6220_v52, %v5398_v30 }
 0x283   : > { %v3195_v41 = vadd.f32 %v3194_v5, %v3106_v36 }
 0x285   : > { %v3374_v32 = vpop.f32.mrf.mxu1  ;;  %v3284_v45 = vadd.f32 %v3283_v21, %v3195_v41  ;;  %v5390_v41 = vld [vmem:[%s6946_s8 + $0x558] sm:$0xf] }
 0x287   : > { %v7453_v50 = vadd.f32 %v3372_v51, %v3284_v45  ;;  %v6212_v45 = vld [vmem:[%s6946_s8 + $0x55c] sm:$0xf] }
 0x288   : > { %v3107_v53 = vpop.f32.mrf.mxu2 }
 0x289   : > { %v3196_v0 = vpop.f32.mrf.mxu3  ;;  %v3108_v4 = vadd.f32 %v3107_v53, %v7234_v47 }
 0x28a   : > { %v3288_v58 = vpop.f32.mrf.mxu0 }
 0x28b   : > { %v3197_v15 = vadd.f32 %v3196_v0, %v3108_v4 }
 0x28d   : > { %v3377_v2 = vpop.f32.mrf.mxu1  ;;  %v3286_v21 = vadd.f32 %v3285_v20, %v3197_v15  ;;  %3149 = vmatmul.bf16.gmra.mxu2 %v5335_v10  ;;  %3327 = vmatmul.bf16.gmra.mxu0 %v5343_v3  ;;  %v6219_v20 = vld [vmem:[%s6946_s8 + $0x58c] sm:$0xf0]  ;;  %v5403_v10 = vor.u32 %v6213_v59, %v5400_v11  ;;  %v6345_v15 = vld [vmem:[#allocation5 + $0x280] sm:$0xff] }
 0x28e   : > { %3238 = vmatmul.bf16.gmra.mxu3 %v5339_v8  ;;  %v5391_v0 = vor.u32 %v6219_v20, %v5390_v41  ;;  %3449 = vmatpush.bf16.msrb.mxu2 %v6345_v15  ;;  %v6226_v41 = vld [vmem:[%s6946_s8 + $0x5cc] sm:$0xf]  ;;  %v5448_v20 = vld [vmem:[%s6946_s8 + $0x600] sm:$0xf0] }
 0x28f   : > { %v7458_v47 = vadd.f32 %v3374_v32, %v3286_v21  ;;  %v5451_v11 = vor.u32 %v6226_v41, %v5448_v20 }
 0x290   : > { %3416 = vmatmul.bf16.gmra.mxu1 %v5347_v9  ;;  %v3110_v51 = vpop.f32.mrf.mxu2 }
 0x291   : > { %v3199_v18 = vpop.f32.mrf.mxu3  ;;  %v3111_v29 = vadd.f32 %v3110_v51, %v7243_v44  ;;  %v5395_v44 = vor.u32 %v6212_v45, %v5392_v24  ;;  %v5454_v45 = vld [vmem:[%s6946_s8 + $0x5d0] sm:$0xf]  ;;  %v6234_v24 = vld [vmem:[%s6946_s8 + $0x604] sm:$0xf0] }
 0x292   : > { %v3290_v22 = vpop.f32.mrf.mxu0 }
 0x293   : > { %v3200_v57 = vadd.f32 %v3199_v18, %v3111_v29 }
 0x295   : > { %v3379_v5 = vpop.f32.mrf.mxu1  ;;  %v3289_v36 = vadd.f32 %v3288_v58, %v3200_v57  ;;  %v6353_v58 = vld [vmem:[#allocation5 + $0x2c0] sm:$0xff]  ;;  %v5446_v57 = vld [vmem:[%s6946_s8 + $0x5c8] sm:$0xf] }
 0x296   : > { %3538 = vmatpush.bf16.msrb.mxu3 %v6353_v58 }
 0x297   : > { %v7467_v55 = vadd.f32 %v3377_v2, %v3289_v36  ;;  %v6233_v36 = vld [vmem:[%s6946_s8 + $0x5fc] sm:$0xf0] }
 0x298   : > { %v3112_v32 = vpop.f32.mrf.mxu2  ;;  %v5447_v59 = vor.u32 %v6233_v36, %v5446_v57  ;;  %v5504_v57 = vld [vmem:[%s6946_s8 + $0x670] sm:$0xf0]  ;;  %v6248_v36 = vld [vmem:[%s6946_s8 + $0x674] sm:$0xf0] }
 0x299   : > { %v3201_v6 = vpop.f32.mrf.mxu3  ;;  %v3113_v53 = vadd.f32 %v3112_v32, %v7248_v17  ;;  %v6227_v32 = vld [vmem:[%s6946_s8 + $0x5d4] sm:$0xf] }
 0x29a   : > { %v3293_v4 = vpop.f32.mrf.mxu0 }
 0x29b   : > { %v3202_v38 = vadd.f32 %v3201_v6, %v3113_v53  ;;  %v5455_v53 = vor.u32 %v6234_v24, %v5454_v45  ;;  %v6241_v45 = vld [vmem:[%s6946_s8 + $0x644] sm:$0xf]  ;;  %v5512_v24 = vld [vmem:[%s6946_s8 + $0x678] sm:$0xf0] }
 0x29d   : > { %v3382_v8 = vpop.f32.mrf.mxu1  ;;  %v3291_v3 = vadd.f32 %v3290_v22, %v3202_v38  ;;  %3154 = vmatmul.bf16.gmra.mxu2 %v5391_v0  ;;  %3332 = vmatmul.bf16.gmra.mxu0 %v5399_v46  ;;  %v6361_v22 = vld [vmem:[#allocation5 + $0x300] sm:$0xff] }
 0x29e   : > { %3243 = vmatmul.bf16.gmra.mxu3 %v5395_v44  ;;  %3627 = vmatpush.bf16.msrb.mxu0 %v6361_v22  ;;  %v5510_v22 = vld [vmem:[%s6946_s8 + $0x640] sm:$0xf] }
 0x29f   : > { %v7472_v17 = vadd.f32 %v3379_v5, %v3291_v3 }
 0x2a0   : > { %3421 = vmatmul.bf16.gmra.mxu1 %v5403_v10  ;;  %v3115_v9 = vpop.f32.mrf.mxu2  ;;  %v6369_v10 = vld [vmem:[#allocation5 + $0x340] sm:$0xff] }
 0x2a1   : > { %v3204_v2 = vpop.f32.mrf.mxu3  ;;  %v3116_v21 = vadd.f32 %v3115_v9, %v7257_v23  ;;  %v5456_v23 = vld [vmem:[%s6946_s8 + $0x608] sm:$0xf0]  ;;  %3716 = vmatpush.bf16.msrb.mxu1 %v6369_v10 }
 0x2a2   : > { %v3295_v51 = vpop.f32.mrf.mxu0  ;;  %v5459_v46 = vor.u32 %v6227_v32, %v5456_v23  ;;  %v5511_v32 = vor.u32 %v6248_v36, %v5510_v22  ;;  %v5568_v22 = vld [vmem:[%s6946_s8 + $0x6e8] sm:$0xf0] }
 0x2a3   : > { %v3205_v25 = vadd.f32 %v3204_v2, %v3116_v21 }
 0x2a5   : > { %v3384_v18 = vpop.f32.mrf.mxu1  ;;  %v3294_v29 = vadd.f32 %v3293_v4, %v3205_v25  ;;  %v5502_v25 = vld [vmem:[%s6946_s8 + $0x638] sm:$0xf] }
 0x2a7   : > { %v7481_v5 = vadd.f32 %v3382_v8, %v3294_v29  ;;  %v6240_v29 = vld [vmem:[%s6946_s8 + $0x63c] sm:$0xf] }
 0x2a8   : > { %v3117_v30 = vpop.f32.mrf.mxu2 }
 0x2a9   : > { %v3206_v52 = vpop.f32.mrf.mxu3  ;;  %v3118_v6 = vadd.f32 %v3117_v30, %v7262_v56 }
 0x2aa   : > { %v3298_v44 = vpop.f32.mrf.mxu0 }
 0x2ab   : > { %v3207_v0 = vadd.f32 %v3206_v52, %v3118_v6 }
 0x2ad   : > { %v3387_v38 = vpop.f32.mrf.mxu1  ;;  %v3296_v4 = vadd.f32 %v3295_v51, %v3207_v0  ;;  %3159 = vmatmul.bf16.gmra.mxu2 %v5447_v59  ;;  %3337 = vmatmul.bf16.gmra.mxu0 %v5455_v53  ;;  %v6247_v51 = vld [vmem:[%s6946_s8 + $0x66c] sm:$0xf0]  ;;  %v5515_v59 = vor.u32 %v6241_v45, %v5512_v24 }
 0x2ae   : > { %3248 = vmatmul.bf16.gmra.mxu3 %v5451_v11  ;;  %v5503_v52 = vor.u32 %v6247_v51, %v5502_v25  ;;  %v6262_v25 = vld [vmem:[%s6946_s8 + $0x6e4] sm:$0xf0] }
 0x2af   : > { %v7486_v56 = vadd.f32 %v3384_v18, %v3296_v4 }
 0x2b0   : > { %3426 = vmatmul.bf16.gmra.mxu1 %v5459_v46  ;;  %v3120_v8 = vpop.f32.mrf.mxu2 }
 0x2b1   : > { %v3209_v3 = vpop.f32.mrf.mxu3  ;;  %v3121_v15 = vadd.f32 %v3120_v8, %v7271_v28  ;;  %v5507_v28 = vor.u32 %v6240_v29, %v5504_v57  ;;  %v6255_v57 = vld [vmem:[%s6946_s8 + $0x6b4] sm:$0xf] }
 0x2b2   : > { %v3300_v9 = vpop.f32.mrf.mxu0 }
 0x2b3   : > { %v3210_v58 = vadd.f32 %v3209_v3, %v3121_v15  ;;  %v5558_v3 = vld [vmem:[%s6946_s8 + $0x6a8] sm:$0xf]  ;;  %v6261_v15 = vld [vmem:[%s6946_s8 + $0x6dc] sm:$0xf0] }
 0x2b5   : > { %v3389_v2 = vpop.f32.mrf.mxu1  ;;  %v3299_v21 = vadd.f32 %v3298_v44, %v3210_v58  ;;  %v6254_v58 = vld [vmem:[%s6946_s8 + $0x6ac] sm:$0xf] }
 0x2b7   : > { %v7495_v41 = vadd.f32 %v3387_v38, %v3299_v21  ;;  %v5566_v21 = vld [vmem:[%s6946_s8 + $0x6b0] sm:$0xf] }
 0x2b8   : > { %v3122_v18 = vpop.f32.mrf.mxu2 }
 0x2b9   : > { %v3211_v20 = vpop.f32.mrf.mxu3  ;;  %v3123_v30 = vadd.f32 %v3122_v18, %v7276_v31  ;;  %v5559_v18 = vor.u32 %v6261_v15, %v5558_v3  ;;  %v6054_v3 = vld [vmem:[%s6946_s8 + $0x64] sm:$0xf0] }
 0x2ba   : > { %v3303_v6 = vpop.f32.mrf.mxu0 }
 0x2bb   : > { %v3212_v23 = vadd.f32 %v3211_v20, %v3123_v30  ;;  %v5567_v20 = vor.u32 %v6262_v25, %v5566_v21  ;;  %v5571_v30 = vor.u32 %v6255_v57, %v5568_v22  ;;  %v4744_v21 = vld [vmem:[%s6946_s8 + $0x68] sm:$0xf0] }
 0x2bd   : > { %v3392_v11 = vpop.f32.mrf.mxu1  ;;  %v3301_v53 = vadd.f32 %v3300_v9, %v3212_v23  ;;  %3164 = vmatmul.bf16.gmra.mxu2 %v5503_v52  ;;  %3342 = vmatmul.bf16.gmra.mxu0 %v5511_v32  ;;  %v5560_v9 = vld [vmem:[%s6946_s8 + $0x6e0] sm:$0xf0] }
 0x2be   : > { %3253 = vmatmul.bf16.gmra.mxu3 %v5507_v28 }
 0x2bf   : > { %v7500_v0 = vadd.f32 %v3389_v2, %v3301_v53 }
 0x2c0   : > { %3431 = vmatmul.bf16.gmra.mxu1 %v5515_v59  ;;  %v3125_v31 = vpop.f32.mrf.mxu2 }
 0x2c1   : > { %v3214_v44 = vpop.f32.mrf.mxu3  ;;  %v3126_v46 = vadd.f32 %v3125_v31, %v7285_v37  ;;  %v5563_v37 = vor.u32 %v6254_v58, %v5560_v9  ;;  %v6047_v9 = vld [vmem:[%s6946_s8 + $0x34] sm:$0xf] }
 0x2c2   : > { %v3305_v4 = vpop.f32.mrf.mxu0 }
 0x2c3   : > { %v3215_v38 = vadd.f32 %v3214_v44, %v3126_v46  ;;  %v4734_v44 = vld [vmem:[%s6946_s8 + $0x28] sm:$0xf]  ;;  %v6053_v46 = vld [vmem:[%s6946_s8 + $0x5c] sm:$0xf0] }
 0x2c5   : > { %v3394_v10 = vpop.f32.mrf.mxu1  ;;  %v3304_v8 = vadd.f32 %v3303_v6, %v3215_v38  ;;  %v6046_v38 = vld [vmem:[%s6946_s8 + $0x2c] sm:$0xf] }
 0x2c7   : > { %v7509_v51 = vadd.f32 %v3392_v11, %v3304_v8  ;;  %v4742_v8 = vld [vmem:[%s6946_s8 + $0x30] sm:$0xf] }
 0x2c8   : > { %v3127_v2 = vpop.f32.mrf.mxu2 }
 0x2c9   : > { %v3216_v29 = vpop.f32.mrf.mxu3  ;;  %v3128_v36 = vadd.f32 %v3127_v2, %v7290_v16  ;;  %v4735_v2 = vor.u32 %v6053_v46, %v4734_v44  ;;  %v6068_v44 = vld [vmem:[%s6946_s8 + $0xd4] sm:$0xf0] }
 0x2ca   : > { %v3308_v24 = vpop.f32.mrf.mxu0 }
 0x2cb   : > { %v3217_v45 = vadd.f32 %v3216_v29, %v3128_v36  ;;  %v4743_v29 = vor.u32 %v6054_v3, %v4742_v8  ;;  %v4747_v36 = vor.u32 %v6047_v9, %v4744_v21  ;;  %v4800_v8 = vld [vmem:[%s6946_s8 + $0xd8] sm:$0xf0] }
 0x2cd   : > { %v3397_v52 = vpop.f32.mrf.mxu1  ;;  %v3306_v28 = vadd.f32 %v3305_v4, %v3217_v45  ;;  %3169 = vmatmul.bf16.gmra.mxu2 %v5559_v18  ;;  %3347 = vmatmul.bf16.gmra.mxu0 %v5567_v20  ;;  %v4736_v4 = vld [vmem:[%s6946_s8 + $0x60] sm:$0xf0] }
 0x2ce   : > { %3258 = vmatmul.bf16.gmra.mxu3 %v5563_v37 }
 0x2cf   : > { %v7514_v32 = vadd.f32 %v3394_v10, %v3306_v28 }
 0x2d0   : > { %3436 = vmatmul.bf16.gmra.mxu1 %v5571_v30  ;;  %v3130_v16 = vpop.f32.mrf.mxu2 }
 0x2d1   : > { %v3219_v23 = vpop.f32.mrf.mxu3  ;;  %v3131_v6 = vadd.f32 %v3130_v16, %v7299_v14  ;;  %v4739_v14 = vor.u32 %v6046_v38, %v4736_v4  ;;  %v6061_v4 = vld [vmem:[%s6946_s8 + $0xa4] sm:$0xf] }
 0x2d2   : > { %v3310_v11 = vpop.f32.mrf.mxu0 }
 0x2d3   : > { %v3220_v59 = vadd.f32 %v3219_v23, %v3131_v6  ;;  %v4790_v23 = vld [vmem:[%s6946_s8 + $0x98] sm:$0xf]  ;;  %v6067_v6 = vld [vmem:[%s6946_s8 + $0xcc] sm:$0xf0] }
 0x2d5   : > { %v3399_v53 = vpop.f32.mrf.mxu1  ;;  %v3309_v31 = vadd.f32 %v3308_v24, %v3220_v59  ;;  %v6060_v59 = vld [vmem:[%s6946_s8 + $0x9c] sm:$0xf] }
 0x2d7   : > { %v7523_v15 = vadd.f32 %v3397_v52, %v3309_v31  ;;  %v4798_v31 = vld [vmem:[%s6946_s8 + $0xa0] sm:$0xf] }
 0x2d8   : > { %v3132_v10 = vpop.f32.mrf.mxu2 }
 0x2d9   : > { %v3221_v58 = vpop.f32.mrf.mxu3  ;;  %v3133_v25 = vadd.f32 %v3132_v10, %v7304_v1  ;;  %v4791_v10 = vor.u32 %v6067_v6, %v4790_v23  ;;  %v6082_v23 = vld [vmem:[%s6946_s8 + $0x144] sm:$0xf0] }
 0x2da   : > { %v3313_v22 = vpop.f32.mrf.mxu0 }
 0x2db   : > { %v3222_v57 = vadd.f32 %v3221_v58, %v3133_v25  ;;  %v4799_v58 = vor.u32 %v6068_v44, %v4798_v31  ;;  %v4803_v25 = vor.u32 %v6061_v4, %v4800_v8  ;;  %v4856_v31 = vld [vmem:[%s6946_s8 + $0x148] sm:$0xf0] }
 0x2dd   : > { %v3402_v18 = vpop.f32.mrf.mxu1  ;;  %v3311_v37 = vadd.f32 %v3310_v11, %v3222_v57  ;;  %3450 = vmatmul.bf16.vlgmr.msrb.gmra.mxu2 %v4735_v2  ;;  %3628 = vmatmul.bf16.vlgmr.msrb.gmra.mxu0 %v4743_v29  ;;  %v4792_v11 = vld [vmem:[%s6946_s8 + $0xd0] sm:$0xf0] }
 0x2de   : > { %3539 = vmatmul.bf16.vlgmr.msrb.gmra.mxu3 %v4739_v14 }
 0x2df   : > { %v7528_v20 = vadd.f32 %v3399_v53, %v3311_v37 }
 0x2e0   : > { %3717 = vmatmul.bf16.vlgmr.msrb.gmra.mxu1 %v4747_v36  ;;  %v3135_v1 = vpop.f32.mrf.mxu2 }
 0x2e1   : > { %v3224_v45 = vpop.f32.mrf.mxu3  ;;  %v3136_v24 = vadd.f32 %v3135_v1, %v7313_v34  ;;  %v4795_v34 = vor.u32 %v6060_v59, %v4792_v11  ;;  %v6075_v11 = vld [vmem:[%s6946_s8 + $0x114] sm:$0xf] }
 0x2e2   : > { %v3315_v52 = vpop.f32.mrf.mxu0 }
 0x2e3   : > { %v3225_v30 = vadd.f32 %v3224_v45, %v3136_v24  ;;  %v4846_v45 = vld [vmem:[%s6946_s8 + $0x108] sm:$0xf]  ;;  %v6081_v24 = vld [vmem:[%s6946_s8 + $0x13c] sm:$0xf0] }
 0x2e5   : > { %v3404_v28 = vpop.f32.mrf.mxu1  ;;  %v3314_v16 = vadd.f32 %v3313_v22, %v3225_v30  ;;  %v6074_v30 = vld [vmem:[%s6946_s8 + $0x10c] sm:$0xf] }
 0x2e7   : > { %v7537_v46 = vadd.f32 %v3402_v18, %v3314_v16  ;;  %v4854_v16 = vld [vmem:[%s6946_s8 + $0x110] sm:$0xf] }
 0x2e8   : > { %v3137_v53 = vpop.f32.mrf.mxu2 }
 0x2e9   : > { %v3226_v38 = vpop.f32.mrf.mxu3  ;;  %v3138_v3 = vadd.f32 %v3137_v53, %v7318_v62  ;;  %v4847_v53 = vor.u32 %v6081_v24, %v4846_v45  ;;  %v6096_v45 = vld [vmem:[%s6946_s8 + $0x1b4] sm:$0xf0] }
 0x2ea   : > { %v3318_v21 = vpop.f32.mrf.mxu0 }
 0x2eb   : > { %v3227_v9 = vadd.f32 %v3226_v38, %v3138_v3  ;;  %v4855_v38 = vor.u32 %v6082_v23, %v4854_v16  ;;  %v4859_v3 = vor.u32 %v6075_v11, %v4856_v31  ;;  %v4912_v16 = vld [vmem:[%s6946_s8 + $0x1b8] sm:$0xf0] }
 0x2ed   : > { %v3407_v2 = vpop.f32.mrf.mxu1  ;;  %v3316_v14 = vadd.f32 %v3315_v52, %v3227_v9  ;;  %3455 = vmatmul.bf16.gmra.mxu2 %v4791_v10  ;;  %3633 = vmatmul.bf16.gmra.mxu0 %v4799_v58  ;;  %v4848_v52 = vld [vmem:[%s6946_s8 + $0x140] sm:$0xf0] }
 0x2ee   : > { %3544 = vmatmul.bf16.gmra.mxu3 %v4795_v34 }
 0x2ef   : > { %v7542_v29 = vadd.f32 %v3404_v28, %v3316_v14 }
 0x2f0   : > { %3722 = vmatmul.bf16.gmra.mxu1 %v4803_v25  ;;  %v3140_v62 = vpop.f32.mrf.mxu2 }
 0x2f1   : > { %v3229_v57 = vpop.f32.mrf.mxu3  ;;  %v3141_v22 = vadd.f32 %v3140_v62, %v7327_v60  ;;  %v4851_v60 = vor.u32 %v6074_v30, %v4848_v52  ;;  %v6089_v52 = vld [vmem:[%s6946_s8 + $0x184] sm:$0xf] }
 0x2f2   : > { %v3320_v18 = vpop.f32.mrf.mxu0 }
 0x2f3   : > { %v3230_v36 = vadd.f32 %v3229_v57, %v3141_v22  ;;  %v4902_v57 = vld [vmem:[%s6946_s8 + $0x178] sm:$0xf]  ;;  %v6095_v22 = vld [vmem:[%s6946_s8 + $0x1ac] sm:$0xf0] }
 0x2f5   : > { %v3409_v37 = vpop.f32.mrf.mxu1  ;;  %v3319_v1 = vadd.f32 %v3318_v21, %v3230_v36  ;;  %v6088_v36 = vld [vmem:[%s6946_s8 + $0x17c] sm:$0xf] }
 0x2f7   : > { %v7551_v6 = vadd.f32 %v3407_v2, %v3319_v1  ;;  %v4910_v1 = vld [vmem:[%s6946_s8 + $0x180] sm:$0xf] }
 0x2f8   : > { %v3142_v28 = vpop.f32.mrf.mxu2 }
 0x2f9   : > { %v3231_v59 = vpop.f32.mrf.mxu3  ;;  %v3143_v44 = vadd.f32 %v3142_v28, %v7332_v27  ;;  %v4903_v28 = vor.u32 %v6095_v22, %v4902_v57  ;;  %v6110_v57 = vld [vmem:[%s6946_s8 + $0x224] sm:$0xf0] }
 0x2fa   : > { %v3323_v8 = vpop.f32.mrf.mxu0 }
 0x2fb   : > { %v3232_v4 = vadd.f32 %v3231_v59, %v3143_v44  ;;  %v4911_v59 = vor.u32 %v6096_v45, %v4910_v1  ;;  %v4915_v44 = vor.u32 %v6089_v52, %v4912_v16  ;;  %v4968_v1 = vld [vmem:[%s6946_s8 + $0x228] sm:$0xf0] }
 0x2fd   : > { %v3412_v10 = vpop.f32.mrf.mxu1  ;;  %v3321_v34 = vadd.f32 %v3320_v18, %v3232_v4  ;;  %3460 = vmatmul.bf16.gmra.mxu2 %v4847_v53  ;;  %3638 = vmatmul.bf16.gmra.mxu0 %v4855_v38  ;;  %v4904_v18 = vld [vmem:[%s6946_s8 + $0x1b0] sm:$0xf0] }
 0x2fe   : > { %3549 = vmatmul.bf16.gmra.mxu3 %v4851_v60 }
 0x2ff   : > { %v7556_v58 = vadd.f32 %v3409_v37, %v3321_v34 }
 0x300   : > { %3727 = vmatmul.bf16.gmra.mxu1 %v4859_v3  ;;  %v3145_v27 = vpop.f32.mrf.mxu2 }
 0x301   : > { %v3234_v9 = vpop.f32.mrf.mxu3  ;;  %v3146_v21 = vadd.f32 %v3145_v27, %v7341_v43  ;;  %v4907_v43 = vor.u32 %v6088_v36, %v4904_v18  ;;  %v6103_v18 = vld [vmem:[%s6946_s8 + $0x1f4] sm:$0xf] }
 0x302   : > { %v3325_v2 = vpop.f32.mrf.mxu0 }
 0x303   : > { %v3235_v25 = vadd.f32 %v3234_v9, %v3146_v21  ;;  %v4958_v9 = vld [vmem:[%s6946_s8 + $0x1e8] sm:$0xf]  ;;  %v6109_v21 = vld [vmem:[%s6946_s8 + $0x21c] sm:$0xf0] }
 0x305   : > { %v3414_v14 = vpop.f32.mrf.mxu1  ;;  %v3324_v62 = vadd.f32 %v3323_v8, %v3235_v25  ;;  %v6102_v25 = vld [vmem:[%s6946_s8 + $0x1ec] sm:$0xf] }
 0x307   : > { %v7565_v24 = vadd.f32 %v3412_v10, %v3324_v62  ;;  %v4966_v62 = vld [vmem:[%s6946_s8 + $0x1f0] sm:$0xf] }
 0x308   : > { %v3147_v37 = vpop.f32.mrf.mxu2 }
 0x309   : > { %v3236_v30 = vpop.f32.mrf.mxu3  ;;  %v3148_v23 = vadd.f32 %v3147_v37, %v7346_v63  ;;  %v4959_v37 = vor.u32 %v6109_v21, %v4958_v9  ;;  %v6124_v9 = vld [vmem:[%s6946_s8 + $0x294] sm:$0xf0] }
 0x30a   : > { %v3328_v31 = vpop.f32.mrf.mxu0 }
 0x30b   : > { %v3237_v11 = vadd.f32 %v3236_v30, %v3148_v23  ;;  %v4967_v30 = vor.u32 %v6110_v57, %v4966_v62  ;;  %v4971_v23 = vor.u32 %v6103_v18, %v4968_v1  ;;  %v5024_v62 = vld [vmem:[%s6946_s8 + $0x298] sm:$0xf0] }
 0x30d   : > { %v3417_v53 = vpop.f32.mrf.mxu1  ;;  %v3326_v60 = vadd.f32 %v3325_v2, %v3237_v11  ;;  %3465 = vmatmul.bf16.gmra.mxu2 %v4903_v28  ;;  %3643 = vmatmul.bf16.gmra.mxu0 %v4911_v59  ;;  %v4960_v2 = vld [vmem:[%s6946_s8 + $0x220] sm:$0xf0] }
 0x30e   : > { %3554 = vmatmul.bf16.gmra.mxu3 %v4907_v43 }
 0x30f   : > { %v7570_v38 = vadd.f32 %v3414_v14, %v3326_v60 }
 0x310   : > { %3732 = vmatmul.bf16.gmra.mxu1 %v4915_v44  ;;  %v3150_v63 = vpop.f32.mrf.mxu2 }
 0x311   : > { %v3239_v4 = vpop.f32.mrf.mxu3  ;;  %v3151_v8 = vadd.f32 %v3150_v63, %v7355_v49  ;;  %v4963_v49 = vor.u32 %v6102_v25, %v4960_v2  ;;  %v6117_v2 = vld [vmem:[%s6946_s8 + $0x264] sm:$0xf] }
 0x312   : > { %v3330_v10 = vpop.f32.mrf.mxu0 }
 0x313   : > { %v3240_v3 = vadd.f32 %v3239_v4, %v3151_v8  ;;  %v5014_v4 = vld [vmem:[%s6946_s8 + $0x258] sm:$0xf]  ;;  %v6123_v8 = vld [vmem:[%s6946_s8 + $0x28c] sm:$0xf0] }
 0x315   : > { %v3419_v34 = vpop.f32.mrf.mxu1  ;;  %v3329_v27 = vadd.f32 %v3328_v31, %v3240_v3  ;;  %v6116_v3 = vld [vmem:[%s6946_s8 + $0x25c] sm:$0xf] }
 0x317   : > { %v7579_v22 = vadd.f32 %v3417_v53, %v3329_v27  ;;  %v5022_v27 = vld [vmem:[%s6946_s8 + $0x260] sm:$0xf] }
 0x318   : > { %v3152_v14 = vpop.f32.mrf.mxu2 }
 0x319   : > { %v3241_v36 = vpop.f32.mrf.mxu3  ;;  %v3153_v45 = vadd.f32 %v3152_v14, %v7360_v33  ;;  %v5015_v14 = vor.u32 %v6123_v8, %v5014_v4  ;;  %v6138_v4 = vld [vmem:[%s6946_s8 + $0x304] sm:$0xf0] }
 0x31a   : > { %v3333_v16 = vpop.f32.mrf.mxu0 }
 0x31b   : > { %v3242_v52 = vadd.f32 %v3241_v36, %v3153_v45  ;;  %v5023_v36 = vor.u32 %v6124_v9, %v5022_v27  ;;  %v5027_v45 = vor.u32 %v6117_v2, %v5024_v62  ;;  %v5080_v27 = vld [vmem:[%s6946_s8 + $0x308] sm:$0xf0] }
 0x31d   : > { %v3422_v28 = vpop.f32.mrf.mxu1  ;;  %v3331_v43 = vadd.f32 %v3330_v10, %v3242_v52  ;;  %3470 = vmatmul.bf16.gmra.mxu2 %v4959_v37  ;;  %3648 = vmatmul.bf16.gmra.mxu0 %v4967_v30  ;;  %v5016_v10 = vld [vmem:[%s6946_s8 + $0x290] sm:$0xf0] }
 0x31e   : > { %3559 = vmatmul.bf16.gmra.mxu3 %v4963_v49 }
 0x31f   : > { %v7584_v59 = vadd.f32 %v3419_v34, %v3331_v43 }
 0x320   : > { %3737 = vmatmul.bf16.gmra.mxu1 %v4971_v23  ;;  %v3155_v33 = vpop.f32.mrf.mxu2 }
 0x321   : > { %v3244_v11 = vpop.f32.mrf.mxu3  ;;  %v3156_v31 = vadd.f32 %v3155_v33, %v7369_v61  ;;  %v5019_v61 = vor.u32 %v6116_v3, %v5016_v10  ;;  %v6131_v10 = vld [vmem:[%s6946_s8 + $0x2d4] sm:$0xf] }
 0x322   : > { %v3335_v53 = vpop.f32.mrf.mxu0 }
 0x323   : > { %v3245_v44 = vadd.f32 %v3244_v11, %v3156_v31  ;;  %v5070_v11 = vld [vmem:[%s6946_s8 + $0x2c8] sm:$0xf]  ;;  %v6137_v31 = vld [vmem:[%s6946_s8 + $0x2fc] sm:$0xf0] }
 0x325   : > { %v3424_v60 = vpop.f32.mrf.mxu1  ;;  %v3334_v63 = vadd.f32 %v3333_v16, %v3245_v44  ;;  %v6130_v44 = vld [vmem:[%s6946_s8 + $0x2cc] sm:$0xf] }
 0x327   : > { %v7593_v21 = vadd.f32 %v3422_v28, %v3334_v63  ;;  %v5078_v63 = vld [vmem:[%s6946_s8 + $0x2d0] sm:$0xf] }
 0x328   : > { %v3157_v34 = vpop.f32.mrf.mxu2 }
 0x329   : > { %v3246_v25 = vpop.f32.mrf.mxu3  ;;  %v3158_v57 = vadd.f32 %v3157_v34, %v7374_v12  ;;  %v5071_v34 = vor.u32 %v6137_v31, %v5070_v11  ;;  %v6152_v11 = vld [vmem:[%s6946_s8 + $0x374] sm:$0xf0] }
 0x32a   : > { %v3338_v1 = vpop.f32.mrf.mxu0 }
 0x32b   : > { %v3247_v18 = vadd.f32 %v3246_v25, %v3158_v57  ;;  %v5079_v25 = vor.u32 %v6138_v4, %v5078_v63  ;;  %v5083_v57 = vor.u32 %v6131_v10, %v5080_v27  ;;  %v5136_v63 = vld [vmem:[%s6946_s8 + $0x378] sm:$0xf0] }
 0x32d   : > { %v3427_v37 = vpop.f32.mrf.mxu1  ;;  %v3336_v49 = vadd.f32 %v3335_v53, %v3247_v18  ;;  %3475 = vmatmul.bf16.gmra.mxu2 %v5015_v14  ;;  %3653 = vmatmul.bf16.gmra.mxu0 %v5023_v36  ;;  %v5072_v53 = vld [vmem:[%s6946_s8 + $0x300] sm:$0xf0] }
 0x32e   : > { %3564 = vmatmul.bf16.gmra.mxu3 %v5019_v61 }
 0x32f   : > { %v7598_v30 = vadd.f32 %v3424_v60, %v3336_v49 }
 0x330   : > { %3742 = vmatmul.bf16.gmra.mxu1 %v5027_v45  ;;  %v3160_v12 = vpop.f32.mrf.mxu2 }
 0x331   : > { %v3249_v52 = vpop.f32.mrf.mxu3  ;;  %v3161_v16 = vadd.f32 %v3160_v12, %v7383_v35  ;;  %v5075_v35 = vor.u32 %v6130_v44, %v5072_v53  ;;  %v6145_v53 = vld [vmem:[%s6946_s8 + $0x344] sm:$0xf] }
 0x332   : > { %v3340_v28 = vpop.f32.mrf.mxu0 }
 0x333   : > { %v3250_v23 = vadd.f32 %v3249_v52, %v3161_v16  ;;  %v5126_v52 = vld [vmem:[%s6946_s8 + $0x338] sm:$0xf]  ;;  %v6151_v16 = vld [vmem:[%s6946_s8 + $0x36c] sm:$0xf0] }
 0x335   : > { %v3429_v43 = vpop.f32.mrf.mxu1  ;;  %v3339_v33 = vadd.f32 %v3338_v1, %v3250_v23  ;;  %v6144_v23 = vld [vmem:[%s6946_s8 + $0x33c] sm:$0xf] }
 0x337   : > { %v7607_v8 = vadd.f32 %v3427_v37, %v3339_v33  ;;  %v5134_v33 = vld [vmem:[%s6946_s8 + $0x340] sm:$0xf] }
 0x338   : > { %v3162_v60 = vpop.f32.mrf.mxu2 }
 0x339   : > { %v3251_v3 = vpop.f32.mrf.mxu3  ;;  %v3163_v9 = vadd.f32 %v3162_v60, %v7388_v54  ;;  %v5127_v60 = vor.u32 %v6151_v16, %v5126_v52  ;;  %v6166_v52 = vld [vmem:[%s6946_s8 + $0x3e4] sm:$0xf0] }
 0x33a   : > { %v3343_v62 = vpop.f32.mrf.mxu0 }
 0x33b   : > { %v3252_v2 = vadd.f32 %v3251_v3, %v3163_v9  ;;  %v5135_v3 = vor.u32 %v6152_v11, %v5134_v33  ;;  %v5139_v9 = vor.u32 %v6145_v53, %v5136_v63  ;;  %v5192_v33 = vld [vmem:[%s6946_s8 + $0x3e8] sm:$0xf0] }
 0x33d   : > { %v3432_v14 = vpop.f32.mrf.mxu1  ;;  %v3341_v61 = vadd.f32 %v3340_v28, %v3252_v2  ;;  %3480 = vmatmul.bf16.gmra.mxu2 %v5071_v34  ;;  %3658 = vmatmul.bf16.gmra.mxu0 %v5079_v25  ;;  %v5128_v28 = vld [vmem:[%s6946_s8 + $0x370] sm:$0xf0] }
 0x33e   : > { %3569 = vmatmul.bf16.gmra.mxu3 %v5075_v35 }
 0x33f   : > { %v7612_v36 = vadd.f32 %v3429_v43, %v3341_v61 }
 0x340   : > { %3747 = vmatmul.bf16.gmra.mxu1 %v5083_v57  ;;  %v3165_v54 = vpop.f32.mrf.mxu2 }
 0x341   : > { %v3254_v18 = vpop.f32.mrf.mxu3  ;;  %v3166_v1 = vadd.f32 %v3165_v54, %v7397_v42  ;;  %v5131_v42 = vor.u32 %v6144_v23, %v5128_v28  ;;  %v6159_v28 = vld [vmem:[%s6946_s8 + $0x3b4] sm:$0xf] }
 0x342   : > { %v3345_v37 = vpop.f32.mrf.mxu0 }
 0x343   : > { %v3255_v45 = vadd.f32 %v3254_v18, %v3166_v1  ;;  %v5182_v18 = vld [vmem:[%s6946_s8 + $0x3a8] sm:$0xf]  ;;  %v6165_v1 = vld [vmem:[%s6946_s8 + $0x3dc] sm:$0xf0] }
 0x345   : > { %v3434_v49 = vpop.f32.mrf.mxu1  ;;  %v3344_v12 = vadd.f32 %v3343_v62, %v3255_v45  ;;  %v6158_v45 = vld [vmem:[%s6946_s8 + $0x3ac] sm:$0xf] }
 0x347   : > { %v7621_v31 = vadd.f32 %v3432_v14, %v3344_v12  ;;  %v5190_v12 = vld [vmem:[%s6946_s8 + $0x3b0] sm:$0xf] }
 0x348   : > { %v3167_v43 = vpop.f32.mrf.mxu2 }
 0x349   : > { %v3256_v44 = vpop.f32.mrf.mxu3  ;;  %v3168_v4 = vadd.f32 %v3167_v43, %v7402_v39  ;;  %v5183_v43 = vor.u32 %v6165_v1, %v5182_v18  ;;  %v5246_v18 = vld [vmem:[%s6946_s8 + $0x420] sm:$0xf]  ;;  %v6180_v1 = vld [vmem:[%s6946_s8 + $0x454] sm:$0xf0] }
 0x34a   : > { %v3348_v27 = vpop.f32.mrf.mxu0 }
 0x34b   : > { %v3257_v10 = vadd.f32 %v3256_v44, %v3168_v4  ;;  %v5191_v44 = vor.u32 %v6166_v52, %v5190_v12  ;;  %v5195_v4 = vor.u32 %v6159_v28, %v5192_v33  ;;  %v5248_v12 = vld [vmem:[%s6946_s8 + $0x458] sm:$0xf0] }
 0x34d   : > { %v3437_v34 = vpop.f32.mrf.mxu1  ;;  %v3346_v35 = vadd.f32 %v3345_v37, %v3257_v10  ;;  %3485 = vmatmul.bf16.gmra.mxu2 %v5127_v60  ;;  %3663 = vmatmul.bf16.gmra.mxu0 %v5135_v3  ;;  %v5184_v37 = vld [vmem:[%s6946_s8 + $0x3e0] sm:$0xf0] }
 0x34e   : > { %3574 = vmatmul.bf16.gmra.mxu3 %v5131_v42 }
 0x34f   : > { %v7626_v25 = vadd.f32 %v3434_v49, %v3346_v35 }
 0x350   : > { %3752 = vmatmul.bf16.gmra.mxu1 %v5139_v9  ;;  %v3170_v39 = vpop.f32.mrf.mxu2 }
 0x351   : > { %v3259_v2 = vpop.f32.mrf.mxu3  ;;  %v3171_v62 = vadd.f32 %v3170_v39, %v7411_v19  ;;  %v5187_v19 = vor.u32 %v6158_v45, %v5184_v37  ;;  %v6173_v37 = vld [vmem:[%s6946_s8 + $0x424] sm:$0xf] }
 0x352   : > { %v3350_v14 = vpop.f32.mrf.mxu0 }
 0x353   : > { %v3260_v57 = vadd.f32 %v3259_v2, %v3171_v62  ;;  %v5238_v2 = vld [vmem:[%s6946_s8 + $0x418] sm:$0xf]  ;;  %v6179_v62 = vld [vmem:[%s6946_s8 + $0x44c] sm:$0xf0] }
 0x355   : > { %v3439_v61 = vpop.f32.mrf.mxu1  ;;  %v3349_v54 = vadd.f32 %v3348_v27, %v3260_v57  ;;  %v6172_v57 = vld [vmem:[%s6946_s8 + $0x41c] sm:$0xf] }
 0x357   : > { %v7635_v16 = vadd.f32 %v3437_v34, %v3349_v54 }
 0x358   : > { %v3172_v49 = vpop.f32.mrf.mxu2 }
 0x359   : > { %v3261_v23 = vpop.f32.mrf.mxu3  ;;  %v3173_v11 = vadd.f32 %v3172_v49, %v7416_v26 }
 0x35a   : > { %v3629_v63 = vpop.f32.mrf.mxu0 }
 0x35b   : > { %v3262_v53 = vadd.f32 %v3261_v23, %v3173_v11  ;;  %v5247_v23 = vor.u32 %v6180_v1, %v5246_v18  ;;  %v5251_v11 = vor.u32 %v6173_v37, %v5248_v12  ;;  %v5304_v18 = vld [vmem:[%s6946_s8 + $0x4c8] sm:$0xf0] }
 0x35d   : > { %v3718_v60 = vpop.f32.mrf.mxu1  ;;  %v3351_v42 = vadd.f32 %v3350_v14, %v3262_v53  ;;  %3490 = vmatmul.bf16.gmra.mxu2 %v5183_v43  ;;  %3668 = vmatmul.bf16.gmra.mxu0 %v5191_v44  ;;  %v5240_v14 = vld [vmem:[%s6946_s8 + $0x450] sm:$0xf0] }
 0x35e   : > { %3579 = vmatmul.bf16.gmra.mxu3 %v5187_v19  ;;  %v5243_v49 = vor.u32 %v6172_v57, %v5240_v14  ;;  %v6187_v14 = vld [vmem:[%s6946_s8 + $0x494] sm:$0xf] }
 0x35f   : > { %v7640_v3 = vadd.f32 %v3439_v61, %v3351_v42 }
 0x360   : > { %3757 = vmatmul.bf16.gmra.mxu1 %v5195_v4  ;;  %v3451_v26 = vpop.f32.mrf.mxu2 }
 0x361   : > { %v3540_v10 = vpop.f32.mrf.mxu3  ;;  %v3452_v27 = vadd.f32 %v3451_v26, %v7425_v40  ;;  %v5239_v40 = vor.u32 %v6179_v62, %v5238_v2  ;;  %v6194_v2 = vld [vmem:[%s6946_s8 + $0x4c4] sm:$0xf0] }
 0x362   : > { %v3631_v34 = vpop.f32.mrf.mxu0 }
 0x363   : > { %v3541_v9 = vadd.f32 %v3540_v10, %v3452_v27  ;;  %v5294_v10 = vld [vmem:[%s6946_s8 + $0x488] sm:$0xf]  ;;  %v6193_v27 = vld [vmem:[%s6946_s8 + $0x4bc] sm:$0xf0] }
 0x364   : > { %v5295_v1 = vor.u32 %v6193_v27, %v5294_v10  ;;  %v6208_v10 = vld [vmem:[%s6946_s8 + $0x534] sm:$0xf0] }
 0x365   : > { %v3720_v35 = vpop.f32.mrf.mxu1  ;;  %v3630_v39 = vadd.f32 %v3629_v63, %v3541_v9  ;;  %v6186_v9 = vld [vmem:[%s6946_s8 + $0x48c] sm:$0xf] }
 0x367   : > { %v7647_v54 = vadd.f32 %v3718_v60, %v3630_v39 }
 0x368   : > { %v3453_v61 = vpop.f32.mrf.mxu2 }
 0x369   : > { %v3542_v45 = vpop.f32.mrf.mxu3  ;;  %v3454_v52 = vadd.f32 %v3453_v61, %v7430_v48  ;;  %3798 = vadd.xlane.f32.xlu0 %v7647_v54 }
 0x36a   : > { %v3634_v33 = vpop.f32.mrf.mxu0 }
 0x36b   : > { %v3543_v28 = vadd.f32 %v3542_v45, %v3454_v52  ;;  %v5307_v52 = vor.u32 %v6187_v14, %v5304_v18 }
 0x36d   : > { %v3723_v43 = vpop.f32.mrf.mxu1  ;;  %3495 = vmatmul.bf16.gmra.mxu2 %v5239_v40  ;;  %v3632_v19 = vadd.f32 %v3631_v34, %v3543_v28  ;;  %3673 = vmatmul.bf16.gmra.mxu0 %v5247_v23  ;;  %v5296_v34 = vld [vmem:[%s6946_s8 + $0x4c0] sm:$0xf0] }
 0x36e   : > { %3584 = vmatmul.bf16.gmra.mxu3 %v5243_v49  ;;  %v5299_v61 = vor.u32 %v6186_v9, %v5296_v34  ;;  %v6201_v34 = vld [vmem:[%s6946_s8 + $0x504] sm:$0xf] }
 0x36f   : > { %v7655_v48 = vadd.f32 %v3720_v35, %v3632_v19  ;;  %v5302_v35 = vld [vmem:[%s6946_s8 + $0x490] sm:$0xf] }
 0x370   : > { %3762 = vmatmul.bf16.gmra.mxu1 %v5251_v11  ;;  %v3456_v44 = vpop.f32.mrf.mxu2  ;;  %v5303_v45 = vor.u32 %v6194_v2, %v5302_v35  ;;  %v5360_v35 = vld [vmem:[%s6946_s8 + $0x538] sm:$0xf0] }
 0x371   : > { %v3545_v53 = vpop.f32.mrf.mxu3  ;;  %v3457_v63 = vadd.f32 %v3456_v44, %v7439_v7  ;;  %3800 = vadd.xlane.f32.xlu0 %v7655_v48 }
 0x372   : > { %v3636_v60 = vpop.f32.mrf.mxu0 }
 0x373   : > { %v3546_v4 = vadd.f32 %v3545_v53, %v3457_v63  ;;  %v5350_v53 = vld [vmem:[%s6946_s8 + $0x4f8] sm:$0xf]  ;;  %v6207_v63 = vld [vmem:[%s6946_s8 + $0x52c] sm:$0xf0] }
 0x374   : > { %v5351_v2 = vor.u32 %v6207_v63, %v5350_v53  ;;  %v6222_v53 = vld [vmem:[%s6946_s8 + $0x5a4] sm:$0xf0] }
 0x375   : > { %v3725_v42 = vpop.f32.mrf.mxu1  ;;  %v3635_v26 = vadd.f32 %v3634_v33, %v3546_v4  ;;  %v6200_v4 = vld [vmem:[%s6946_s8 + $0x4fc] sm:$0xf] }
 0x377   : > { %v7663_v39 = vadd.f32 %v3723_v43, %v3635_v26 }
 0x378   : > { %v3458_v62 = vpop.f32.mrf.mxu2 }
 0x379   : > { %v3547_v57 = vpop.f32.mrf.mxu3  ;;  %v3459_v7 = vadd.f32 %v3458_v62, %v7444_v13  ;;  %3802 = vadd.xlane.f32.xlu1 %v7663_v39 }
 0x37a   : > { %v3639_v12 = vpop.f32.mrf.mxu0 }
 0x37b   : > { %v3548_v37 = vadd.f32 %v3547_v57, %v3459_v7  ;;  %v5363_v7 = vor.u32 %v6201_v34, %v5360_v35 }
 0x37d   : > { %v3728_v40 = vpop.f32.mrf.mxu1  ;;  %3500 = vmatmul.bf16.gmra.mxu2 %v5295_v1  ;;  %v3637_v49 = vadd.f32 %v3636_v60, %v3548_v37  ;;  %3678 = vmatmul.bf16.gmra.mxu0 %v5303_v45  ;;  %v5352_v60 = vld [vmem:[%s6946_s8 + $0x530] sm:$0xf0] }
 0x37e   : > { %3589 = vmatmul.bf16.gmra.mxu3 %v5299_v61  ;;  %v5355_v62 = vor.u32 %v6200_v4, %v5352_v60  ;;  %v6215_v60 = vld [vmem:[%s6946_s8 + $0x574] sm:$0xf] }
 0x37f   : > { %v7671_v13 = vadd.f32 %v3725_v42, %v3637_v49  ;;  %v5358_v42 = vld [vmem:[%s6946_s8 + $0x500] sm:$0xf] }
 0x380   : > { %3767 = vmatmul.bf16.gmra.mxu1 %v5307_v52  ;;  %v3461_v23 = vpop.f32.mrf.mxu2  ;;  %v5359_v57 = vor.u32 %v6208_v10, %v5358_v42  ;;  %v5416_v42 = vld [vmem:[%s6946_s8 + $0x5a8] sm:$0xf0] }
 0x381   : > { %v3550_v28 = vpop.f32.mrf.mxu3  ;;  %v3462_v33 = vadd.f32 %v3461_v23, %v7453_v50  ;;  %3804 = vadd.xlane.f32.xlu1 %v7671_v13 }
 0x382   : > { %v3641_v43 = vpop.f32.mrf.mxu0 }
 0x383   : > { %v3551_v11 = vadd.f32 %v3550_v28, %v3462_v33  ;;  %v5406_v28 = vld [vmem:[%s6946_s8 + $0x568] sm:$0xf]  ;;  %v6221_v33 = vld [vmem:[%s6946_s8 + $0x59c] sm:$0xf0] }
 0x384   : > { %v5407_v10 = vor.u32 %v6221_v33, %v5406_v28  ;;  %v6236_v28 = vld [vmem:[%s6946_s8 + $0x614] sm:$0xf0] }
 0x385   : > { %v3730_v19 = vpop.f32.mrf.mxu1  ;;  %v3640_v44 = vadd.f32 %v3639_v12, %v3551_v11  ;;  %v6214_v11 = vld [vmem:[%s6946_s8 + $0x56c] sm:$0xf] }
 0x387   : > { %v7679_v26 = vadd.f32 %v3728_v40, %v3640_v44 }
 0x388   : > { %v3463_v27 = vpop.f32.mrf.mxu2 }
 0x389   : > { %v3552_v9 = vpop.f32.mrf.mxu3  ;;  %v3464_v50 = vadd.f32 %v3463_v27, %v7458_v47  ;;  %3806 = vadd.xlane.f32.xlu2 %v7679_v26 }
 0x38a   : > { %v3644_v18 = vpop.f32.mrf.mxu0 }
 0x38b   : > { %v3553_v14 = vadd.f32 %v3552_v9, %v3464_v50  ;;  %v5419_v50 = vor.u32 %v6215_v60, %v5416_v42 }
 0x38d   : > { %v3733_v1 = vpop.f32.mrf.mxu1  ;;  %3505 = vmatmul.bf16.gmra.mxu2 %v5351_v2  ;;  %v3642_v61 = vadd.f32 %v3641_v43, %v3553_v14  ;;  %3683 = vmatmul.bf16.gmra.mxu0 %v5359_v57  ;;  %v5408_v43 = vld [vmem:[%s6946_s8 + $0x5a0] sm:$0xf0] }
 0x38e   : > { %3594 = vmatmul.bf16.gmra.mxu3 %v5355_v62  ;;  %v5411_v27 = vor.u32 %v6214_v11, %v5408_v43  ;;  %v6229_v43 = vld [vmem:[%s6946_s8 + $0x5e4] sm:$0xf] }
 0x38f   : > { %v7687_v47 = vadd.f32 %v3730_v19, %v3642_v61  ;;  %v5414_v19 = vld [vmem:[%s6946_s8 + $0x570] sm:$0xf] }
 0x390   : > { %3772 = vmatmul.bf16.gmra.mxu1 %v5363_v7  ;;  %v3466_v45 = vpop.f32.mrf.mxu2  ;;  %v5415_v9 = vor.u32 %v6222_v53, %v5414_v19  ;;  %v5472_v19 = vld [vmem:[%s6946_s8 + $0x618] sm:$0xf0] }
 0x391   : > { %v3555_v37 = vpop.f32.mrf.mxu3  ;;  %v3467_v12 = vadd.f32 %v3466_v45, %v7467_v55  ;;  %3808 = vadd.xlane.f32.xlu2 %v7687_v47 }
 0x392   : > { %v3646_v40 = vpop.f32.mrf.mxu0 }
 0x393   : > { %v3556_v52 = vadd.f32 %v3555_v37, %v3467_v12  ;;  %v5462_v37 = vld [vmem:[%s6946_s8 + $0x5d8] sm:$0xf]  ;;  %v6235_v12 = vld [vmem:[%s6946_s8 + $0x60c] sm:$0xf0] }
 0x394   : > { %v5463_v53 = vor.u32 %v6235_v12, %v5462_v37  ;;  %v6250_v37 = vld [vmem:[%s6946_s8 + $0x684] sm:$0xf0] }
 0x395   : > { %v3735_v49 = vpop.f32.mrf.mxu1  ;;  %v3645_v23 = vadd.f32 %v3644_v18, %v3556_v52  ;;  %v6228_v52 = vld [vmem:[%s6946_s8 + $0x5dc] sm:$0xf] }
 0x397   : > { %v7695_v44 = vadd.f32 %v3733_v1, %v3645_v23 }
 0x398   : > { %v3468_v63 = vpop.f32.mrf.mxu2 }
 0x399   : > { %v3557_v4 = vpop.f32.mrf.mxu3  ;;  %v3469_v55 = vadd.f32 %v3468_v63, %v7472_v17  ;;  %3810 = vadd.xlane.f32.xlu0 %v7695_v44 }
 0x39a   : > { %v3649_v35 = vpop.f32.mrf.mxu0 }
 0x39b   : > { %v3558_v34 = vadd.f32 %v3557_v4, %v3469_v55  ;;  %v5475_v55 = vor.u32 %v6229_v43, %v5472_v19 }
 0x39d   : > { %v3738_v2 = vpop.f32.mrf.mxu1  ;;  %3510 = vmatmul.bf16.gmra.mxu2 %v5407_v10  ;;  %v3647_v62 = vadd.f32 %v3646_v40, %v3558_v34  ;;  %3688 = vmatmul.bf16.gmra.mxu0 %v5415_v9  ;;  %v5464_v40 = vld [vmem:[%s6946_s8 + $0x610] sm:$0xf0] }
 0x39e   : > { %3599 = vmatmul.bf16.gmra.mxu3 %v5411_v27  ;;  %v5467_v63 = vor.u32 %v6228_v52, %v5464_v40  ;;  %v6243_v40 = vld [vmem:[%s6946_s8 + $0x654] sm:$0xf] }
 0x39f   : > { %v7703_v17 = vadd.f32 %v3735_v49, %v3647_v62  ;;  %v5470_v49 = vld [vmem:[%s6946_s8 + $0x5e0] sm:$0xf] }
 0x3a0   : > { %3777 = vmatmul.bf16.gmra.mxu1 %v5419_v50  ;;  %v3471_v57 = vpop.f32.mrf.mxu2  ;;  %v5471_v4 = vor.u32 %v6236_v28, %v5470_v49  ;;  %v5528_v49 = vld [vmem:[%s6946_s8 + $0x688] sm:$0xf0] }
 0x3a1   : > { %v3560_v14 = vpop.f32.mrf.mxu3  ;;  %v3472_v18 = vadd.f32 %v3471_v57, %v7481_v5  ;;  %3812 = vadd.xlane.f32.xlu1 %v7703_v17 }
 0x3a2   : > { %v3651_v1 = vpop.f32.mrf.mxu0 }
 0x3a3   : > { %v3561_v7 = vadd.f32 %v3560_v14, %v3472_v18  ;;  %v5518_v14 = vld [vmem:[%s6946_s8 + $0x648] sm:$0xf]  ;;  %v6249_v18 = vld [vmem:[%s6946_s8 + $0x67c] sm:$0xf0] }
 0x3a4   : > { %v5519_v28 = vor.u32 %v6249_v18, %v5518_v14  ;;  %v5582_v18 = vld [vmem:[%s6946_s8 + $0x6c0] sm:$0xf] }
 0x3a5   : > { %v3740_v61 = vpop.f32.mrf.mxu1  ;;  %v3650_v45 = vadd.f32 %v3649_v35, %v3561_v7  ;;  %v6242_v7 = vld [vmem:[%s6946_s8 + $0x64c] sm:$0xf] }
 0x3a7   : > { %v7711_v23 = vadd.f32 %v3738_v2, %v3650_v45 }
 0x3a8   : > { %v3473_v33 = vpop.f32.mrf.mxu2 }
 0x3a9   : > { %v3562_v11 = vpop.f32.mrf.mxu3  ;;  %v3474_v5 = vadd.f32 %v3473_v33, %v7486_v56  ;;  %3814 = vadd.xlane.f32.xlu2 %v7711_v23 }
 0x3aa   : > { %v3654_v42 = vpop.f32.mrf.mxu0 }
 0x3ab   : > { %v3563_v60 = vadd.f32 %v3562_v11, %v3474_v5  ;;  %v5531_v5 = vor.u32 %v6243_v40, %v5528_v49 }
 0x3ad   : > { %v3743_v10 = vpop.f32.mrf.mxu1  ;;  %v3652_v27 = vadd.f32 %v3651_v1, %v3563_v60  ;;  %3515 = vmatmul.bf16.gmra.mxu2 %v5463_v53  ;;  %3693 = vmatmul.bf16.gmra.mxu0 %v5471_v4  ;;  %v5520_v1 = vld [vmem:[%s6946_s8 + $0x680] sm:$0xf0] }
 0x3ae   : > { %3604 = vmatmul.bf16.gmra.mxu3 %v5467_v63  ;;  %v5523_v33 = vor.u32 %v6242_v7, %v5520_v1  ;;  %v6264_v7 = vld [vmem:[%s6946_s8 + $0x6f4] sm:$0xf0] }
 0x3af   : > { %v7719_v56 = vadd.f32 %v3740_v61, %v3652_v27  ;;  %v5526_v61 = vld [vmem:[%s6946_s8 + $0x650] sm:$0xf]  ;;  %v5583_v49 = vor.u32 %v6264_v7, %v5582_v18 }
 0x3b0   : > { %3782 = vmatmul.bf16.gmra.mxu1 %v5475_v55  ;;  %v3476_v9 = vpop.f32.mrf.mxu2  ;;  %v5527_v11 = vor.u32 %v6250_v37, %v5526_v61  ;;  %v6796_v55 = vmov 128.0   ;;  %v6257_v61 = vld [vmem:[%s6946_s8 + $0x6c4] sm:$0xf]  ;;  %v5584_v37 = vld [vmem:[%s6946_s8 + $0x6f8] sm:$0xf0] }
 0x3b1   : > { %v3565_v34 = vpop.f32.mrf.mxu3  ;;  %v3477_v35 = vadd.f32 %v3476_v9, %v7495_v41  ;;  %3816 = vadd.xlane.f32.xlu0 %v7719_v56  ;;  %6494 = vrcp.f32 %v6796_v55 }
 0x3b2   : > { %v3656_v2 = vpop.f32.mrf.mxu0 }
 0x3b3   : > { %v3566_v50 = vadd.f32 %v3565_v34, %v3477_v35  ;;  %v5574_v35 = vld [vmem:[%s6946_s8 + $0x6b8] sm:$0xf] }
 0x3b5   : > { %v3745_v62 = vpop.f32.mrf.mxu1  ;;  %v3655_v57 = vadd.f32 %v3654_v42, %v3566_v50  ;;  %v6263_v50 = vld [vmem:[%s6946_s8 + $0x6ec] sm:$0xf0] }
 0x3b7   : > { %v7727_v45 = vadd.f32 %v3743_v10, %v3655_v57  ;;  %v6495_v57 = vpop.eup %6494 }
 0x3b8   : > { %v3478_v12 = vpop.f32.mrf.mxu2  ;;  %vm3867_vm0 = vweird.f32 %v6495_v57 }
 0x3b9   : > { %v3567_v52 = vpop.f32.mrf.mxu3  ;;  %v3479_v41 = vadd.f32 %v3478_v12, %v7500_v0  ;;  %3818 = vadd.xlane.f32.xlu1 %v7727_v45 }
 0x3ba   : > { %v3659_v19 = vpop.f32.mrf.mxu0 }
 0x3bb   : > { %v3568_v43 = vadd.f32 %v3567_v52, %v3479_v41  ;;  %v5575_v52 = vor.u32 %v6263_v50, %v5574_v35  ;;  %v3863_v41 = vmul.f32 128.0, %v6495_v57 }
 0x3bd   : > { %v3748_v53 = vpop.f32.mrf.mxu1  ;;  %v3657_v63 = vadd.f32 %v3656_v2, %v3568_v43  ;;  %3520 = vmatmul.bf16.gmra.mxu2 %v5519_v28  ;;  %3698 = vmatmul.bf16.gmra.mxu0 %v5527_v11  ;;  %v6256_v2 = vld [vmem:[%s6946_s8 + $0x6bc] sm:$0xf]  ;;  %v5587_v11 = vor.u32 %v6257_v61, %v5584_v37 }
 0x3be   : > { %3609 = vmatmul.bf16.gmra.mxu3 %v5523_v33 }
 0x3bf   : > { %v7735_v4 = vadd.f32 %v3745_v62, %v3657_v63  ;;  %v5576_v62 = vld [vmem:[%s6946_s8 + $0x6f0] sm:$0xf0] }
 0x3c0   : > { %3787 = vmatmul.bf16.gmra.mxu1 %v5531_v5  ;;  %v3481_v0 = vpop.f32.mrf.mxu2  ;;  %v5579_v40 = vor.u32 %v6256_v2, %v5576_v62  ;;  %v3864_v5 = vsub.f32 1.0, %v3863_v41 }
 0x3c1   : > { %v3570_v60 = vpop.f32.mrf.mxu3  ;;  %v3482_v42 = vadd.f32 %v3481_v0, %v7509_v51  ;;  %3820 = vadd.xlane.f32.xlu2 %v7735_v4 }
 0x3c2   : > { %v3661_v27 = vpop.f32.mrf.mxu0 }
 0x3c3   : > { %v3571_v10 = vadd.f32 %v3570_v60, %v3482_v42  ;;  %v3865_v60 = vmul.f32 %v6495_v57, %v3864_v5 }
 0x3c5   : > { %v3750_v9 = vpop.f32.mrf.mxu1  ;;  %v3660_v34 = vadd.f32 %v3659_v19, %v3571_v10  ;;  %v3866_v35 = vadd.f32 %v6495_v57, %v3865_v60 }
 0x3c7   : > { %v7743_v14 = vadd.f32 %v3748_v53, %v3660_v34  ;;  %v7759_v62 = vsel %vm3867_vm0, %v6495_v57, %v3866_v35 }
 0x3c8   : > { %v3483_v51 = vpop.f32.mrf.mxu2 }
 0x3c9   : > { %v3572_v1 = vpop.f32.mrf.mxu3  ;;  %v3484_v12 = vadd.f32 %v3483_v51, %v7514_v32  ;;  %3822 = vadd.xlane.f32.xlu0 %v7743_v14 }
 0x3ca   : > { %v3664_v33 = vpop.f32.mrf.mxu0 }
 0x3cb   : > { %v3573_v28 = vadd.f32 %v3572_v1, %v3484_v12 }
 0x3cd   : > { %v3753_v43 = vpop.f32.mrf.mxu1  ;;  %v3662_v19 = vadd.f32 %v3661_v27, %v3573_v28  ;;  %3525 = vmatmul.bf16.gmra.mxu2 %v5575_v52  ;;  %3703 = vmatmul.bf16.gmra.mxu0 %v5583_v49 }
 0x3ce   : > { %3614 = vmatmul.bf16.gmra.mxu3 %v5579_v40 }
 0x3cf   : > { %v7751_v53 = vadd.f32 %v3750_v9, %v3662_v19 }
 0x3d0   : > { %3792 = vmatmul.bf16.gmra.mxu1 %v5587_v11  ;;  %v3486_v63 = vpop.f32.mrf.mxu2 }
 0x3d1   : > { %v3575_v32 = vpop.f32.mrf.mxu3  ;;  %v3487_v0 = vadd.f32 %v3486_v63, %v7523_v15  ;;  %3824 = vadd.xlane.f32.xlu1 %v7751_v53 }
 0x3d2   : > { %v3666_v55 = vpop.f32.mrf.mxu0 }
 0x3d3   : > { %v3576_v42 = vadd.f32 %v3575_v32, %v3487_v0 }
 0x3d5   : > { %v3755_v10 = vpop.f32.mrf.mxu1  ;;  %v3665_v34 = vadd.f32 %v3664_v33, %v3576_v42 }
 0x3d7   : > { %v7755_v27 = vadd.f32 %v3753_v43, %v3665_v34 }
 0x3d8   : > { %v3488_v50 = vpop.f32.mrf.mxu2 }
 0x3d9   : > { %v3577_v2 = vpop.f32.mrf.mxu3  ;;  %v3489_v9 = vadd.f32 %v3488_v50, %v7528_v20  ;;  %3826 = vadd.xlane.f32.xlu2 %v7755_v27 }
 0x3da   : > { %v3669_v18 = vpop.f32.mrf.mxu0 }
 0x3db   : > { %v3578_v15 = vadd.f32 %v3577_v2, %v3489_v9 }
 0x3dc   : > { %v3799_v7 = vpop.xlane.xlu0 %3798 }
 0x3dd   : > { %v3758_v51 = vpop.f32.mrf.mxu1  ;;  %v3667_v1 = vadd.f32 %v3666_v55, %v3578_v15  ;;  %v3869_v61 = vmul.f32 %v7759_v62, %v3799_v7 }
 0x3df   : > { %v7763_v37 = vsub.f32 %v7647_v54, %v3869_v61  ;;  %v7765_v12 = vadd.f32 %v3755_v10, %v3667_v1 }
 0x3e0   : > { %v3491_v52 = vpop.f32.mrf.mxu2 }
 0x3e1   : > { %v3580_v40 = vpop.f32.mrf.mxu3  ;;  %v3492_v20 = vadd.f32 %v3491_v52, %v7537_v46  ;;  %3828 = vadd.xlane.f32.xlu0 %v7765_v12  ;;  %v3933_v57 = vmul.f32 %v7763_v37, %v7763_v37 }
 0x3e2   : > { %v3671_v41 = vpop.f32.mrf.mxu0 }
 0x3e3   : > { %v3581_v49 = vadd.f32 %v3580_v40, %v3492_v20  ;;  %3965 = vadd.xlane.f32.xlu2 %v3933_v57 }
 0x3e4   : > { %v3801_v28 = vpop.xlane.xlu0 %3800 }
 0x3e5   : > { %v3760_v33 = vpop.f32.mrf.mxu1  ;;  %v3670_v11 = vadd.f32 %v3669_v18, %v3581_v49  ;;  %v3870_v54 = vmul.f32 %v7759_v62, %v3801_v28 }
 0x3e7   : > { %v7773_v43 = vsub.f32 %v7655_v48, %v3870_v54  ;;  %v7775_v19 = vadd.f32 %v3758_v51, %v3670_v11 }
 0x3e8   : > { %v3493_v5 = vpop.f32.mrf.mxu2 }
 0x3e9   : > { %v3582_v46 = vpop.f32.mrf.mxu3  ;;  %v3494_v63 = vadd.f32 %v3493_v5, %v7542_v29  ;;  %3830 = vadd.xlane.f32.xlu1 %v7775_v19  ;;  %v3934_v32 = vmul.f32 %v7773_v43, %v7773_v43 }
 0x3ea   : > { %v3674_v60 = vpop.f32.mrf.mxu0 }
 0x3eb   : > { %v3583_v0 = vadd.f32 %v3582_v46, %v3494_v63  ;;  %3967 = vadd.xlane.f32.xlu0 %v3934_v32 }
 0x3ec   : > { %v3803_v42 = vpop.xlane.xlu1 %3802 }
 0x3ed   : > { %v3763_v55 = vpop.f32.mrf.mxu1  ;;  %v3672_v10 = vadd.f32 %v3671_v41, %v3583_v0  ;;  %v3871_v48 = vmul.f32 %v7759_v62, %v3803_v42 }
 0x3ef   : > { %v7783_v34 = vsub.f32 %v7663_v39, %v3871_v48  ;;  %v7785_v35 = vadd.f32 %v3760_v33, %v3672_v10 }
 0x3f0   : > { %v3496_v50 = vpop.f32.mrf.mxu2 }
 0x3f1   : > { %v3585_v29 = vpop.f32.mrf.mxu3  ;;  %v3497_v2 = vadd.f32 %v3496_v50, %v7551_v6  ;;  %3832 = vadd.xlane.f32.xlu2 %v7785_v35  ;;  %v3935_v9 = vmul.f32 %v7783_v34, %v7783_v34 }
 0x3f2   : > { %v3676_v18 = vpop.f32.mrf.mxu0 }
 0x3f3   : > { %v3586_v15 = vadd.f32 %v3585_v29, %v3497_v2  ;;  %3969 = vadd.xlane.f32.xlu1 %v3935_v9 }
 0x3f4   : > { %v3805_v7 = vpop.xlane.xlu1 %3804 }
 0x3f5   : > { %v3765_v51 = vpop.f32.mrf.mxu1  ;;  %v3675_v1 = vadd.f32 %v3674_v60, %v3586_v15  ;;  %v3872_v39 = vmul.f32 %v7759_v62, %v3805_v7 }
 0x3f7   : > { %v7793_v61 = vsub.f32 %v7671_v13, %v3872_v39  ;;  %v7795_v52 = vadd.f32 %v3763_v55, %v3675_v1 }
 0x3f8   : > { %v3498_v40 = vpop.f32.mrf.mxu2 }
 0x3f9   : > { %v3587_v6 = vpop.f32.mrf.mxu3  ;;  %v3499_v20 = vadd.f32 %v3498_v40, %v7556_v58  ;;  %3834 = vadd.xlane.f32.xlu0 %v7795_v52  ;;  %v3936_v57 = vmul.f32 %v7793_v61, %v7793_v61 }
 0x3fa   : > { %v3679_v41 = vpop.f32.mrf.mxu0 }
 0x3fb   : > { %v3588_v49 = vadd.f32 %v3587_v6, %v3499_v20  ;;  %3971 = vadd.xlane.f32.xlu2 %v3936_v57 }
 0x3fc   : > { %v3807_v28 = vpop.xlane.xlu2 %3806 }
 0x3fd   : > { %v3768_v33 = vpop.f32.mrf.mxu1  ;;  %v3677_v11 = vadd.f32 %v3676_v18, %v3588_v49  ;;  %v3873_v13 = vmul.f32 %v7759_v62, %v3807_v28 }
 0x3ff   : > { %v7803_v54 = vsub.f32 %v7679_v26, %v3873_v13  ;;  %v7805_v5 = vadd.f32 %v3765_v51, %v3677_v11 }
 0x400   : > { %v3501_v46 = vpop.f32.mrf.mxu2 }
 0x401   : > { %v3590_v58 = vpop.f32.mrf.mxu3  ;;  %v3502_v63 = vadd.f32 %v3501_v46, %v7565_v24  ;;  %3836 = vadd.xlane.f32.xlu1 %v7805_v5  ;;  %v3937_v32 = vmul.f32 %v7803_v54, %v7803_v54 }
 0x402   : > { %v3681_v60 = vpop.f32.mrf.mxu0 }
 0x403   : > { %v3591_v0 = vadd.f32 %v3590_v58, %v3502_v63  ;;  %3973 = vadd.xlane.f32.xlu0 %v3937_v32 }
 0x404   : > { %v3809_v42 = vpop.xlane.xlu2 %3808 }
 0x405   : > { %v3770_v55 = vpop.f32.mrf.mxu1  ;;  %v3680_v10 = vadd.f32 %v3679_v41, %v3591_v0  ;;  %v3874_v26 = vmul.f32 %v7759_v62, %v3809_v42 }
 0x407   : > { %v7813_v48 = vsub.f32 %v7687_v47, %v3874_v26  ;;  %v7815_v50 = vadd.f32 %v3768_v33, %v3680_v10 }
 0x408   : > { %v3503_v29 = vpop.f32.mrf.mxu2 }
 0x409   : > { %v3592_v24 = vpop.f32.mrf.mxu3  ;;  %v3504_v2 = vadd.f32 %v3503_v29, %v7570_v38  ;;  %3838 = vadd.xlane.f32.xlu2 %v7815_v50  ;;  %v3938_v9 = vmul.f32 %v7813_v48, %v7813_v48 }
 0x40a   : > { %v3684_v18 = vpop.f32.mrf.mxu0 }
 0x40b   : > { %v3593_v15 = vadd.f32 %v3592_v24, %v3504_v2  ;;  %3975 = vadd.xlane.f32.xlu1 %v3938_v9 }
 0x40c   : > { %v3811_v7 = vpop.xlane.xlu0 %3810 }
 0x40d   : > { %v3773_v51 = vpop.f32.mrf.mxu1  ;;  %v3682_v1 = vadd.f32 %v3681_v60, %v3593_v15  ;;  %v3875_v47 = vmul.f32 %v7759_v62, %v3811_v7 }
 0x40f   : > { %v7823_v39 = vsub.f32 %v7695_v44, %v3875_v47  ;;  %v7825_v40 = vadd.f32 %v3770_v55, %v3682_v1 }
 0x410   : > { %v3506_v6 = vpop.f32.mrf.mxu2 }
 0x411   : > { %v3595_v38 = vpop.f32.mrf.mxu3  ;;  %v3507_v20 = vadd.f32 %v3506_v6, %v7579_v22  ;;  %3840 = vadd.xlane.f32.xlu0 %v7825_v40  ;;  %v3939_v57 = vmul.f32 %v7823_v39, %v7823_v39 }
 0x412   : > { %v3686_v41 = vpop.f32.mrf.mxu0 }
 0x413   : > { %v3596_v49 = vadd.f32 %v3595_v38, %v3507_v20  ;;  %3977 = vadd.xlane.f32.xlu2 %v3939_v57 }
 0x414   : > { %v3813_v28 = vpop.xlane.xlu1 %3812 }
 0x415   : > { %v3775_v33 = vpop.f32.mrf.mxu1  ;;  %v3685_v11 = vadd.f32 %v3684_v18, %v3596_v49  ;;  %v3876_v44 = vmul.f32 %v7759_v62, %v3813_v28 }
 0x417   : > { %v7833_v13 = vsub.f32 %v7703_v17, %v3876_v44  ;;  %v7835_v46 = vadd.f32 %v3773_v51, %v3685_v11 }
 0x418   : > { %v3508_v58 = vpop.f32.mrf.mxu2 }
 0x419   : > { %v3597_v22 = vpop.f32.mrf.mxu3  ;;  %v3509_v63 = vadd.f32 %v3508_v58, %v7584_v59  ;;  %3842 = vadd.xlane.f32.xlu1 %v7835_v46  ;;  %v3940_v32 = vmul.f32 %v7833_v13, %v7833_v13 }
 0x41a   : > { %v3689_v60 = vpop.f32.mrf.mxu0 }
 0x41b   : > { %v3598_v0 = vadd.f32 %v3597_v22, %v3509_v63  ;;  %3979 = vadd.xlane.f32.xlu0 %v3940_v32 }
 0x41c   : > { %v3815_v42 = vpop.xlane.xlu2 %3814 }
 0x41d   : > { %v3778_v55 = vpop.f32.mrf.mxu1  ;;  %v3687_v10 = vadd.f32 %v3686_v41, %v3598_v0  ;;  %v3877_v17 = vmul.f32 %v7759_v62, %v3815_v42 }
 0x41f   : > { %v7843_v26 = vsub.f32 %v7711_v23, %v3877_v17  ;;  %v7845_v29 = vadd.f32 %v3775_v33, %v3687_v10 }
 0x420   : > { %v3511_v24 = vpop.f32.mrf.mxu2 }
 0x421   : > { %v3600_v59 = vpop.f32.mrf.mxu3  ;;  %v3512_v2 = vadd.f32 %v3511_v24, %v7593_v21  ;;  %3844 = vadd.xlane.f32.xlu2 %v7845_v29  ;;  %v3941_v9 = vmul.f32 %v7843_v26, %v7843_v26 }
 0x422   : > { %v3691_v18 = vpop.f32.mrf.mxu0 }
 0x423   : > { %v3601_v15 = vadd.f32 %v3600_v59, %v3512_v2  ;;  %3981 = vadd.xlane.f32.xlu1 %v3941_v9 }
 0x424   : > { %v3817_v7 = vpop.xlane.xlu0 %3816 }
 0x425   : > { %v3780_v51 = vpop.f32.mrf.mxu1  ;;  %v3690_v1 = vadd.f32 %v3689_v60, %v3601_v15  ;;  %v3878_v23 = vmul.f32 %v7759_v62, %v3817_v7 }
 0x427   : > { %v7853_v47 = vsub.f32 %v7719_v56, %v3878_v23  ;;  %v7855_v6 = vadd.f32 %v3778_v55, %v3690_v1 }
 0x428   : > { %v3513_v38 = vpop.f32.mrf.mxu2 }
 0x429   : > { %v3602_v21 = vpop.f32.mrf.mxu3  ;;  %v3514_v20 = vadd.f32 %v3513_v38, %v7598_v30  ;;  %3846 = vadd.xlane.f32.xlu0 %v7855_v6  ;;  %v3942_v57 = vmul.f32 %v7853_v47, %v7853_v47 }
 0x42a   : > { %v3694_v41 = vpop.f32.mrf.mxu0 }
 0x42b   : > { %v3603_v49 = vadd.f32 %v3602_v21, %v3514_v20  ;;  %3983 = vadd.xlane.f32.xlu2 %v3942_v57 }
 0x42c   : > { %v3819_v28 = vpop.xlane.xlu1 %3818 }
 0x42d   : > { %v3783_v33 = vpop.f32.mrf.mxu1  ;;  %v3692_v11 = vadd.f32 %v3691_v18, %v3603_v49  ;;  %v3879_v56 = vmul.f32 %v7759_v62, %v3819_v28 }
 0x42f   : > { %v7863_v44 = vsub.f32 %v7727_v45, %v3879_v56  ;;  %v7865_v58 = vadd.f32 %v3780_v51, %v3692_v11 }
 0x430   : > { %v3516_v22 = vpop.f32.mrf.mxu2 }
 0x431   : > { %v3605_v30 = vpop.f32.mrf.mxu3  ;;  %v3517_v63 = vadd.f32 %v3516_v22, %v7607_v8  ;;  %3848 = vadd.xlane.f32.xlu1 %v7865_v58  ;;  %v3943_v32 = vmul.f32 %v7863_v44, %v7863_v44 }
 0x432   : > { %v3696_v60 = vpop.f32.mrf.mxu0 }
 0x433   : > { %v3606_v0 = vadd.f32 %v3605_v30, %v3517_v63  ;;  %3985 = vadd.xlane.f32.xlu0 %v3943_v32 }
 0x434   : > { %v3821_v42 = vpop.xlane.xlu2 %3820 }
 0x435   : > { %v3695_v55 = vadd.f32 %v3694_v41, %v3606_v0  ;;  %v3880_v10 = vmul.f32 %v7759_v62, %v3821_v42  ;;  %v3785_v45 = vpop.f32.mrf.mxu1 }
 0x437   : > { %v7873_v17 = vsub.f32 %v7735_v4, %v3880_v10  ;;  %v7875_v24 = vadd.f32 %v3783_v33, %v3695_v55 }
 0x438   : > { %v3518_v59 = vpop.f32.mrf.mxu2 }
 0x439   : > { %v3607_v8 = vpop.f32.mrf.mxu3  ;;  %v3519_v2 = vadd.f32 %v3518_v59, %v7612_v36  ;;  %3850 = vadd.xlane.f32.xlu2 %v7875_v24  ;;  %v3944_v9 = vmul.f32 %v7873_v17, %v7873_v17 }
 0x43a   : > { %v3699_v51 = vpop.f32.mrf.mxu0 }
 0x43b   : > { %v3608_v15 = vadd.f32 %v3607_v8, %v3519_v2  ;;  %3987 = vadd.xlane.f32.xlu1 %v3944_v9 }
 0x43c   : > { %v3823_v18 = vpop.xlane.xlu0 %3822 }
 0x43d   : > { %v3697_v7 = vadd.f32 %v3696_v60, %v3608_v15  ;;  %v3881_v1 = vmul.f32 %v7759_v62, %v3823_v18  ;;  %v3788_v23 = vpop.f32.mrf.mxu1 }
 0x43f   : > { %v7883_v4 = vsub.f32 %v7743_v14, %v3881_v1  ;;  %v7885_v38 = vadd.f32 %v3785_v45, %v3697_v7 }
 0x440   : > { %v3521_v21 = vpop.f32.mrf.mxu2 }
 0x441   : > { %v3610_v36 = vpop.f32.mrf.mxu3  ;;  %v3522_v20 = vadd.f32 %v3521_v21, %v7621_v31  ;;  %3852 = vadd.xlane.f32.xlu0 %v7885_v38  ;;  %v3945_v57 = vmul.f32 %v7883_v4, %v7883_v4 }
 0x442   : > { %v3701_v14 = vpop.f32.mrf.mxu0 }
 0x443   : > { %v3611_v49 = vadd.f32 %v3610_v36, %v3522_v20  ;;  %3989 = vadd.xlane.f32.xlu2 %v3945_v57 }
 0x444   : > { %v3825_v41 = vpop.xlane.xlu1 %3824 }
 0x445   : > { %v3700_v28 = vadd.f32 %v3699_v51, %v3611_v49  ;;  %v3882_v33 = vmul.f32 %v7759_v62, %v3825_v41  ;;  %v3790_v32 = vpop.f32.mrf.mxu1 }
 0x447   : > { %v7893_v11 = vsub.f32 %v7751_v53, %v3882_v33  ;;  %v7895_v56 = vadd.f32 %v3788_v23, %v3700_v28 }
 0x448   : > { %v3523_v22 = vpop.f32.mrf.mxu2 }
 0x449   : > { %v3612_v30 = vpop.f32.mrf.mxu3  ;;  %v3524_v31 = vadd.f32 %v3523_v22, %v7626_v25  ;;  %3854 = vadd.xlane.f32.xlu1 %v7895_v56  ;;  %v3946_v63 = vmul.f32 %v7893_v11, %v7893_v11 }
 0x44a   : > { %v3704_v59 = vpop.f32.mrf.mxu0 }
 0x44b   : > { %v3613_v0 = vadd.f32 %v3612_v30, %v3524_v31  ;;  %3991 = vadd.xlane.f32.xlu0 %v3946_v63 }
 0x44c   : > { %v3827_v42 = vpop.xlane.xlu2 %3826 }
 0x44d   : > { %v3702_v60 = vadd.f32 %v3701_v14, %v3613_v0  ;;  %v3793_v8 = vpop.f32.mrf.mxu1  ;;  %v3883_v22 = vmul.f32 %v7759_v62, %v3827_v42 }
 0x44f   : > { %v7901_v55 = vadd.f32 %v3790_v32, %v3702_v60 }
 0x450   : > { %v3526_v53 = vpop.f32.mrf.mxu2 }
 0x451   : > { %v3615_v10 = vpop.f32.mrf.mxu3  ;;  %v3527_v45 = vadd.f32 %v3526_v53, %v7635_v16  ;;  %3856 = vadd.xlane.f32.xlu2 %v7901_v55  ;;  %v7928_v53 = vsub.f32 %v7755_v27, %v3883_v22 }
 0x452   : > { %v3706_v49 = vpop.f32.mrf.mxu0 }
 0x453   : > { %v3616_v25 = vadd.f32 %v3615_v10, %v3527_v45 }
 0x454   : > { %v3829_v2 = vpop.xlane.xlu0 %3828 }
 0x455   : > { %v3705_v9 = vadd.f32 %v3704_v59, %v3616_v25  ;;  %v3884_v15 = vmul.f32 %v7759_v62, %v3829_v2  ;;  %v3795_v33 = vpop.f32.mrf.mxu1 }
 0x456   : > { %v3966_v18 = vpop.xlane.xlu2 %3965 }
 0x457   : > { %v7907_v7 = vsub.f32 %v7765_v12, %v3884_v15  ;;  %v4029_v51 = vmul.f32 %v3966_v18, %v7759_v62  ;;  %v7910_v1 = vadd.f32 %v3793_v8, %v3705_v9  ;;  %v3947_v8 = vmul.f32 %v7928_v53, %v7928_v53 }
 0x458   : > { %v3528_v23 = vpop.f32.mrf.mxu2 }
 0x459   : > { %v4061_v21 = vadd.f32 1e-05, %v4029_v51  ;;  %v3529_v16 = vadd.f32 %v3528_v23, %v7640_v3  ;;  %3858 = vadd.xlane.f32.xlu0 %v7910_v1  ;;  %v3948_v36 = vmul.f32 %v7907_v7, %v7907_v7  ;;  %v3617_v20 = vpop.f32.mrf.mxu3  ;;  %v7934_v51 = vld [vmem:[#allocation8] ss:$0 sm:$0xff] }
 0x45b   : > { %6496 = vrsqrt.f32 %v4061_v21  ;;  %v3618_v57 = vadd.f32 %v3617_v20, %v3529_v16  ;;  %3995 = vadd.xlane.f32.xlu2 %v3948_v36  ;;  %vm4099_vm2 = vweird.f32 %v4061_v21 }
 0x45c   : > { %v3831_v12 = vpop.xlane.xlu1 %3830 }
 0x45d   : > { %v3707_v41 = vadd.f32 %v3706_v49, %v3618_v57  ;;  %v3885_v28 = vmul.f32 %v7759_v62, %v3831_v12  ;;  %v7940_v57 = vld [vmem:[#allocation10] ss:$0 sm:$0xff] }
 0x45e   : > { %v3968_v14 = vpop.xlane.xlu0 %3967 }
 0x45f   : > { %v7919_v3 = vsub.f32 %v7775_v19, %v3885_v28  ;;  %v4030_v30 = vmul.f32 %v3968_v14, %v7759_v62  ;;  %v7922_v31 = vadd.f32 %v3795_v33, %v3707_v41 }
 0x461   : > { %v6497_v63 = vpop.eup %6496  ;;  %v4062_v32 = vadd.f32 1e-05, %v4030_v30  ;;  %3860 = vadd.xlane.f32.xlu1 %v7922_v31  ;;  %v3949_v0 = vmul.f32 %v7919_v3, %v7919_v3 }
 0x462   : > { %v4094_v60 = vmul.f32 %v6497_v63, %v4061_v21  ;;  %vm4100_vm1 = vweird.f32 %v6497_v63 }
 0x463   : > { %6498 = vrsqrt.f32 %v4062_v32  ;;  %3997 = vadd.xlane.f32.xlu0 %v3949_v0  ;;  %vm4101_vm3 = vmor %vm4099_vm2, %vm4100_vm1  ;;  %vm4109_vm5 = vweird.f32 %v4062_v32 }
 0x464   : > { %v4095_v42 = vmul.f32 %v6497_v63, %v4094_v60  ;;  %v3833_v19 = vpop.xlane.xlu2 %3832 }
 0x465   : > { %v3886_v59 = vmul.f32 %v7759_v62, %v3833_v19 }
 0x466   : > { %v4096_v10 = vmul.f32 0.5, %v4095_v42  ;;  %v3970_v45 = vpop.xlane.xlu1 %3969 }
 0x467   : > { %v4031_v25 = vmul.f32 %v3970_v45, %v7759_v62  ;;  %v7937_v23 = vsub.f32 %v7785_v35, %v3886_v59 }
 0x468   : > { %v4097_v2 = vsub.f32 1.5, %v4096_v10 }
 0x469   : > { %v6499_v9 = vpop.eup %6498  ;;  %v4063_v15 = vadd.f32 1e-05, %v4031_v25  ;;  %3993 = vadd.xlane.f32.xlu1 %v3947_v8  ;;  %v3950_v14 = vmul.f32 %v7937_v23, %v7937_v23 }
 0x46a   : > { %v4098_v27 = vmul.f32 %v6497_v63, %v4097_v2  ;;  %v4104_v18 = vmul.f32 %v6499_v9, %v4062_v32  ;;  %vm4110_vm4 = vweird.f32 %v6499_v9 }
 0x46b   : > { %6500 = vrsqrt.f32 %v4063_v15  ;;  %vm4111_vm6 = vmor %vm4109_vm5, %vm4110_vm4  ;;  %vm4119_vm8 = vweird.f32 %v4063_v15 }
 0x46c   : > { %v4102_v16 = vsel %vm4101_vm3, %v6497_v63, %v4098_v27  ;;  %v4105_v36 = vmul.f32 %v6499_v9, %v4104_v18  ;;  %v3835_v20 = vpop.xlane.xlu0 %3834 }
 0x46d   : > { %v4413_v49 = vmul.f32 %v4102_v16, %v7763_v37  ;;  %v3887_v12 = vmul.f32 %v7759_v62, %v3835_v20 }
 0x46e   : > { %v4106_v41 = vmul.f32 0.5, %v4105_v36  ;;  %v3972_v21 = vpop.xlane.xlu2 %3971 }
 0x46f   : > { %v4449_v28 = vmul.f32 %v7934_v51, %v4413_v49  ;;  %v7946_v33 = vsub.f32 %v7795_v52, %v3887_v12  ;;  %v4032_v35 = vmul.f32 %v3972_v21, %v7759_v62 }
 0x470   : > { %v4107_v22 = vsub.f32 1.5, %v4106_v41 }
 0x471   : > { %v6501_v30 = vpop.eup %6500  ;;  %v4485_v63 = vadd.f32 %v7940_v57, %v4449_v28  ;;  %v4064_v37 = vadd.f32 1e-05, %v4032_v35  ;;  %3999 = vadd.xlane.f32.xlu1 %v3950_v14  ;;  %v3951_v0 = vmul.f32 %v7946_v33, %v7946_v33 }
 0x472   : > { %v4108_v60 = vmul.f32 %v6499_v9, %v4107_v22  ;;  %v4114_v42 = vmul.f32 %v6501_v30, %v4063_v15  ;;  %vm4120_vm7 = vweird.f32 %v6501_v30 }
 0x473   : > { %4517 = vst [vmem:[%s7954_s29] sm:$0xff] %v4485_v63  ;;  %6502 = vrsqrt.f32 %v4064_v37  ;;  %4001 = vadd.xlane.f32.xlu2 %v3951_v0  ;;  %vm4121_vm9 = vmor %vm4119_vm8, %vm4120_vm7  ;;  %vm4129_vm11 = vweird.f32 %v4064_v37 }
 0x474   : > { %v4112_v52 = vsel %vm4111_vm6, %v6499_v9, %v4108_v60  ;;  %v4115_v19 = vmul.f32 %v6501_v30, %v4114_v42  ;;  %v3837_v10 = vpop.xlane.xlu1 %3836 }
 0x475   : > { %v4414_v45 = vmul.f32 %v4112_v52, %v7773_v43  ;;  %v3888_v59 = vmul.f32 %v7759_v62, %v3837_v10 }
 0x476   : > { %v4116_v25 = vmul.f32 0.5, %v4115_v19  ;;  %v3974_v8 = vpop.xlane.xlu0 %3973 }
 0x477   : > { %v4450_v32 = vmul.f32 %v7934_v51, %v4414_v45  ;;  %v7961_v2 = vsub.f32 %v7805_v5, %v3888_v59  ;;  %v4033_v27 = vmul.f32 %v3974_v8, %v7759_v62 }
 0x478   : > { %v4117_v18 = vsub.f32 1.5, %v4116_v25 }
 0x479   : > { %v6503_v16 = vpop.eup %6502  ;;  %v4486_v9 = vadd.f32 %v7940_v57, %v4450_v32  ;;  %v4065_v36 = vadd.f32 1e-05, %v4033_v27  ;;  %v3952_v43 = vmul.f32 %v7961_v2, %v7961_v2 }
 0x47a   : > { %v4118_v20 = vmul.f32 %v6501_v30, %v4117_v18  ;;  %v4124_v49 = vmul.f32 %v6503_v16, %v4064_v37  ;;  %vm4130_vm10 = vweird.f32 %v6503_v16 }
 0x47b   : > { %4518 = vst [vmem:[%s7954_s29 + $0x8] sm:$0xff] %v4486_v9  ;;  %6504 = vrsqrt.f32 %v4065_v36  ;;  %4003 = vadd.xlane.f32.xlu0 %v3952_v43  ;;  %vm4131_vm12 = vmor %vm4129_vm11, %vm4130_vm10  ;;  %vm4139_vm14 = vweird.f32 %v4065_v36 }
 0x47c   : > { %v4122_v5 = vsel %vm4121_vm9, %v6501_v30, %v4118_v20  ;;  %v4125_v12 = vmul.f32 %v6503_v16, %v4124_v49  ;;  %v3839_v41 = vpop.xlane.xlu2 %3838 }
 0x47d   : > { %v4415_v21 = vmul.f32 %v4122_v5, %v7783_v34  ;;  %v3889_v28 = vmul.f32 %v7759_v62, %v3839_v41 }
 0x47e   : > { %v4126_v35 = vmul.f32 0.5, %v4125_v12  ;;  %v3976_v14 = vpop.xlane.xlu1 %3975 }
 0x47f   : > { %v4451_v22 = vmul.f32 %v7934_v51, %v4415_v21  ;;  %v7972_v63 = vsub.f32 %v7815_v50, %v3889_v28  ;;  %v4034_v15 = vmul.f32 %v3976_v14, %v7759_v62 }
 0x480   : > { %v4127_v0 = vsub.f32 1.5, %v4126_v35 }
 0x481   : > { %v6505_v60 = vpop.eup %6504  ;;  %v4487_v30 = vadd.f32 %v7940_v57, %v4451_v22  ;;  %v4066_v42 = vadd.f32 1e-05, %v4034_v15  ;;  %v3953_v34 = vmul.f32 %v7972_v63, %v7972_v63 }
 0x482   : > { %v4128_v52 = vmul.f32 %v6503_v16, %v4127_v0  ;;  %v4134_v19 = vmul.f32 %v6505_v60, %v4065_v36  ;;  %vm4140_vm13 = vweird.f32 %v6505_v60 }
 0x483   : > { %4519 = vst [vmem:[%s7954_s29 + $0x10] sm:$0xff] %v4487_v30  ;;  %6506 = vrsqrt.f32 %v4066_v42  ;;  %4005 = vadd.xlane.f32.xlu1 %v3953_v34  ;;  %vm4141_vm15 = vmor %vm4139_vm14, %vm4140_vm13  ;;  %vm4149_vm1 = vweird.f32 %v4066_v42 }
 0x484   : > { %v4132_v50 = vsel %vm4131_vm12, %v6503_v16, %v4128_v52  ;;  %v4135_v10 = vmul.f32 %v6505_v60, %v4134_v19  ;;  %v3841_v45 = vpop.xlane.xlu0 %3840 }
 0x485   : > { %v4416_v59 = vmul.f32 %v4132_v50, %v7793_v61  ;;  %v3890_v25 = vmul.f32 %v7759_v62, %v3841_v45 }
 0x486   : > { %v4136_v8 = vmul.f32 0.5, %v4135_v10  ;;  %v3978_v32 = vpop.xlane.xlu2 %3977 }
 0x487   : > { %v4452_v27 = vmul.f32 %v7934_v51, %v4416_v59  ;;  %v7983_v18 = vsub.f32 %v7825_v40, %v3890_v25  ;;  %v4035_v37 = vmul.f32 %v3978_v32, %v7759_v62 }
 0x488   : > { %v4137_v9 = vsub.f32 1.5, %v4136_v8 }
 0x489   : > { %v6507_v43 = vpop.eup %6506  ;;  %v4488_v16 = vadd.f32 %v7940_v57, %v4452_v27  ;;  %v4067_v20 = vadd.f32 1e-05, %v4035_v37  ;;  %v3954_v61 = vmul.f32 %v7983_v18, %v7983_v18 }
 0x48a   : > { %v4138_v49 = vmul.f32 %v6505_v60, %v4137_v9  ;;  %v4144_v5 = vmul.f32 %v6507_v43, %v4066_v42  ;;  %vm4150_vm0 = vweird.f32 %v6507_v43 }
 0x48b   : > { %4520 = vst [vmem:[%s7954_s29 + $0x18] sm:$0xff] %v4488_v16  ;;  %6508 = vrsqrt.f32 %v4067_v20  ;;  %4007 = vadd.xlane.f32.xlu2 %v3954_v61  ;;  %vm4151_vm2 = vmor %vm4149_vm1, %vm4150_vm0  ;;  %vm4159_vm4 = vweird.f32 %v4067_v20 }
 0x48c   : > { %v4142_v40 = vsel %vm4141_vm15, %v6505_v60, %v4138_v49  ;;  %v4145_v12 = vmul.f32 %v6507_v43, %v4144_v5  ;;  %v3843_v41 = vpop.xlane.xlu1 %3842 }
 0x48d   : > { %v4417_v21 = vmul.f32 %v4142_v40, %v7803_v54  ;;  %v3891_v28 = vmul.f32 %v7759_v62, %v3843_v41 }
 0x48e   : > { %v4146_v35 = vmul.f32 0.5, %v4145_v12  ;;  %v3980_v14 = vpop.xlane.xlu0 %3979 }
 0x48f   : > { %v4453_v22 = vmul.f32 %v7934_v51, %v4417_v21  ;;  %v7994_v15 = vsub.f32 %v7835_v46, %v3891_v28  ;;  %v4036_v36 = vmul.f32 %v3980_v14, %v7759_v62 }
 0x490   : > { %v4147_v0 = vsub.f32 1.5, %v4146_v35 }
 0x491   : > { %v6509_v30 = vpop.eup %6508  ;;  %v4489_v60 = vadd.f32 %v7940_v57, %v4453_v22  ;;  %v4068_v34 = vadd.f32 1e-05, %v4036_v36  ;;  %v3955_v54 = vmul.f32 %v7994_v15, %v7994_v15 }
 0x492   : > { %v4148_v52 = vmul.f32 %v6507_v43, %v4147_v0  ;;  %v4154_v19 = vmul.f32 %v6509_v30, %v4067_v20  ;;  %vm4160_vm3 = vweird.f32 %v6509_v30 }
 0x493   : > { %4521 = vst [vmem:[%s7954_s29 + $0x20] sm:$0xff] %v4489_v60  ;;  %6510 = vrsqrt.f32 %v4068_v34  ;;  %4009 = vadd.xlane.f32.xlu0 %v3955_v54  ;;  %vm4161_vm5 = vmor %vm4159_vm4, %vm4160_vm3  ;;  %vm4169_vm7 = vweird.f32 %v4068_v34 }
 0x494   : > { %v4152_v46 = vsel %vm4151_vm2, %v6507_v43, %v4148_v52  ;;  %v4155_v50 = vmul.f32 %v6509_v30, %v4154_v19  ;;  %v3845_v10 = vpop.xlane.xlu2 %3844 }
 0x495   : > { %v4418_v45 = vmul.f32 %v4152_v46, %v7813_v48  ;;  %v3892_v59 = vmul.f32 %v7759_v62, %v3845_v10 }
 0x496   : > { %v4156_v25 = vmul.f32 0.5, %v4155_v50  ;;  %v3982_v8 = vpop.xlane.xlu1 %3981 }
 0x497   : > { %v4454_v32 = vmul.f32 %v7934_v51, %v4418_v45  ;;  %v8005_v27 = vsub.f32 %v7845_v29, %v3892_v59  ;;  %v4037_v42 = vmul.f32 %v3982_v8, %v7759_v62 }
 0x498   : > { %v4157_v37 = vsub.f32 1.5, %v4156_v25 }
 0x499   : > { %v6511_v9 = vpop.eup %6510  ;;  %v4490_v43 = vadd.f32 %v7940_v57, %v4454_v32  ;;  %v4069_v16 = vadd.f32 1e-05, %v4037_v42  ;;  %v3956_v48 = vmul.f32 %v8005_v27, %v8005_v27 }
 0x49a   : > { %v4158_v61 = vmul.f32 %v6509_v30, %v4157_v37  ;;  %v4164_v49 = vmul.f32 %v6511_v9, %v4068_v34  ;;  %vm4170_vm6 = vweird.f32 %v6511_v9 }
 0x49b   : > { %4522 = vst [vmem:[%s7954_s29 + $0x28] sm:$0xff] %v4490_v43  ;;  %6512 = vrsqrt.f32 %v4069_v16  ;;  %4011 = vadd.xlane.f32.xlu1 %v3956_v48  ;;  %vm4171_vm8 = vmor %vm4169_vm7, %vm4170_vm6  ;;  %vm4179_vm10 = vweird.f32 %v4069_v16 }
 0x49c   : > { %v4162_v29 = vsel %vm4161_vm5, %v6509_v30, %v4158_v61  ;;  %v4165_v5 = vmul.f32 %v6511_v9, %v4164_v49  ;;  %v3847_v40 = vpop.xlane.xlu0 %3846 }
 0x49d   : > { %v4419_v12 = vmul.f32 %v4162_v29, %v7823_v39  ;;  %v3893_v41 = vmul.f32 %v7759_v62, %v3847_v40 }
 0x49e   : > { %v4166_v21 = vmul.f32 0.5, %v4165_v5  ;;  %v3984_v28 = vpop.xlane.xlu2 %3983 }
 0x49f   : > { %v4455_v35 = vmul.f32 %v7934_v51, %v4419_v12  ;;  %v8016_v14 = vsub.f32 %v7855_v6, %v3893_v41  ;;  %v4038_v20 = vmul.f32 %v3984_v28, %v7759_v62 }
 0x4a0   : > { %v4167_v22 = vsub.f32 1.5, %v4166_v21 }
 0x4a1   : > { %v6513_v36 = vpop.eup %6512  ;;  %v4491_v0 = vadd.f32 %v7940_v57, %v4455_v35  ;;  %v4070_v30 = vadd.f32 1e-05, %v4038_v20  ;;  %v3957_v39 = vmul.f32 %v8016_v14, %v8016_v14 }
 0x4a2   : > { %v4168_v60 = vmul.f32 %v6511_v9, %v4167_v22  ;;  %v4174_v54 = vmul.f32 %v6513_v36, %v4069_v16  ;;  %vm4180_vm9 = vweird.f32 %v6513_v36 }
 0x4a3   : > { %4523 = vst [vmem:[%s7954_s29 + $0x30] sm:$0xff] %v4491_v0  ;;  %6514 = vrsqrt.f32 %v4070_v30  ;;  %4013 = vadd.xlane.f32.xlu2 %v3957_v39  ;;  %vm4181_vm11 = vmor %vm4179_vm10, %vm4180_vm9  ;;  %vm4189_vm13 = vweird.f32 %v4070_v30 }
 0x4a4   : > { %v4172_v6 = vsel %vm4171_vm8, %v6511_v9, %v4168_v60  ;;  %v4175_v52 = vmul.f32 %v6513_v36, %v4174_v54  ;;  %v3849_v19 = vpop.xlane.xlu1 %3848 }
 0x4a5   : > { %v4420_v46 = vmul.f32 %v4172_v6, %v7833_v13  ;;  %v3894_v50 = vmul.f32 %v7759_v62, %v3849_v19 }
 0x4a6   : > { %v4176_v10 = vmul.f32 0.5, %v4175_v52  ;;  %v3986_v45 = vpop.xlane.xlu0 %3985 }
 0x4a7   : > { %v4456_v59 = vmul.f32 %v7934_v51, %v4420_v46  ;;  %v8027_v25 = vsub.f32 %v7865_v58, %v3894_v50  ;;  %v4039_v34 = vmul.f32 %v3986_v45, %v7759_v62 }
 0x4a8   : > { %v4177_v8 = vsub.f32 1.5, %v4176_v10 }
 0x4a9   : > { %v6515_v32 = vpop.eup %6514  ;;  %v4492_v42 = vadd.f32 %v7940_v57, %v4456_v59  ;;  %v4071_v37 = vadd.f32 1e-05, %v4039_v34  ;;  %v3958_v13 = vmul.f32 %v8027_v25, %v8027_v25 }
 0x4aa   : > { %v4178_v9 = vmul.f32 %v6513_v36, %v4177_v8  ;;  %v4184_v43 = vmul.f32 %v6515_v32, %v4070_v30  ;;  %vm4190_vm12 = vweird.f32 %v6515_v32 }
 0x4ab   : > { %4524 = vst [vmem:[%s7954_s29 + $0x38] sm:$0xff] %v4492_v42  ;;  %6516 = vrsqrt.f32 %v4071_v37  ;;  %4015 = vadd.xlane.f32.xlu0 %v3958_v13  ;;  %vm4191_vm14 = vmor %vm4189_vm13, %vm4190_vm12  ;;  %vm4199_vm0 = vweird.f32 %v4071_v37 }
 0x4ac   : > { %v4182_v58 = vsel %vm4181_vm11, %v6513_v36, %v4178_v9  ;;  %v4185_v48 = vmul.f32 %v6515_v32, %v4184_v43  ;;  %v3851_v61 = vpop.xlane.xlu2 %3850 }
 0x4ad   : > { %v4421_v49 = vmul.f32 %v4182_v58, %v7843_v26  ;;  %v3895_v29 = vmul.f32 %v7759_v62, %v3851_v61 }
 0x4ae   : > { %v4186_v5 = vmul.f32 0.5, %v4185_v48  ;;  %v3988_v40 = vpop.xlane.xlu1 %3987 }
 0x4af   : > { %v4457_v12 = vmul.f32 %v7934_v51, %v4421_v49  ;;  %v8038_v41 = vsub.f32 %v7875_v24, %v3895_v29  ;;  %v4040_v16 = vmul.f32 %v3988_v40, %v7759_v62 }
 0x4b0   : > { %v4187_v21 = vsub.f32 1.5, %v4186_v5 }
 0x4b1   : > { %v6517_v28 = vpop.eup %6516  ;;  %v4493_v35 = vadd.f32 %v7940_v57, %v4457_v12  ;;  %v4072_v20 = vadd.f32 1e-05, %v4040_v16  ;;  %v3959_v26 = vmul.f32 %v8038_v41, %v8038_v41 }
 0x4b2   : > { %v4188_v22 = vmul.f32 %v6515_v32, %v4187_v21  ;;  %v4194_v36 = vmul.f32 %v6517_v28, %v4071_v37  ;;  %vm4200_vm15 = vweird.f32 %v6517_v28 }
 0x4b3   : > { %4525 = vst [vmem:[%s7954_s29 + $0x40] sm:$0xff] %v4493_v35  ;;  %6518 = vrsqrt.f32 %v4072_v20  ;;  %4017 = vadd.xlane.f32.xlu1 %v3959_v26  ;;  %vm4201_vm1 = vmor %vm4199_vm0, %vm4200_vm15  ;;  %vm4209_vm3 = vweird.f32 %v4072_v20 }
 0x4b4   : > { %v4192_v24 = vsel %vm4191_vm14, %v6515_v32, %v4188_v22  ;;  %v4195_v0 = vmul.f32 %v6517_v28, %v4194_v36  ;;  %v3853_v39 = vpop.xlane.xlu0 %3852 }
 0x4b5   : > { %v4422_v60 = vmul.f32 %v4192_v24, %v7853_v47  ;;  %v3896_v54 = vmul.f32 %v7759_v62, %v3853_v39 }
 0x4b6   : > { %v4196_v6 = vmul.f32 0.5, %v4195_v0  ;;  %v3990_v52 = vpop.xlane.xlu2 %3989 }
 0x4b7   : > { %v4458_v19 = vmul.f32 %v7934_v51, %v4422_v60  ;;  %v8049_v46 = vsub.f32 %v7885_v38, %v3896_v54  ;;  %v4041_v30 = vmul.f32 %v3990_v52, %v7759_v62 }
 0x4b8   : > { %v4197_v50 = vsub.f32 1.5, %v4196_v6 }
 0x4b9   : > { %v6519_v10 = vpop.eup %6518  ;;  %v4494_v45 = vadd.f32 %v7940_v57, %v4458_v19  ;;  %v4073_v59 = vadd.f32 1e-05, %v4041_v30  ;;  %v3960_v47 = vmul.f32 %v8049_v46, %v8049_v46 }
 0x4ba   : > { %v4198_v34 = vmul.f32 %v6517_v28, %v4197_v50  ;;  %v4204_v8 = vmul.f32 %v6519_v10, %v4072_v20  ;;  %vm4210_vm2 = vweird.f32 %v6519_v10 }
 0x4bb   : > { %4526 = vst [vmem:[%s7954_s29 + $0x48] sm:$0xff] %v4494_v45  ;;  %6520 = vrsqrt.f32 %v4073_v59  ;;  %4019 = vadd.xlane.f32.xlu2 %v3960_v47  ;;  %vm4211_vm4 = vmor %vm4209_vm3, %vm4210_vm2  ;;  %vm4219_vm6 = vweird.f32 %v4073_v59 }
 0x4bc   : > { %v4202_v38 = vsel %vm4201_vm1, %v6517_v28, %v4198_v34  ;;  %v4205_v32 = vmul.f32 %v6519_v10, %v4204_v8  ;;  %v3855_v42 = vpop.xlane.xlu1 %3854 }
 0x4bd   : > { %v4423_v13 = vmul.f32 %v4202_v38, %v7863_v44  ;;  %v3897_v9 = vmul.f32 %v7759_v62, %v3855_v42 }
 0x4be   : > { %v4206_v43 = vmul.f32 0.5, %v4205_v32  ;;  %v3992_v58 = vpop.xlane.xlu0 %3991 }
 0x4bf   : > { %v4459_v48 = vmul.f32 %v7934_v51, %v4423_v13  ;;  %v8060_v61 = vsub.f32 %v7895_v56, %v3897_v9  ;;  %v4042_v37 = vmul.f32 %v3992_v58, %v7759_v62 }
 0x4c0   : > { %v4207_v49 = vsub.f32 1.5, %v4206_v43 }
 0x4c1   : > { %v6521_v29 = vpop.eup %6520  ;;  %v4495_v5 = vadd.f32 %v7940_v57, %v4459_v48  ;;  %v4074_v40 = vadd.f32 1e-05, %v4042_v37  ;;  %v3961_v44 = vmul.f32 %v8060_v61, %v8060_v61 }
 0x4c2   : > { %v4208_v12 = vmul.f32 %v6519_v10, %v4207_v49  ;;  %v4214_v16 = vmul.f32 %v6521_v29, %v4073_v59  ;;  %vm4220_vm5 = vweird.f32 %v6521_v29 }
 0x4c3   : > { %4527 = vst [vmem:[%s7954_s29 + $0x50] sm:$0xff] %v4495_v5  ;;  %6522 = vrsqrt.f32 %v4074_v40  ;;  %4021 = vadd.xlane.f32.xlu0 %v3961_v44  ;;  %vm4221_vm7 = vmor %vm4219_vm6, %vm4220_vm5  ;;  %vm4229_vm9 = vweird.f32 %v4074_v40 }
 0x4c4   : > { %v4212_v56 = vsel %vm4211_vm4, %v6519_v10, %v4208_v12  ;;  %v4215_v21 = vmul.f32 %v6521_v29, %v4214_v16  ;;  %v3857_v28 = vpop.xlane.xlu2 %3856 }
 0x4c5   : > { %v4424_v35 = vmul.f32 %v4212_v56, %v7873_v17  ;;  %v3898_v26 = vmul.f32 %v7759_v62, %v3857_v28 }
 0x4c6   : > { %v4216_v22 = vmul.f32 0.5, %v4215_v21 }
 0x4c7   : > { %v4460_v36 = vmul.f32 %v7934_v51, %v4424_v35  ;;  %v8071_v24 = vsub.f32 %v7901_v55, %v3898_v26 }
 0x4c8   : > { %v4217_v20 = vsub.f32 1.5, %v4216_v22 }
 0x4c9   : > { %v6523_v0 = vpop.eup %6522  ;;  %v4496_v39 = vadd.f32 %v7940_v57, %v4460_v36  ;;  %v3962_v60 = vmul.f32 %v8071_v24, %v8071_v24 }
 0x4ca   : > { %v4218_v54 = vmul.f32 %v6521_v29, %v4217_v20  ;;  %v4224_v6 = vmul.f32 %v6523_v0, %v4074_v40  ;;  %vm4230_vm8 = vweird.f32 %v6523_v0 }
 0x4cb   : > { %4528 = vst [vmem:[%s7954_s29 + $0x58] sm:$0xff] %v4496_v39  ;;  %4023 = vadd.xlane.f32.xlu1 %v3962_v60  ;;  %vm4231_vm10 = vmor %vm4229_vm9, %vm4230_vm8 }
 0x4cc   : > { %v4222_v17 = vsel %vm4221_vm7, %v6521_v29, %v4218_v54  ;;  %v4225_v52 = vmul.f32 %v6523_v0, %v4224_v6  ;;  %v3859_v19 = vpop.xlane.xlu0 %3858 }
 0x4cd   : > { %v4425_v55 = vmul.f32 %v4222_v17, %v7883_v4  ;;  %v3899_v30 = vmul.f32 %v7759_v62, %v3859_v19 }
 0x4ce   : > { %v4226_v50 = vmul.f32 0.5, %v4225_v52  ;;  %v3996_v10 = vpop.xlane.xlu2 %3995 }
 0x4cf   : > { %v4461_v45 = vmul.f32 %v7934_v51, %v4425_v55  ;;  %v8081_v47 = vsub.f32 %v7910_v1, %v3899_v30  ;;  %v4044_v59 = vmul.f32 %v3996_v10, %v7759_v62 }
 0x4d0   : > { %v4227_v34 = vsub.f32 1.5, %v4226_v50 }
 0x4d1   : > { %v4497_v8 = vadd.f32 %v7940_v57, %v4461_v45  ;;  %v4076_v38 = vadd.f32 1e-05, %v4044_v59  ;;  %v3963_v32 = vmul.f32 %v8081_v47, %v8081_v47 }
 0x4d2   : > { %v4228_v4 = vmul.f32 %v6523_v0, %v4227_v34 }
 0x4d3   : > { %4529 = vst [vmem:[%s7954_s29 + $0x60] sm:$0xff] %v4497_v8  ;;  %6524 = vrsqrt.f32 %v4076_v38  ;;  %4025 = vadd.xlane.f32.xlu2 %v3963_v32  ;;  %vm4249_vm12 = vweird.f32 %v4076_v38 }
 0x4d4   : > { %v4232_v42 = vsel %vm4231_vm10, %v6523_v0, %v4228_v4  ;;  %v3861_v1 = vpop.xlane.xlu1 %3860 }
 0x4d5   : > { %v4426_v13 = vmul.f32 %v4232_v42, %v7893_v11  ;;  %v3900_v9 = vmul.f32 %v7759_v62, %v3861_v1 }
 0x4d6   : > { %v3998_v43 = vpop.xlane.xlu0 %3997 }
 0x4d7   : > { %v4462_v58 = vmul.f32 %v7934_v51, %v4426_v13  ;;  %v8092_v48 = vsub.f32 %v7922_v31, %v3900_v9  ;;  %v4045_v37 = vmul.f32 %v3998_v43, %v7759_v62 }
 0x4d9   : > { %v6525_v49 = vpop.eup %6524  ;;  %v4498_v29 = vadd.f32 %v7940_v57, %v4462_v58  ;;  %v4077_v5 = vadd.f32 1e-05, %v4045_v37  ;;  %v3964_v40 = vmul.f32 %v8092_v48, %v8092_v48 }
 0x4da   : > { %v4244_v44 = vmul.f32 %v6525_v49, %v4076_v38  ;;  %vm4250_vm11 = vweird.f32 %v6525_v49 }
 0x4db   : > { %4530 = vst [vmem:[%s7954_s29 + $0x68] sm:$0xff] %v4498_v29  ;;  %6526 = vrsqrt.f32 %v4077_v5  ;;  %4027 = vadd.xlane.f32.xlu0 %v3964_v40  ;;  %vm4251_vm13 = vmor %vm4249_vm12, %vm4250_vm11  ;;  %vm4259_vm15 = vweird.f32 %v4077_v5 }
 0x4dc   : > { %v4245_v11 = vmul.f32 %v6525_v49, %v4244_v44  ;;  %v3994_v12 = vpop.xlane.xlu1 %3993 }
 0x4dd   : > { %v4043_v16 = vmul.f32 %v3994_v12, %v7759_v62 }
 0x4de   : > { %v4246_v56 = vmul.f32 0.5, %v4245_v11 }
 0x4df   : > { %v4075_v31 = vadd.f32 1e-05, %v4043_v16 }
 0x4e0   : > { %v4247_v21 = vsub.f32 1.5, %v4246_v56 }
 0x4e1   : > { %v6527_v28 = vpop.eup %6526  ;;  %6528 = vrsqrt.f32 %v4075_v31  ;;  %vm4239_vm2 = vweird.f32 %v4075_v31 }
 0x4e2   : > { %v4248_v35 = vmul.f32 %v6525_v49, %v4247_v21  ;;  %v4254_v26 = vmul.f32 %v6527_v28, %v4077_v5  ;;  %vm4260_vm14 = vweird.f32 %v6527_v28 }
 0x4e3   : > { %vm4261_vm0 = vmor %vm4259_vm15, %vm4260_vm14 }
 0x4e4   : > { %v4252_v22 = vsel %vm4251_vm13, %v6525_v49, %v4248_v35  ;;  %v4255_v36 = vmul.f32 %v6527_v28, %v4254_v26  ;;  %v4000_v20 = vpop.xlane.xlu1 %3999 }
 0x4e5   : > { %v4428_v0 = vmul.f32 %v4252_v22, %v7907_v7  ;;  %v4046_v39 = vmul.f32 %v4000_v20, %v7759_v62 }
 0x4e6   : > { %v4256_v60 = vmul.f32 0.5, %v4255_v36  ;;  %v4002_v54 = vpop.xlane.xlu2 %4001 }
 0x4e7   : > { %v6529_v6 = vpop.eup %6528  ;;  %v4464_v17 = vmul.f32 %v7934_v51, %v4428_v0  ;;  %v4078_v52 = vadd.f32 1e-05, %v4046_v39  ;;  %v4047_v19 = vmul.f32 %v4002_v54, %v7759_v62 }
 0x4e8   : > { %v4257_v55 = vsub.f32 1.5, %v4256_v60  ;;  %v4234_v30 = vmul.f32 %v6529_v6, %v4075_v31  ;;  %vm4240_vm1 = vweird.f32 %v6529_v6 }
 0x4e9   : > { %v4500_v50 = vadd.f32 %v7940_v57, %v4464_v17  ;;  %6530 = vrsqrt.f32 %v4078_v52  ;;  %v4079_v10 = vadd.f32 1e-05, %v4047_v19  ;;  %vm4241_vm3 = vmor %vm4239_vm2, %vm4240_vm1  ;;  %vm4269_vm5 = vweird.f32 %v4078_v52 }
 0x4ea   : > { %v4258_v45 = vmul.f32 %v6527_v28, %v4257_v55  ;;  %v4235_v7 = vmul.f32 %v6529_v6, %v4234_v30 }
 0x4eb   : > { %4532 = vst [vmem:[%s7954_s29 + $0x78] sm:$0xff] %v4500_v50  ;;  %6532 = vrsqrt.f32 %v4079_v10  ;;  %vm4279_vm8 = vweird.f32 %v4079_v10 }
 0x4ec   : > { %v4262_v59 = vsel %vm4261_vm0, %v6527_v28, %v4258_v45  ;;  %v4236_v34 = vmul.f32 0.5, %v4235_v7 }
 0x4ed   : > { %v4429_v8 = vmul.f32 %v4262_v59, %v7919_v3 }
 0x4ee   : > { %v4237_v38 = vsub.f32 1.5, %v4236_v34  ;;  %v4004_v32 = vpop.xlane.xlu0 %4003 }
 0x4ef   : > { %v6531_v4 = vpop.eup %6530  ;;  %v4465_v42 = vmul.f32 %v7934_v51, %v4429_v8  ;;  %v4048_v1 = vmul.f32 %v4004_v32, %v7759_v62 }
 0x4f0   : > { %v4238_v13 = vmul.f32 %v6529_v6, %v4237_v38  ;;  %v4264_v9 = vmul.f32 %v6531_v4, %v4078_v52  ;;  %vm4270_vm4 = vweird.f32 %v6531_v4 }
 0x4f1   : > { %v6533_v43 = vpop.eup %6532  ;;  %v4501_v58 = vadd.f32 %v7940_v57, %v4465_v42  ;;  %v4080_v37 = vadd.f32 1e-05, %v4048_v1  ;;  %vm4271_vm7 = vmor %vm4269_vm5, %vm4270_vm4 }
 0x4f2   : > { %v4242_v49 = vsel %vm4241_vm3, %v6529_v6, %v4238_v13  ;;  %v4265_v29 = vmul.f32 %v6531_v4, %v4264_v9  ;;  %v4274_v3 = vmul.f32 %v6533_v43, %v4079_v10  ;;  %vm4280_vm6 = vweird.f32 %v6533_v43 }
 0x4f3   : > { %4533 = vst [vmem:[%s7954_s29 + $0x80] sm:$0xff] %v4501_v58  ;;  %v4427_v5 = vmul.f32 %v4242_v49, %v7928_v53  ;;  %6534 = vrsqrt.f32 %v4080_v37  ;;  %vm4281_vm9 = vmor %vm4279_vm8, %vm4280_vm6  ;;  %vm4289_vm11 = vweird.f32 %v4080_v37 }
 0x4f4   : > { %v4266_v40 = vmul.f32 0.5, %v4265_v29  ;;  %v4275_v44 = vmul.f32 %v6533_v43, %v4274_v3 }
 0x4f5   : > { %v4463_v11 = vmul.f32 %v7934_v51, %v4427_v5 }
 0x4f6   : > { %v4267_v12 = vsub.f32 1.5, %v4266_v40  ;;  %v4276_v16 = vmul.f32 0.5, %v4275_v44  ;;  %v4006_v56 = vpop.xlane.xlu1 %4005 }
 0x4f7   : > { %v4499_v31 = vadd.f32 %v7940_v57, %v4463_v11  ;;  %v4049_v21 = vmul.f32 %v4006_v56, %v7759_v62 }
 0x4f8   : > { %v4268_v28 = vmul.f32 %v6531_v4, %v4267_v12  ;;  %v4277_v35 = vsub.f32 1.5, %v4276_v16 }
 0x4f9   : > { %v6535_v26 = vpop.eup %6534  ;;  %4531 = vst [vmem:[%s7954_s29 + $0x70] sm:$0xff] %v4499_v31  ;;  %v4081_v53 = vadd.f32 1e-05, %v4049_v21 }
 0x4fa   : > { %v4272_v22 = vsel %vm4271_vm7, %v6531_v4, %v4268_v28  ;;  %v4278_v36 = vmul.f32 %v6533_v43, %v4277_v35  ;;  %v4284_v20 = vmul.f32 %v6535_v26, %v4080_v37  ;;  %vm4290_vm10 = vweird.f32 %v6535_v26 }
 0x4fb   : > { %v4430_v0 = vmul.f32 %v4272_v22, %v7937_v23  ;;  %6536 = vrsqrt.f32 %v4081_v53  ;;  %vm4291_vm12 = vmor %vm4289_vm11, %vm4290_vm10  ;;  %vm4299_vm14 = vweird.f32 %v4081_v53 }
 0x4fc   : > { %v4282_v39 = vsel %vm4281_vm9, %v6533_v43, %v4278_v36  ;;  %v4285_v60 = vmul.f32 %v6535_v26, %v4284_v20 }
 0x4fd   : > { %v4466_v54 = vmul.f32 %v7934_v51, %v4430_v0  ;;  %v4431_v6 = vmul.f32 %v4282_v39, %v7946_v33 }
 0x4fe   : > { %v4286_v17 = vmul.f32 0.5, %v4285_v60  ;;  %v4008_v52 = vpop.xlane.xlu2 %4007 }
 0x4ff   : > { %v4502_v19 = vadd.f32 %v7940_v57, %v4466_v54  ;;  %v4467_v55 = vmul.f32 %v7934_v51, %v4431_v6  ;;  %v4050_v30 = vmul.f32 %v4008_v52, %v7759_v62 }
 0x500   : > { %v4287_v50 = vsub.f32 1.5, %v4286_v17 }
 0x501   : > { %v6537_v23 = vpop.eup %6536  ;;  %4534 = vst [vmem:[%s7954_s29 + $0x88] sm:$0xff] %v4502_v19  ;;  %v4503_v10 = vadd.f32 %v7940_v57, %v4467_v55  ;;  %v4082_v45 = vadd.f32 1e-05, %v4050_v30 }
 0x502   : > { %v4288_v7 = vmul.f32 %v6535_v26, %v4287_v50  ;;  %v4294_v59 = vmul.f32 %v6537_v23, %v4081_v53  ;;  %vm4300_vm13 = vweird.f32 %v6537_v23 }
 0x503   : > { %4535 = vst [vmem:[%s7954_s29 + $0x90] sm:$0xff] %v4503_v10  ;;  %6538 = vrsqrt.f32 %v4082_v45  ;;  %vm4301_vm15 = vmor %vm4299_vm14, %vm4300_vm13  ;;  %vm4309_vm1 = vweird.f32 %v4082_v45 }
 0x504   : > { %v4292_v33 = vsel %vm4291_vm12, %v6535_v26, %v4288_v7  ;;  %v4295_v34 = vmul.f32 %v6537_v23, %v4294_v59 }
 0x505   : > { %v4432_v8 = vmul.f32 %v4292_v33, %v7961_v2 }
 0x506   : > { %v4296_v38 = vmul.f32 0.5, %v4295_v34  ;;  %v4010_v32 = vpop.xlane.xlu0 %4009 }
 0x507   : > { %v4468_v4 = vmul.f32 %v7934_v51, %v4432_v8  ;;  %v4051_v42 = vmul.f32 %v4010_v32, %v7759_v62 }
 0x508   : > { %v4297_v1 = vsub.f32 1.5, %v4296_v38 }
 0x509   : > { %v6539_v13 = vpop.eup %6538  ;;  %v4504_v9 = vadd.f32 %v7940_v57, %v4468_v4  ;;  %v4083_v43 = vadd.f32 1e-05, %v4051_v42 }
 0x50a   : > { %v4298_v58 = vmul.f32 %v6537_v23, %v4297_v1  ;;  %v4304_v37 = vmul.f32 %v6539_v13, %v4082_v45  ;;  %vm4310_vm0 = vweird.f32 %v6539_v13 }
 0x50b   : > { %4536 = vst [vmem:[%s7954_s29 + $0x98] sm:$0xff] %v4504_v9  ;;  %6540 = vrsqrt.f32 %v4083_v43  ;;  %vm4311_vm2 = vmor %vm4309_vm1, %vm4310_vm0  ;;  %vm4319_vm4 = vweird.f32 %v4083_v43 }
 0x50c   : > { %v4302_v2 = vsel %vm4301_vm15, %v6537_v23, %v4298_v58  ;;  %v4305_v49 = vmul.f32 %v6539_v13, %v4304_v37 }
 0x50d   : > { %v4433_v29 = vmul.f32 %v4302_v2, %v7972_v63 }
 0x50e   : > { %v4306_v3 = vmul.f32 0.5, %v4305_v49  ;;  %v4012_v5 = vpop.xlane.xlu1 %4011 }
 0x50f   : > { %v4469_v40 = vmul.f32 %v7934_v51, %v4433_v29  ;;  %v4052_v44 = vmul.f32 %v4012_v5, %v7759_v62 }
 0x510   : > { %v4307_v11 = vsub.f32 1.5, %v4306_v3  ;;  %v8151_v3 = vld [vmem:[#allocation8] ss:$0 sm:$0xff] }
 0x511   : > { %v6541_v12 = vpop.eup %6540  ;;  %v4505_v16 = vadd.f32 %v7940_v57, %v4469_v40  ;;  %v4084_v56 = vadd.f32 1e-05, %v4052_v44 }
 0x512   : > { %v4308_v31 = vmul.f32 %v6539_v13, %v4307_v11  ;;  %v4314_v21 = vmul.f32 %v6541_v12, %v4083_v43  ;;  %vm4320_vm3 = vweird.f32 %v6541_v12  ;;  %v8155_v11 = vld [vmem:[#allocation10] ss:$0 sm:$0xff] }
 0x513   : > { %4537 = vst [vmem:[%s7954_s29 + $0xa0] sm:$0xff] %v4505_v16  ;;  %6542 = vrsqrt.f32 %v4084_v56  ;;  %vm4321_vm5 = vmor %vm4319_vm4, %vm4320_vm3  ;;  %vm4329_vm7 = vweird.f32 %v4084_v56 }
 0x514   : > { %v4312_v63 = vsel %vm4311_vm2, %v6539_v13, %v4308_v31  ;;  %v4315_v28 = vmul.f32 %v6541_v12, %v4314_v21 }
 0x515   : > { %v4434_v35 = vmul.f32 %v4312_v63, %v7983_v18 }
 0x516   : > { %v4316_v26 = vmul.f32 0.5, %v4315_v28  ;;  %v4014_v53 = vpop.xlane.xlu2 %4013 }
 0x517   : > { %v4470_v22 = vmul.f32 %v7934_v51, %v4434_v35  ;;  %v4053_v36 = vmul.f32 %v4014_v53, %v7759_v62 }
 0x518   : > { %v4317_v20 = vsub.f32 1.5, %v4316_v26 }
 0x519   : > { %v6543_v0 = vpop.eup %6542  ;;  %v4506_v39 = vadd.f32 %v7940_v57, %v4470_v22  ;;  %v4085_v60 = vadd.f32 1e-05, %v4053_v36 }
 0x51a   : > { %v4318_v54 = vmul.f32 %v6541_v12, %v4317_v20  ;;  %v4324_v6 = vmul.f32 %v6543_v0, %v4084_v56  ;;  %vm4330_vm6 = vweird.f32 %v6543_v0 }
 0x51b   : > { %4538 = vst [vmem:[%s7954_s29 + $0xa8] sm:$0xff] %v4506_v39  ;;  %6544 = vrsqrt.f32 %v4085_v60  ;;  %vm4331_vm8 = vmor %vm4329_vm7, %vm4330_vm6  ;;  %vm4339_vm10 = vweird.f32 %v4085_v60 }
 0x51c   : > { %v4322_v18 = vsel %vm4321_vm5, %v6541_v12, %v4318_v54  ;;  %v4325_v17 = vmul.f32 %v6543_v0, %v4324_v6 }
 0x51d   : > { %v4435_v52 = vmul.f32 %v4322_v18, %v7994_v15 }
 0x51e   : > { %v4326_v19 = vmul.f32 0.5, %v4325_v17  ;;  %v4016_v55 = vpop.xlane.xlu0 %4015 }
 0x51f   : > { %v4471_v30 = vmul.f32 %v7934_v51, %v4435_v52  ;;  %v4054_v50 = vmul.f32 %v4016_v55, %v7759_v62 }
 0x520   : > { %v4327_v23 = vsub.f32 1.5, %v4326_v19 }
 0x521   : > { %v6545_v10 = vpop.eup %6544  ;;  %v4507_v45 = vadd.f32 %v7940_v57, %v4471_v30  ;;  %v4086_v7 = vadd.f32 1e-05, %v4054_v50 }
 0x522   : > { %v4328_v59 = vmul.f32 %v6543_v0, %v4327_v23  ;;  %v4334_v33 = vmul.f32 %v6545_v10, %v4085_v60  ;;  %vm4340_vm9 = vweird.f32 %v6545_v10 }
 0x523   : > { %4539 = vst [vmem:[%s7954_s29 + $0xb0] sm:$0xff] %v4507_v45  ;;  %6546 = vrsqrt.f32 %v4086_v7  ;;  %vm4341_vm11 = vmor %vm4339_vm10, %vm4340_vm9  ;;  %vm4349_vm13 = vweird.f32 %v4086_v7 }
 0x524   : > { %v4332_v15 = vsel %vm4331_vm8, %v6543_v0, %v4328_v59  ;;  %v4335_v34 = vmul.f32 %v6545_v10, %v4334_v33 }
 0x525   : > { %v4436_v8 = vmul.f32 %v4332_v15, %v8005_v27 }
 0x526   : > { %v4336_v38 = vmul.f32 0.5, %v4335_v34  ;;  %v4018_v32 = vpop.xlane.xlu1 %4017 }
 0x527   : > { %v4472_v4 = vmul.f32 %v7934_v51, %v4436_v8  ;;  %v4055_v42 = vmul.f32 %v4018_v32, %v7759_v62 }
 0x528   : > { %v4337_v1 = vsub.f32 1.5, %v4336_v38 }
 0x529   : > { %v6547_v13 = vpop.eup %6546  ;;  %v4508_v9 = vadd.f32 %v7940_v57, %v4472_v4  ;;  %v4087_v43 = vadd.f32 1e-05, %v4055_v42 }
 0x52a   : > { %v4338_v58 = vmul.f32 %v6545_v10, %v4337_v1  ;;  %v4344_v37 = vmul.f32 %v6547_v13, %v4086_v7  ;;  %vm4350_vm12 = vweird.f32 %v6547_v13 }
 0x52b   : > { %4540 = vst [vmem:[%s7954_s29 + $0xb8] sm:$0xff] %v4508_v9  ;;  %6548 = vrsqrt.f32 %v4087_v43  ;;  %vm4351_vm14 = vmor %vm4349_vm13, %vm4350_vm12  ;;  %vm4359_vm0 = vweird.f32 %v4087_v43 }
 0x52c   : > { %v4342_v2 = vsel %vm4341_vm11, %v6545_v10, %v4338_v58  ;;  %v4345_v27 = vmul.f32 %v6547_v13, %v4344_v37 }
 0x52d   : > { %v4437_v49 = vmul.f32 %v4342_v2, %v8016_v14 }
 0x52e   : > { %v4346_v51 = vmul.f32 0.5, %v4345_v27  ;;  %v4020_v29 = vpop.xlane.xlu2 %4019 }
 0x52f   : > { %v4473_v5 = vmul.f32 %v8151_v3, %v4437_v49  ;;  %v4056_v57 = vmul.f32 %v4020_v29, %v7759_v62 }
 0x530   : > { %v4347_v40 = vsub.f32 1.5, %v4346_v51 }
 0x531   : > { %v6549_v44 = vpop.eup %6548  ;;  %v4509_v12 = vadd.f32 %v8155_v11, %v4473_v5  ;;  %v4088_v16 = vadd.f32 1e-05, %v4056_v57 }
 0x532   : > { %v4348_v56 = vmul.f32 %v6547_v13, %v4347_v40  ;;  %v4354_v31 = vmul.f32 %v6549_v44, %v4087_v43  ;;  %vm4360_vm15 = vweird.f32 %v6549_v44 }
 0x533   : > { %4541 = vst [vmem:[%s7954_s29 + $0xc0] sm:$0xff] %v4509_v12  ;;  %6550 = vrsqrt.f32 %v4088_v16  ;;  %vm4361_vm1 = vmor %vm4359_vm0, %vm4360_vm15  ;;  %vm4369_vm3 = vweird.f32 %v4088_v16 }
 0x534   : > { %v4352_v14 = vsel %vm4351_vm14, %v6547_v13, %v4348_v56  ;;  %v4355_v21 = vmul.f32 %v6549_v44, %v4354_v31 }
 0x535   : > { %v4438_v63 = vmul.f32 %v4352_v14, %v8027_v25 }
 0x536   : > { %v4356_v28 = vmul.f32 0.5, %v4355_v21  ;;  %v4022_v35 = vpop.xlane.xlu0 %4021 }
 0x537   : > { %v4474_v26 = vmul.f32 %v8151_v3, %v4438_v63  ;;  %v4057_v53 = vmul.f32 %v4022_v35, %v7759_v62 }
 0x538   : > { %v4357_v22 = vsub.f32 1.5, %v4356_v28 }
 0x539   : > { %v6551_v36 = vpop.eup %6550  ;;  %v4510_v20 = vadd.f32 %v8155_v11, %v4474_v26  ;;  %v4089_v0 = vadd.f32 1e-05, %v4057_v53 }
 0x53a   : > { %v4358_v39 = vmul.f32 %v6549_v44, %v4357_v22  ;;  %v4364_v60 = vmul.f32 %v6551_v36, %v4088_v16  ;;  %vm4370_vm2 = vweird.f32 %v6551_v36 }
 0x53b   : > { %4542 = vst [vmem:[%s7954_s29 + $0xc8] sm:$0xff] %v4510_v20  ;;  %6552 = vrsqrt.f32 %v4089_v0  ;;  %vm4371_vm4 = vmor %vm4369_vm3, %vm4370_vm2  ;;  %vm4379_vm6 = vweird.f32 %v4089_v0 }
 0x53c   : > { %v4362_v25 = vsel %vm4361_vm1, %v6549_v44, %v4358_v39  ;;  %v4365_v54 = vmul.f32 %v6551_v36, %v4364_v60 }
 0x53d   : > { %v4439_v6 = vmul.f32 %v4362_v25, %v8038_v41 }
 0x53e   : > { %v4366_v18 = vmul.f32 0.5, %v4365_v54  ;;  %v4024_v17 = vpop.xlane.xlu1 %4023 }
 0x53f   : > { %v4475_v52 = vmul.f32 %v8151_v3, %v4439_v6  ;;  %v4058_v19 = vmul.f32 %v4024_v17, %v7759_v62 }
 0x540   : > { %v4367_v55 = vsub.f32 1.5, %v4366_v18 }
 0x541   : > { %v6553_v30 = vpop.eup %6552  ;;  %v4511_v50 = vadd.f32 %v8155_v11, %v4475_v52  ;;  %v4090_v23 = vadd.f32 1e-05, %v4058_v19 }
 0x542   : > { %v4368_v10 = vmul.f32 %v6551_v36, %v4367_v55  ;;  %v4374_v45 = vmul.f32 %v6553_v30, %v4089_v0  ;;  %vm4380_vm5 = vweird.f32 %v6553_v30 }
 0x543   : > { %4543 = vst [vmem:[%s7954_s29 + $0xd0] sm:$0xff] %v4511_v50  ;;  %6554 = vrsqrt.f32 %v4090_v23  ;;  %vm4381_vm7 = vmor %vm4379_vm6, %vm4380_vm5  ;;  %vm4389_vm9 = vweird.f32 %v4090_v23 }
 0x544   : > { %v4372_v41 = vsel %vm4371_vm4, %v6551_v36, %v4368_v10  ;;  %v4375_v7 = vmul.f32 %v6553_v30, %v4374_v45 }
 0x545   : > { %v4440_v59 = vmul.f32 %v4372_v41, %v8049_v46 }
 0x546   : > { %v4376_v33 = vmul.f32 0.5, %v4375_v7  ;;  %v4026_v15 = vpop.xlane.xlu2 %4025 }
 0x547   : > { %v4476_v34 = vmul.f32 %v8151_v3, %v4440_v59  ;;  %v4059_v8 = vmul.f32 %v4026_v15, %v7759_v62 }
 0x548   : > { %v4377_v38 = vsub.f32 1.5, %v4376_v33 }
 0x549   : > { %v6555_v32 = vpop.eup %6554  ;;  %v4512_v4 = vadd.f32 %v8155_v11, %v4476_v34  ;;  %v4091_v42 = vadd.f32 1e-05, %v4059_v8 }
 0x54a   : > { %v4378_v1 = vmul.f32 %v6553_v30, %v4377_v38  ;;  %v4384_v13 = vmul.f32 %v6555_v32, %v4090_v23  ;;  %vm4390_vm8 = vweird.f32 %v6555_v32 }
 0x54b   : > { %4544 = vst [vmem:[%s7954_s29 + $0xd8] sm:$0xff] %v4512_v4  ;;  %6556 = vrsqrt.f32 %v4091_v42  ;;  %vm4391_vm10 = vmor %vm4389_vm9, %vm4390_vm8  ;;  %vm4399_vm12 = vweird.f32 %v4091_v42 }
 0x54c   : > { %v4382_v46 = vsel %vm4381_vm7, %v6553_v30, %v4378_v1  ;;  %v4385_v9 = vmul.f32 %v6555_v32, %v4384_v13 }
 0x54d   : > { %v4441_v43 = vmul.f32 %v4382_v46, %v8060_v61 }
 0x54e   : > { %v4386_v58 = vmul.f32 0.5, %v4385_v9  ;;  %v4028_v37 = vpop.xlane.xlu0 %4027 }
 0x54f   : > { %v4477_v2 = vmul.f32 %v8151_v3, %v4441_v43  ;;  %v4060_v27 = vmul.f32 %v4028_v37, %v7759_v62 }
 0x550   : > { %v4387_v49 = vsub.f32 1.5, %v4386_v58 }
 0x551   : > { %v6557_v51 = vpop.eup %6556  ;;  %v4513_v29 = vadd.f32 %v8155_v11, %v4477_v2  ;;  %v4092_v5 = vadd.f32 1e-05, %v4060_v27 }
 0x552   : > { %v4388_v57 = vmul.f32 %v6555_v32, %v4387_v49  ;;  %v4394_v40 = vmul.f32 %v6557_v51, %v4091_v42  ;;  %vm4400_vm11 = vweird.f32 %v6557_v51 }
 0x553   : > { %4545 = vst [vmem:[%s7954_s29 + $0xe0] sm:$0xff] %v4513_v29  ;;  %6558 = vrsqrt.f32 %v4092_v5  ;;  %vm4401_vm13 = vmor %vm4399_vm12, %vm4400_vm11  ;;  %vm4409_vm15 = vweird.f32 %v4092_v5 }
 0x554   : > { %v4392_v61 = vsel %vm4391_vm10, %v6555_v32, %v4388_v57  ;;  %v4395_v44 = vmul.f32 %v6557_v51, %v4394_v40 }
 0x555   : > { %v4442_v12 = vmul.f32 %v4392_v61, %v8071_v24 }
 0x556   : > { %v4396_v16 = vmul.f32 0.5, %v4395_v44 }
 0x557   : > { %v4478_v62 = vmul.f32 %v8151_v3, %v4442_v12 }
 0x558   : > { %v4397_v56 = vsub.f32 1.5, %v4396_v16 }
 0x559   : > { %v6559_v31 = vpop.eup %6558  ;;  %v4514_v14 = vadd.f32 %v8155_v11, %v4478_v62 }
 0x55a   : > { %v4398_v21 = vmul.f32 %v6557_v51, %v4397_v56  ;;  %v4404_v63 = vmul.f32 %v6559_v31, %v4092_v5  ;;  %vm4410_vm14 = vweird.f32 %v6559_v31 }
 0x55b   : > { %4546 = vst [vmem:[%s7954_s29 + $0xe8] sm:$0xff] %v4514_v14  ;;  %vm4411_vm0 = vmor %vm4409_vm15, %vm4410_vm14 }
 0x55c   : > { %v4402_v28 = vsel %vm4401_vm13, %v6557_v51, %v4398_v21  ;;  %v4405_v35 = vmul.f32 %v6559_v31, %v4404_v63 }
 0x55d   : > { %v4443_v24 = vmul.f32 %v4402_v28, %v8081_v47 }
 0x55e   : > { %v4406_v26 = vmul.f32 0.5, %v4405_v35 }
 0x55f   : > { %v4479_v53 = vmul.f32 %v8151_v3, %v4443_v24 }
 0x560   : > { %v4407_v22 = vsub.f32 1.5, %v4406_v26 }
 0x561   : > { %v4515_v36 = vadd.f32 %v8155_v11, %v4479_v53 }
 0x562   : > { %v4408_v20 = vmul.f32 %v6559_v31, %v4407_v22 }
 0x563   : > { %4547 = vst [vmem:[%s7954_s29 + $0xf0] sm:$0xff] %v4515_v36 }
 0x564   : > { %v4412_v47 = vsel %vm4411_vm0, %v6559_v31, %v4408_v20 }
 0x565   : > { %v4444_v0 = vmul.f32 %v4412_v47, %v8092_v48 }
 0x567   : > { %v4480_v39 = vmul.f32 %v8151_v3, %v4444_v0 }
 0x569   : > { %v4516_v60 = vadd.f32 %v8155_v11, %v4480_v39 }
 0x56b   : > { %4548 = vst [vmem:[%s7954_s29 + $0xf8] sm:$0xff] %v4516_v60 }
 0x56c   : > { %6739 = shalt.err (!%p6736_p10)
}
 0x56d   : > { %s6797_s1 = smov 128   ;;  %s6798_s8 = smov 8  }
 0x56e   : > { %6415 = dma.vmem_to_hbm [thread:$0]  (%p6912_p0), %s4563_s10, 4096, %s4565_s22, %s4550_s11, %s6797_s1, %s6797_s1, %s6798_s8  }
 0x56f PF: > { %p6447_p11 = scmp.ge.s32.totalorder %s6786_s21, 2  ;;  %s4579_s24 = sand.u32 1, %s6774_s18  }
 0x570   : > { %s4580_s29 = scalar_lea.sflag [#allocation4], %s4579_s24 }
 0x571   : > { %p6435_p12 = pnand %p6447_p11, %p6864_p6 }
 0x573   : > { %p6436_p13 = pneg %p6435_p12 }
 0x575   : > { %6769 = dma.done.wait (%p6436_p13), %s4580_s29, 4096  }
 0x576   : > { %6771 = vsyncadd (%p6436_p13), %s4580_s29, 4294963200  ;;  %p20_p3 = scmp.ge.s32.totalorder %s6902_s9, 6   ;;  %s8238_s18 = smov %s6778_s19 }
 0x577   : > { %s8239_s19 = smov %s6782_s20  ;;  %s8240_s20 = smov %s6918_s13 }
 0x578   : > { %s8241_s21 = smov %s6902_s9  ;;  %22 = sbr.rel (!%p20_p3) target bundleno = 9 (0x9), region = 101 }
 0x57d   :  { %4586 = vsyncpa [#allocation3], 1 }
 0x57e   :  { %4588 = vsyncpa [#allocation3 + $0x1], 1 }
 0x57f   :  { %4589 = vsyncpa [#allocation6], 1 }
 0x580   :  { %4590 = vsyncpa [#allocation9], 1 }
 0x581   :  { %4591 = vsyncpa [#allocation4], 1 }
 0x582   :  { %4593 = vsyncpa [#allocation4 + $0x1], 1 }

</bundles_post_ra>
